<compile_context>
chip_gen: v7x
topology: tpu7x:2x2x1
jax: 0.10.0
libtpu: 0.0.40
codegen_flags: <defaults>
</compile_context>

<pallas_src>
import jax
import jax.numpy as jnp
from jax.experimental import pallas as pl
from jax.experimental.pallas import tpu as pltpu

MID = 500          # logical hidden width (matches the PyTorch module)
MID_PAD = 512      # padded to a multiple of 128 lanes
IN_DIM = 8
IN_PAD = 16        # K padded 8 -> 16 for bf16 sublane packing (zero rows)
OUT_DIM = 1


def _round_up(x, m):
    return (x + m - 1) // m * m


def _elementwise_bf16_ok():
    """bf16 bias/sigmoid only where the VPU/EUP support bf16 (v6e/v7x+)."""
    try:
        kind = jax.devices()[0].device_kind.lower()
    except Exception:
        return False
    return not any(g in kind for g in ("v2", "v3", "v4", "v5"))


def _choose_tb(B, tb_max=1024):
    """Batch tile: multiple of 256, <= tb_max, >=2 grid steps when B allows
    (v7x megacore), while keeping batch padding waste small."""
    Bp = _round_up(max(B, 1), 256)
    half = (Bp // 2) // 256 * 256
    return min(tb_max, max(256, half))


def _dense_sigmoid(a_bf16, w_ref, b_ref):
    """sigmoid(a @ W + b) with bf16 MXU matmul and f32 accumulation.

    The elementwise tail runs in the bias dtype: bf16 on v6e/v7x (halves VPU
    vreg traffic, removes the separate cast), f32 on v5e where the divide is
    routed to the EUP via approx reciprocal.  Returns bf16 for the next MXU.
    """
    acc = jnp.dot(a_bf16, w_ref[...], preferred_element_type=jnp.float32)
    b = b_ref[...]
    h = acc.astype(b.dtype) + b
    e = jnp.exp(-h)
    if h.dtype == jnp.float32:                      # v5e path
        s = pl.reciprocal(1.0 + e, approx=True)     # EUP divide, f32
        return s.astype(jnp.bfloat16)
    return 1.0 / (1.0 + e)                          # bf16 end-to-end (v6e/v7x)


def _mlp_kernel(x_ref, w1_ref, b1_ref, w2_ref, b2_ref, w3_ref, b3_ref,
                w4t_ref, b4_ref, o_ref):
    x = x_ref[...].astype(jnp.bfloat16)             # (TB, 16)

    h = _dense_sigmoid(x, w1_ref, b1_ref)           # (TB, 512) bf16
    h = _dense_sigmoid(h, w2_ref, b2_ref)
    h = _dense_sigmoid(h, w3_ref, b3_ref)

    # Layer 4 (N=1): VPU multiply + lane reduce.  w4t is f32 so the product
    # (bf16 * f32 -> f32) and the reduction accumulate in f32.
    o_ref[...] = (jnp.sum(h * w4t_ref[...], axis=-1, keepdims=True)
                  + b4_ref[...])                    # (TB, 1) f32


def nw_forward(x, prepared_params, *, tb=None):
    """Pallas forward pass. x: (B, 8) f32 -> (B, 1) f32."""
    w1, b1, w2, b2, w3, b3, w4t, b4 = prepared_params
    B = x.shape[0]
    if tb is None:
        tb = _choose_tb(B)
    else:
        tb = max(256, min(_round_up(tb, 256), _round_up(B, 256)))
    Bp = _round_up(B, tb)
    x = jnp.pad(x, ((0, Bp - B), (0, IN_PAD - x.shape[1])))
    grid = (Bp // tb,)

    const = lambda i: (0, 0)               # resident operands: DMA'd once
    out = pl.pallas_call(
        _mlp_kernel,
        out_shape=jax.ShapeDtypeStruct((Bp, OUT_DIM), jnp.float32),
        grid=grid,
        in_specs=[
            pl.BlockSpec((tb, IN_PAD), lambda i: (i, 0)),          # x tile
            pl.BlockSpec((IN_PAD, MID_PAD), const),                # w1 (bf16)
            pl.BlockSpec((1, MID_PAD), const),                     # b1
            pl.BlockSpec((MID_PAD, MID_PAD), const),               # w2 (bf16)
            pl.BlockSpec((1, MID_PAD), const),                     # b2
            pl.BlockSpec((MID_PAD, MID_PAD), const),               # w3 (bf16)
            pl.BlockSpec((1, MID_PAD), const),                     # b3
            pl.BlockSpec((1, MID_PAD), const),                     # w4^T (f32)
            pl.BlockSpec((1, 1), const),                           # b4
        ],
        out_specs=pl.BlockSpec((tb, OUT_DIM), lambda i: (i, 0)),
        compiler_params=pltpu.CompilerParams(
            dimension_semantics=("parallel",),
        ),
    )(x, w1, b1, w2, b2, w3, b3, w4t, b4)
    return out[:B]


def init_params(key):
    """Deterministic init mimicking torch.nn.Linear defaults:
    U(-1/sqrt(fan_in), 1/sqrt(fan_in)). Weights stored (in, out), biases (1, out)."""
    dims = [(IN_DIM, MID), (MID, MID), (MID, MID), (MID, OUT_DIM)]
    params = []
    for (fan_in, fan_out) in dims:
        key, kw, kb = jax.random.split(key, 3)
        bound = 1.0 / jnp.sqrt(jnp.float32(fan_in))
        w = jax.random.uniform(kw, (fan_in, fan_out), jnp.float32, -bound, bound)
        b = jax.random.uniform(kb, (1, fan_out), jnp.float32, -bound, bound)
        params += [w, b]
    return tuple(params)


def prepare_params(params, *, bf16_elemwise=None):
    """Zero-pad hidden 500->512 and K 8->16, transpose w4 to a lane-dense row,
    cast all weight matrices to bf16 for the MXU, and (on bf16-VPU chips) the
    hidden-layer biases to bf16 so the elementwise tail runs in bf16."""
    if bf16_elemwise is None:
        bf16_elemwise = _elementwise_bf16_ok()
    bias_dt = jnp.bfloat16 if bf16_elemwise else jnp.float32

    w1, b1, w2, b2, w3, b3, w4, b4 = params
    pk = IN_PAD - IN_DIM
    pm = MID_PAD - MID
    w1p = jnp.pad(w1, ((0, pk), (0, pm))).astype(jnp.bfloat16)   # (16, 512)
    b1p = jnp.pad(b1, ((0, 0), (0, pm))).astype(bias_dt)         # (1, 512)
    w2p = jnp.pad(w2, ((0, pm), (0, pm))).astype(jnp.bfloat16)   # (512, 512)
    b2p = jnp.pad(b2, ((0, 0), (0, pm))).astype(bias_dt)         # (1, 512)
    w3p = jnp.pad(w3, ((0, pm), (0, pm))).astype(jnp.bfloat16)   # (512, 512)
    b3p = jnp.pad(b3, ((0, 0), (0, pm))).astype(bias_dt)         # (1, 512)
    w4t = jnp.pad(w4.T, ((0, 0), (0, pm)))                       # (1, 512) f32
    return (w1p, b1p, w2p, b2p, w3p, b3p, w4t, b4)


def reference_forward(x, params):
    w1, b1, w2, b2, w3, b3, w4, b4 = params
    h = jax.nn.sigmoid(x @ w1 + b1)
    h = jax.nn.sigmoid(h @ w2 + b2)
    h = jax.nn.sigmoid(h @ w3 + b3)
    return h @ w4 + b4


if __name__ == "__main__":
    key = jax.random.PRNGKey(0)
    key, kx = jax.random.split(key)
    batch = 300  # deliberately not a multiple of the tile -> exercises pad/trim
    x = jax.random.normal(kx, (batch, IN_DIM), jnp.float32)

    params = init_params(key)
    prepared = prepare_params(params)

    out = nw_forward(x, prepared)
    out = jax.block_until_ready(out)

    ref = reference_forward(x, params)
    assert out.shape == (batch, OUT_DIM)
    # Mid layers run in bf16 on the MXU (f32 accumulation) and, on v6e/v7x,
    # the bias/sigmoid chain is bf16 too -> compare against the pure-f32
    # reference with a deliberately relaxed tolerance.
    err = float(jnp.max(jnp.abs(out - ref)))
    assert jnp.allclose(out, ref, atol=2e-2, rtol=2e-2), err
    print("KERNEL_OK")
</pallas_src>

<mosaic_0001>
module attributes {stable_mosaic.version = 11 : i64} {
  func.func @_mlp_kernel(%arg0: i32, %arg1: memref<256x16xf32, #tpu.memory_space<vmem>>, %arg2: memref<16x512xbf16, #tpu.memory_space<vmem>>, %arg3: memref<1x512xbf16, #tpu.memory_space<vmem>>, %arg4: memref<512x512xbf16, #tpu.memory_space<vmem>>, %arg5: memref<1x512xbf16, #tpu.memory_space<vmem>>, %arg6: memref<512x512xbf16, #tpu.memory_space<vmem>>, %arg7: memref<1x512xbf16, #tpu.memory_space<vmem>>, %arg8: memref<1x512xf32, #tpu.memory_space<vmem>>, %arg9: memref<1x1xf32, #tpu.memory_space<vmem>>, %arg10: memref<256x1xf32, #tpu.memory_space<vmem>>) attributes {dimension_semantics = [#tpu.dimension_semantics<parallel>], iteration_bounds = array<i64: 2>, scalar_prefetch = 0 : i64, scratch_operands = 0 : i64, tpu.core_type = #tpu.core_type<tc>, window_params = [{transform_indices = @transform_0, window_bounds = array<i64: 256, 16>}, {pipeline_mode = #tpu.pipeline_mode<synchronous>, transform_indices = @transform_1, window_bounds = array<i64: 16, 512>}, {pipeline_mode = #tpu.pipeline_mode<synchronous>, transform_indices = @transform_2, window_bounds = array<i64: 1, 512>}, {pipeline_mode = #tpu.pipeline_mode<synchronous>, transform_indices = @transform_3, window_bounds = array<i64: 512, 512>}, {pipeline_mode = #tpu.pipeline_mode<synchronous>, transform_indices = @transform_4, window_bounds = array<i64: 1, 512>}, {pipeline_mode = #tpu.pipeline_mode<synchronous>, transform_indices = @transform_5, window_bounds = array<i64: 512, 512>}, {pipeline_mode = #tpu.pipeline_mode<synchronous>, transform_indices = @transform_6, window_bounds = array<i64: 1, 512>}, {pipeline_mode = #tpu.pipeline_mode<synchronous>, transform_indices = @transform_7, window_bounds = array<i64: 1, 512>}, {pipeline_mode = #tpu.pipeline_mode<synchronous>, transform_indices = @transform_8, window_bounds = array<i64: 1, 1>}, {transform_indices = @transform_9, window_bounds = array<i64: 256, 1>}]} {
    %c0 = arith.constant 0 : index
    %c0_0 = arith.constant 0 : index
    %0 = vector.load %arg1[%c0, %c0_0] : memref<256x16xf32, #tpu.memory_space<vmem>>, vector<256x16xf32>
    %1 = arith.truncf %0 : vector<256x16xf32> to vector<256x16xbf16>
    %c0_1 = arith.constant 0 : index
    %c0_2 = arith.constant 0 : index
    %2 = vector.load %arg2[%c0_1, %c0_2] : memref<16x512xbf16, #tpu.memory_space<vmem>>, vector<16x512xbf16>
    %cst = arith.constant dense<0.000000e+00> : vector<256x512xf32>
    %3 = tpu.matmul %1, %2, %cst {dimension_numbers = #tpu.dot_dimension_numbers<[1], [0], [0], [1], [0, 0, 1, 1], [], []>} : vector<256x16xbf16>, vector<16x512xbf16>, vector<256x512xf32> -> vector<256x512xf32>
    %c0_3 = arith.constant 0 : index
    %c0_4 = arith.constant 0 : index
    %4 = vector.load %arg3[%c0_3, %c0_4] : memref<1x512xbf16, #tpu.memory_space<vmem>>, vector<1x512xbf16>
    %5 = arith.truncf %3 : vector<256x512xf32> to vector<256x512xbf16>
    %6 = vector.broadcast %4 : vector<1x512xbf16> to vector<256x512xbf16>
    %7 = arith.addf %5, %6 : vector<256x512xbf16>
    %cst_5 = arith.constant 0.000000e+00 : bf16
    %8 = vector.broadcast %cst_5 : bf16 to vector<256x512xbf16>
    %9 = arith.subf %8, %7 : vector<256x512xbf16>
    %10 = math.exp %9 : vector<256x512xbf16>
    %cst_6 = arith.constant 1.000000e+00 : bf16
    %11 = vector.broadcast %cst_6 : bf16 to vector<256x512xbf16>
    %12 = arith.addf %11, %10 : vector<256x512xbf16>
    %cst_7 = arith.constant 1.000000e+00 : bf16
    %13 = vector.broadcast %cst_7 : bf16 to vector<256x512xbf16>
    %14 = arith.divf %13, %12 : vector<256x512xbf16>
    %c0_8 = arith.constant 0 : index
    %c0_9 = arith.constant 0 : index
    %15 = vector.load %arg4[%c0_8, %c0_9] : memref<512x512xbf16, #tpu.memory_space<vmem>>, vector<512x512xbf16>
    %cst_10 = arith.constant dense<0.000000e+00> : vector<256x512xf32>
    %16 = tpu.matmul %14, %15, %cst_10 {dimension_numbers = #tpu.dot_dimension_numbers<[1], [0], [0], [1], [0, 0, 1, 1], [], []>} : vector<256x512xbf16>, vector<512x512xbf16>, vector<256x512xf32> -> vector<256x512xf32>
    %c0_11 = arith.constant 0 : index
    %c0_12 = arith.constant 0 : index
    %17 = vector.load %arg5[%c0_11, %c0_12] : memref<1x512xbf16, #tpu.memory_space<vmem>>, vector<1x512xbf16>
    %18 = arith.truncf %16 : vector<256x512xf32> to vector<256x512xbf16>
    %19 = vector.broadcast %17 : vector<1x512xbf16> to vector<256x512xbf16>
    %20 = arith.addf %18, %19 : vector<256x512xbf16>
    %cst_13 = arith.constant 0.000000e+00 : bf16
    %21 = vector.broadcast %cst_13 : bf16 to vector<256x512xbf16>
    %22 = arith.subf %21, %20 : vector<256x512xbf16>
    %23 = math.exp %22 : vector<256x512xbf16>
    %cst_14 = arith.constant 1.000000e+00 : bf16
    %24 = vector.broadcast %cst_14 : bf16 to vector<256x512xbf16>
    %25 = arith.addf %24, %23 : vector<256x512xbf16>
    %cst_15 = arith.constant 1.000000e+00 : bf16
    %26 = vector.broadcast %cst_15 : bf16 to vector<256x512xbf16>
    %27 = arith.divf %26, %25 : vector<256x512xbf16>
    %c0_16 = arith.constant 0 : index
    %c0_17 = arith.constant 0 : index
    %28 = vector.load %arg6[%c0_16, %c0_17] : memref<512x512xbf16, #tpu.memory_space<vmem>>, vector<512x512xbf16>
    %cst_18 = arith.constant dense<0.000000e+00> : vector<256x512xf32>
    %29 = tpu.matmul %27, %28, %cst_18 {dimension_numbers = #tpu.dot_dimension_numbers<[1], [0], [0], [1], [0, 0, 1, 1], [], []>} : vector<256x512xbf16>, vector<512x512xbf16>, vector<256x512xf32> -> vector<256x512xf32>
    %c0_19 = arith.constant 0 : index
    %c0_20 = arith.constant 0 : index
    %30 = vector.load %arg7[%c0_19, %c0_20] : memref<1x512xbf16, #tpu.memory_space<vmem>>, vector<1x512xbf16>
    %31 = arith.truncf %29 : vector<256x512xf32> to vector<256x512xbf16>
    %32 = vector.broadcast %30 : vector<1x512xbf16> to vector<256x512xbf16>
    %33 = arith.addf %31, %32 : vector<256x512xbf16>
    %cst_21 = arith.constant 0.000000e+00 : bf16
    %34 = vector.broadcast %cst_21 : bf16 to vector<256x512xbf16>
    %35 = arith.subf %34, %33 : vector<256x512xbf16>
    %36 = math.exp %35 : vector<256x512xbf16>
    %cst_22 = arith.constant 1.000000e+00 : bf16
    %37 = vector.broadcast %cst_22 : bf16 to vector<256x512xbf16>
    %38 = arith.addf %37, %36 : vector<256x512xbf16>
    %cst_23 = arith.constant 1.000000e+00 : bf16
    %39 = vector.broadcast %cst_23 : bf16 to vector<256x512xbf16>
    %40 = arith.divf %39, %38 : vector<256x512xbf16>
    %c0_24 = arith.constant 0 : index
    %c0_25 = arith.constant 0 : index
    %41 = vector.load %arg8[%c0_24, %c0_25] : memref<1x512xf32, #tpu.memory_space<vmem>>, vector<1x512xf32>
    %42 = arith.extf %40 : vector<256x512xbf16> to vector<256x512xf32>
    %43 = vector.broadcast %41 : vector<1x512xf32> to vector<256x512xf32>
    %44 = arith.mulf %42, %43 : vector<256x512xf32>
    %cst_26 = arith.constant dense<0.000000e+00> : vector<256xf32>
    %45 = vector.multi_reduction <add>, %44, %cst_26 [1] : vector<256x512xf32> to vector<256xf32>
    %46 = vector.shape_cast %45 : vector<256xf32> to vector<256x1xf32>
    %c0_27 = arith.constant 0 : index
    %c0_28 = arith.constant 0 : index
    %47 = vector.load %arg9[%c0_27, %c0_28] : memref<1x1xf32, #tpu.memory_space<vmem>>, vector<1x1xf32>
    %48 = vector.broadcast %47 : vector<1x1xf32> to vector<256x1xf32>
    %49 = arith.addf %46, %48 : vector<256x1xf32>
    %c0_29 = arith.constant 0 : index
    %c0_30 = arith.constant 0 : index
    %50 = vector.load %arg10[%c0_29, %c0_30] : memref<256x1xf32, #tpu.memory_space<vmem>>, vector<256x1xf32>
    tpu.vector_store %arg10[%c0_29, %c0_30], %49 {strides = array<i32>} : memref<256x1xf32, #tpu.memory_space<vmem>>, vector<256x1xf32>,
    return
  }
  func.func @transform_0(%arg0: i32) -> (i32, i32) {
    %c0_i32 = arith.constant 0 : i32
    %c0_i32_0 = arith.constant 0 : i32
    return %arg0, %c0_i32 : i32, i32
  }
  func.func @transform_1(%arg0: i32) -> (i32, i32) {
    %c0_i32 = arith.constant 0 : i32
    %c0_i32_0 = arith.constant 0 : i32
    %c0_i32_1 = arith.constant 0 : i32
    return %c0_i32, %c0_i32_0 : i32, i32
  }
  func.func @transform_2(%arg0: i32) -> (i32, i32) {
    %c0_i32 = arith.constant 0 : i32
    %c0_i32_0 = arith.constant 0 : i32
    %c0_i32_1 = arith.constant 0 : i32
    return %c0_i32, %c0_i32_0 : i32, i32
  }
  func.func @transform_3(%arg0: i32) -> (i32, i32) {
    %c0_i32 = arith.constant 0 : i32
    %c0_i32_0 = arith.constant 0 : i32
    %c0_i32_1 = arith.constant 0 : i32
    return %c0_i32, %c0_i32_0 : i32, i32
  }
  func.func @transform_4(%arg0: i32) -> (i32, i32) {
    %c0_i32 = arith.constant 0 : i32
    %c0_i32_0 = arith.constant 0 : i32
    %c0_i32_1 = arith.constant 0 : i32
    return %c0_i32, %c0_i32_0 : i32, i32
  }
  func.func @transform_5(%arg0: i32) -> (i32, i32) {
    %c0_i32 = arith.constant 0 : i32
    %c0_i32_0 = arith.constant 0 : i32
    %c0_i32_1 = arith.constant 0 : i32
    return %c0_i32, %c0_i32_0 : i32, i32
  }
  func.func @transform_6(%arg0: i32) -> (i32, i32) {
    %c0_i32 = arith.constant 0 : i32
    %c0_i32_0 = arith.constant 0 : i32
    %c0_i32_1 = arith.constant 0 : i32
    return %c0_i32, %c0_i32_0 : i32, i32
  }
  func.func @transform_7(%arg0: i32) -> (i32, i32) {
    %c0_i32 = arith.constant 0 : i32
    %c0_i32_0 = arith.constant 0 : i32
    %c0_i32_1 = arith.constant 0 : i32
    return %c0_i32, %c0_i32_0 : i32, i32
  }
  func.func @transform_8(%arg0: i32) -> (i32, i32) {
    %c0_i32 = arith.constant 0 : i32
    %c0_i32_0 = arith.constant 0 : i32
    %c0_i32_1 = arith.constant 0 : i32
    return %c0_i32, %c0_i32_0 : i32, i32
  }
  func.func @transform_9(%arg0: i32) -> (i32, i32) {
    %c0_i32 = arith.constant 0 : i32
    %c0_i32_0 = arith.constant 0 : i32
    return %arg0, %c0_i32 : i32, i32
  }
}

</mosaic_0001>

<bundles_post_ra>
// kernel: tpu_custom_call.1
= control target key start
LH: loop header
LB: loop body
LE: loop exit
PB: predicated region body
PF: predicated region fallthrough
CT: control target
= control target key end

     0   :  { %s10127_s0 = inlined_call_operand.vmem [shape: f32[512,16], index: 0, kind: input, shape index: {}]   ;;  %s10128_s1 = inlined_call_operand.vmem [shape: bf16[16,512], index: 1, kind: input, shape index: {}]   ;;  %s10129_s2 = inlined_call_operand.vmem [shape: bf16[1,512], index: 2, kind: input, shape index: {}]   ;;  %s10130_s3 = inlined_call_operand.hbm [shape: bf16[512,512], index: 3, kind: input, shape index: {}]   ;;  %s10131_s4 = inlined_call_operand.vmem [shape: bf16[1,512], index: 4, kind: input, shape index: {}]   ;;  %s10132_s5 = inlined_call_operand.hbm [shape: bf16[512,512], index: 5, kind: input, shape index: {}]   ;;  %s10133_s6 = inlined_call_operand.vmem [shape: bf16[1,512], index: 6, kind: input, shape index: {}]   ;;  %s10134_s7 = inlined_call_operand.vmem [shape: f32[1,512], index: 7, kind: input, shape index: {}]   ;;  %s10135_s8 = inlined_call_operand.<no memory space> [shape: f32[1,1], index: 8, kind: input, shape index: {}]   ;;  %s10136_s9 = inlined_call_operand.vmem [shape: f32[512,1], index: 9, kind: output, shape index: {}]  }
   0x1   :  { %v14_v0 = vstv %s10135_s8 }
   0x2   :  { %15 = vst [vmem:[#allocation2] sm:$0x1] %v14_v0 }
   0x3   :  { %16 = vsyncpa [#allocation4], 0 }
   0x4   :  { %17 = vsyncpa [#allocation6], 0  ;;  %s8324_s11 = smov 0  }
   0x5 LB: > { %s6435_s12 = sadd.s32 4294967295, %s8263_s11   ;;  %p6437_p0 = scmp.ge.s32.totalorder %s8263_s11, 1  ;;  %s8263_s11 = sphi %s8324_s11, %s23_s11  }
   0x6   : > { %p248_p1 = scmp.lt.s32.totalorder %s8263_s11, 3  ;;  %s8265_s13 = smov [#allocation3]  }
   0x7   : > { %s266_s14 = sshll.u32 %s8265_s13, 4  ;;  %p8338_p3 = scmp.eq.s32.totalorder %s6435_s12, 0  ;;  %s267_s14 = int_to_ptr.vmem [resolvable:$true] %s266_s14 }
   0x8   : > { %p8332_p2 = pnand %p6437_p0, %p248_p1  ;;  %s8266_s16 = smov [#allocation5]  }
   0x9   : > { %s10188_s15 = scalar_select %p8338_p3, 1, 0 }
   0xa   : > { %s10187_s8 = scalar_select %p8332_p2, 1, 0 }
   0xb   : > { %p7010_p4 = pneg %p8332_p2  ;;  %s282_s17 = sshll.u32 %s8266_s16, 4  ;;  %s8350_s17 = int_to_ptr.vmem [resolvable:$true] %s282_s17 }
   0xc   : > { %s8193_s21 = scalar_lea.hbm %s10130_s3, 16384 }
   0xd   : > { %p8346_p5 = pnand %p8338_p3, %p7010_p4  ;;  %p8194_p6 = scmp.ne.s32.totalorder %s10130_s3, %s8193_s21 }
   0xe   : > { %p8200_p10 = scmp.lt.u32.totalorder %s8193_s21, %s10130_s3 }
   0xf   : > { %p8195_p7 = pneg %p8346_p5 }
  0x11   : > { %p8196_p8 = pnand %p8195_p7, %p8194_p6 }
  0x13   : > { %p8197_p9 = pneg %p8196_p8 }
  0x15   : > { %p8202_p11 = pnand %p8200_p10, %p8197_p9 }
  0x17   : > { %8205 = shalt.err (!%p8202_p11)
}
  0x18   : > { %s8206_s26 = scalar_lea.vmem %s267_s14, 16384  ;;  %p8214_p1 = scmp.lt.s32.totalorder %s267_s14, %s267_s14 }
  0x19   : > { %p8207_p12 = scmp.ne.s32.totalorder %s267_s14, %s8206_s26  ;;  %p8215_p4 = scmp.lt.s32.totalorder %s8206_s26, %s8206_s26 }
  0x1b   : > { %p8209_p13 = pnand %p8207_p12, %p8195_p7  ;;  %p8216_p3 = por %p8215_p4, %p8214_p1 }
  0x1d   : > { %p8210_p0 = pneg %p8209_p13 }
  0x1f   : > { %p8217_p2 = pnand %p8216_p3, %p8210_p0 }
  0x21   : > { %8220 = shalt.err (!%p8217_p2)
}
  0x22   : > { %s8267_s27 = smov 256   ;;  %s8268_s28 = smov 16  }
  0x23   : > { %7013 = dma.hbm_to_vmem [thread:$0]  (!%p8346_p5), %s10130_s3, 16384, %s267_s14, [#allocation4], %s8267_s27, %s8267_s27, %s8268_s28  }
  0x24   : > { %s8221_s16 = scalar_lea.hbm %s10132_s5, 16384 }
  0x25   : > { %p8222_p6 = scmp.ne.s32.totalorder %s10132_s5, %s8221_s16  ;;  %p8228_p8 = scmp.lt.u32.totalorder %s8221_s16, %s10132_s5 }
  0x27   : > { %p8224_p2 = pnand %p8222_p6, %p8195_p7 }
  0x29   : > { %p8225_p3 = pneg %p8224_p2 }
  0x2b   : > { %p8230_p9 = pnand %p8228_p8, %p8225_p3 }
  0x2d   : > { %8233 = shalt.err (!%p8230_p9)
}
  0x2e   : > { %s8234_s14 = scalar_lea.vmem %s8350_s17, 16384  ;;  %p8242_p13 = scmp.lt.s32.totalorder %s8350_s17, %s8350_s17 }
  0x2f   : > { %p8235_p10 = scmp.ne.s32.totalorder %s8350_s17, %s8234_s14  ;;  %p8243_p0 = scmp.lt.s32.totalorder %s8234_s14, %s8234_s14 }
  0x31   : > { %p8237_p11 = pnand %p8235_p10, %p8195_p7  ;;  %p8244_p1 = por %p8243_p0, %p8242_p13 }
  0x33   : > { %p8238_p12 = pneg %p8237_p11 }
  0x35   : > { %p8245_p4 = pnand %p8244_p1, %p8238_p12 }
  0x37   : > { %8248 = shalt.err (!%p8245_p4)
}
  0x38   : > { %7016 = dma.hbm_to_vmem [thread:$0]  (!%p8346_p5), %s10132_s5, 16384, %s8350_s17, [#allocation6], %s8267_s27, %s8267_s27, %s8268_s28  }
  0x39   : > { %p10190_p6 = scmp.ne.s32.totalorder %s10187_s8, 0 }
  0x3b   : > { %316 = sbr.rel (%p10190_p6) target bundleno = 1442 (0x5a2), region = 56 }
  0x42   : > { %p10191_p2 = scmp.ne.s32.totalorder %s10188_s15, 0 }
  0x44   : > { %8254 = dma.done.wait (%p10191_p2), [#allocation4], 16384  }
  0x45   : > { %8256 = vsyncadd (%p10191_p2), [#allocation4], 4294950912 }
  0x46   : > { %8258 = dma.done.wait (%p10191_p2), [#allocation6], 16384  }
  0x47   : > { %8260 = vsyncadd (%p10191_p2), [#allocation6], 4294950912  ;;  %s6444_s18 = sshll.u32 %s6435_s12, 5  ;;  %v8269_v1 = vmov 0   ;;  %v7035_v2 = vld [vmem:[%s10128_s1 + $0x4] ss:$16 sps:$4 sm:$0xff]  }
  0x48   : > { %523 = vmatprep.mubr.bf16.mxu0 %v8269_v1  ;;  %p357_p5 = scmp.lt.s32.totalorder %s6444_s18, 63  ;;  %716 = vmatprep.mubr.bf16.mxu1 %v8269_v1  ;;  %v7037_v3 = vld [vmem:[%s10128_s1] ss:$16 sps:$4 sm:$0xff]   ;;  %vm442_vm0 = vcmask 130048   ;;  %v7038_v10 = vld [vmem:[%s10128_s1 + $0xc] ss:$16 sps:$4 sm:$0xff]  }
  0x49   : > { %491 = vmatprep.subr.bf16.mxu0 %v7035_v2  ;;  %v7040_v12 = vld [vmem:[%s10128_s1 + $0x8] ss:$16 sps:$4 sm:$0xff]   ;;  %684 = vmatprep.subr.bf16.mxu1 %v7038_v10  ;;  %v7041_v13 = vld [vmem:[#allocation3] ss:$16 sps:$4 sm:$0xff]   ;;  %v7070_v28 = vld [vmem:[#allocation3 + $0xc] ss:$16 sps:$4 sm:$0xff]  }
  0x4a   : > { %s10393_s18 = smov (!%p357_p5, %s6444_s18), 63  ;;  %492 = vmatpush1.bf16.msra.mxu0 %v7037_v3  ;;  %v7043_v14 = vld [vmem:[#allocation3 + $0x4] ss:$16 sps:$4 sm:$0xff]   ;;  %685 = vmatpush1.bf16.msra.mxu1 %v7040_v12  ;;  %v7044_v17 = vld [vmem:[#allocation3 + $0x20] ss:$16 sps:$4 sm:$0xff]   ;;  %vm6324_vm1 = vcmask 7168  }
  0x4b   : > { %s6445_s8 = sshll.u32 %s10393_s18, 3  ;;  %v7046_v16 = vld [vmem:[#allocation3 + $0x24] ss:$16 sps:$4 sm:$0xff]   ;;  %2275 = vmatprep.subr.bf16.mxu0 %v7043_v14  ;;  %v7047_v20 = vld [vmem:[#allocation3 + $0x40] ss:$16 sps:$4 sm:$0xff]   ;;  %2661 = vmatprep.subr.bf16.mxu1 %v7070_v28 }
  0x4c   : > { %s8421_s15 = scalar_lea.vmem %s10127_s0, %s6445_s8  ;;  %v7049_v19 = vld [vmem:[#allocation3 + $0x44] ss:$16 sps:$4 sm:$0xff]   ;;  %v7050_v24 = vld [vmem:[#allocation3 + $0x60] ss:$16 sps:$4 sm:$0xff]   ;;  %v7068_v27 = vld [vmem:[#allocation3 + $0x8] ss:$16 sps:$4 sm:$0xff]  }
  0x4d   : > { %v370_v4 = vld [vmem:[%s8421_s15] sm:$0xff]  ;;  %v371_v5 = vld [vmem:[%s8421_s15 + $0x8] sm:$0xff]  ;;  %v372_v7 = vld [vmem:[%s8421_s15 + $0x10] sm:$0xff] }
  0x4e   : > { %v402_v6 = vpack.c.bf16 %v371_v5, %v370_v4  ;;  %v373_v8 = vld [vmem:[%s8421_s15 + $0x18] sm:$0xff]  ;;  %v374_v11 = vld [vmem:[%s8421_s15 + $0x20] sm:$0xff]  ;;  %v375_v15 = vld [vmem:[%s8421_s15 + $0x28] sm:$0xff] }
  0x4f   : > { %v403_v9 = vpack.c.bf16 %v373_v8, %v372_v7  ;;  %v404_v18 = vpack.c.bf16 %v375_v15, %v374_v11  ;;  %v7052_v21 = vld [vmem:[#allocation3 + $0x64] ss:$16 sps:$4 sm:$0xff]   ;;  %v7073_v29 = vld [vmem:[#allocation3 + $0x2c] ss:$16 sps:$4 sm:$0xff]   ;;  %v7053_v30 = vld [vmem:[#allocation3 + $0x80] ss:$16 sps:$4 sm:$0xff]  }
  0x50   : > { %6452 = vmatmul.mubr.msk.bf16.vlgmr.msra.gmra.mrb[0].mxu0 %vm442_vm0, %v402_v6  ;;  %6468 = vmatmul.mubr.msk.bf16.vlgmr.msra.gmra.mrb[0].mxu1 %vm442_vm0, %v402_v6  ;;  %v376_v22 = vld [vmem:[%s8421_s15 + $0x30] sm:$0xff]  ;;  %v377_v23 = vld [vmem:[%s8421_s15 + $0x38] sm:$0xff]  ;;  %v378_v32 = vld [vmem:[%s8421_s15 + $0x40] sm:$0xff] }
  0x51   : > { %533 = vmatprep.mubr.bf16.mxu0 %v8269_v1  ;;  %2276 = vmatpush1.bf16.msra.mxu0 %v7041_v13  ;;  %v7055_v25 = vld [vmem:[#allocation3 + $0x84] ss:$16 sps:$4 sm:$0xff]   ;;  %v405_v26 = vpack.c.bf16 %v377_v23, %v376_v22  ;;  %v7071_v31 = vld [vmem:[#allocation3 + $0x28] ss:$16 sps:$4 sm:$0xff]   ;;  %v7079_v35 = vld [vmem:[#allocation3 + $0x4c] ss:$16 sps:$4 sm:$0xff]  }
  0x52   : > { %2277 = vmatprep.subr.bf16.mxu0 %v7046_v16  ;;  %726 = vmatprep.mubr.bf16.mxu1 %v8269_v1  ;;  %v7058_v33 = vld [vmem:[#allocation3 + $0xa4] ss:$16 sps:$4 sm:$0xff]   ;;  %v7056_v36 = vld [vmem:[#allocation3 + $0xa0] ss:$16 sps:$4 sm:$0xff]   ;;  %v7077_v37 = vld [vmem:[#allocation3 + $0x48] ss:$16 sps:$4 sm:$0xff]  }
  0x53   : > { %2662 = vmatpush1.bf16.msra.mxu1 %v7068_v27  ;;  %v379_v34 = vld [vmem:[%s8421_s15 + $0x48] sm:$0xff]  ;;  %v7059_v40 = vld [vmem:[#allocation3 + $0xc0] ss:$16 sps:$4 sm:$0xff]   ;;  %v381_v45 = vld [vmem:[%s8421_s15 + $0x58] sm:$0xff] }
  0x54   : > { %2663 = vmatprep.subr.bf16.mxu1 %v7073_v29  ;;  %v406_v38 = vpack.c.bf16 %v379_v34, %v378_v32  ;;  %v7061_v39 = vld [vmem:[#allocation3 + $0xc4] ss:$16 sps:$4 sm:$0xff]   ;;  %v7080_v41 = vld [vmem:[#allocation3 + $0x68] ss:$16 sps:$4 sm:$0xff]   ;;  %v7082_v42 = vld [vmem:[#allocation3 + $0x6c] ss:$16 sps:$4 sm:$0xff]  }
  0x55   : > { %2278 = vmatpush1.bf16.msra.mxu0 %v7044_v17  ;;  %v7064_v43 = vld [vmem:[#allocation3 + $0xe4] ss:$16 sps:$4 sm:$0xff]   ;;  %v7088_v46 = vld [vmem:[#allocation3 + $0x8c] ss:$16 sps:$4 sm:$0xff]   ;;  %v7062_v47 = vld [vmem:[#allocation3 + $0xe0] ss:$16 sps:$4 sm:$0xff]  }
  0x56   : > { %2279 = vmatprep.subr.bf16.mxu0 %v7049_v19  ;;  %v380_v44 = vld [vmem:[%s8421_s15 + $0x50] sm:$0xff]  ;;  %v7086_v48 = vld [vmem:[#allocation3 + $0x88] ss:$16 sps:$4 sm:$0xff]   ;;  %v382_v55 = vld [vmem:[%s8421_s15 + $0x60] sm:$0xff] }
  0x57   : > { %2664 = vmatpush1.bf16.msra.mxu1 %v7071_v31  ;;  %v7067_v49 = vld [vmem:[#allocation3 + $0x104] ss:$16 sps:$4 sm:$0xff]   ;;  %v7091_v50 = vld [vmem:[#allocation3 + $0xac] ss:$16 sps:$4 sm:$0xff]   ;;  %v407_v51 = vpack.c.bf16 %v381_v45, %v380_v44  ;;  %v7065_v52 = vld [vmem:[#allocation3 + $0x100] ss:$16 sps:$4 sm:$0xff]  }
  0x58   : > { %6453 = vmatmul.mubr.msk.bf16.gmra.mrb[4].mxu0 %vm442_vm0, %v403_v9  ;;  %6469 = vmatmul.mubr.msk.bf16.gmra.mrb[4].mxu1 %vm442_vm0, %v403_v9  ;;  %v7089_v53 = vld [vmem:[#allocation3 + $0xa8] ss:$16 sps:$4 sm:$0xff]   ;;  %v7076_v54 = vld [vmem:[#allocation3 + $0x124] ss:$16 sps:$4 sm:$0xff]   ;;  %v7074_v57 = vld [vmem:[#allocation3 + $0x120] ss:$16 sps:$4 sm:$0xff]  }
  0x59   : > { %543 = vmatprep.mubr.bf16.mxu0 %v8269_v1  ;;  %2280 = vmatpush1.bf16.msra.mxu0 %v7047_v20  ;;  %v383_v56 = vld [vmem:[%s8421_s15 + $0x68] sm:$0xff]  ;;  %v7083_v60 = vld [vmem:[#allocation3 + $0x140] ss:$16 sps:$4 sm:$0xff]   ;;  %v385_v62 = vld [vmem:[%s8421_s15 + $0x78] sm:$0xff] }
  0x5a   : > { %2281 = vmatprep.subr.bf16.mxu0 %v7052_v21  ;;  %736 = vmatprep.mubr.bf16.mxu1 %v8269_v1  ;;  %v7085_v58 = vld [vmem:[#allocation3 + $0x144] ss:$16 sps:$4 sm:$0xff]   ;;  %v408_v59 = vpack.c.bf16 %v383_v56, %v382_v55  ;;  %v7097_v12 = vld [vmem:[#allocation3 + $0xcc] ss:$16 sps:$4 sm:$0xff]   ;;  %v7092_v13 = vld [vmem:[#allocation3 + $0x160] ss:$16 sps:$4 sm:$0xff]  }
  0x5b   : > { %2665 = vmatprep.subr.bf16.mxu1 %v7079_v35  ;;  %v384_v61 = vld [vmem:[%s8421_s15 + $0x70] sm:$0xff]  ;;  %v386_v0 = vld [vmem:[%s8421_s15 + $0x80] sm:$0xff]  ;;  %v387_v2 = vld [vmem:[%s8421_s15 + $0x88] sm:$0xff] }
  0x5c   : > { %2666 = vmatpush1.bf16.msra.mxu1 %v7077_v37  ;;  %v409_v63 = vpack.c.bf16 %v385_v62, %v384_v61  ;;  %v410_v3 = vpack.c.bf16 %v387_v2, %v386_v0  ;;  %v388_v4 = vld [vmem:[%s8421_s15 + $0x90] sm:$0xff]  ;;  %v389_v5 = vld [vmem:[%s8421_s15 + $0x98] sm:$0xff]  ;;  %v390_v7 = vld [vmem:[%s8421_s15 + $0xa0] sm:$0xff] }
  0x5d   : > { %2282 = vmatpush1.bf16.msra.mxu0 %v7050_v24  ;;  %2667 = vmatprep.subr.bf16.mxu1 %v7082_v42  ;;  %v411_v6 = vpack.c.bf16 %v389_v5, %v388_v4  ;;  %v391_v8 = vld [vmem:[%s8421_s15 + $0xa8] sm:$0xff]  ;;  %v392_v10 = vld [vmem:[%s8421_s15 + $0xb0] sm:$0xff]  ;;  %v393_v11 = vld [vmem:[%s8421_s15 + $0xb8] sm:$0xff] }
  0x5e   : > { %2283 = vmatprep.subr.bf16.mxu0 %v7055_v25  ;;  %v412_v9 = vpack.c.bf16 %v391_v8, %v390_v7  ;;  %v7094_v14 = vld [vmem:[#allocation3 + $0x164] ss:$16 sps:$4 sm:$0xff]   ;;  %v7095_v15 = vld [vmem:[#allocation3 + $0xc8] ss:$16 sps:$4 sm:$0xff]   ;;  %v413_v16 = vpack.c.bf16 %v393_v11, %v392_v10  ;;  %v7100_v17 = vld [vmem:[#allocation3 + $0xec] ss:$16 sps:$4 sm:$0xff]  }
  0x5f   : > { %v395_v19 = vld [vmem:[%s8421_s15 + $0xc8] sm:$0xff]  ;;  %v396_v25 = vld [vmem:[%s8421_s15 + $0xd0] sm:$0xff]  ;;  %v398_v32 = vld [vmem:[%s8421_s15 + $0xe0] sm:$0xff] }
  0x60   : > { %6454 = vmatmul.mubr.msk.bf16.gmra.mrb[8].mxu0 %vm442_vm0, %v404_v18  ;;  %6470 = vmatmul.mubr.msk.bf16.gmra.mrb[8].mxu1 %vm442_vm0, %v404_v18  ;;  %v394_v18 = vld [vmem:[%s8421_s15 + $0xc0] sm:$0xff]  ;;  %v7098_v20 = vld [vmem:[#allocation3 + $0xe8] ss:$16 sps:$4 sm:$0xff]   ;;  %v400_v44 = vld [vmem:[%s8421_s15 + $0xf0] sm:$0xff] }
  0x61   : > { %553 = vmatprep.mubr.bf16.mxu0 %v8269_v1  ;;  %2284 = vmatpush1.bf16.msra.mxu0 %v7053_v30  ;;  %v7106_v21 = vld [vmem:[#allocation3 + $0x10c] ss:$16 sps:$4 sm:$0xff]   ;;  %v7104_v22 = vld [vmem:[#allocation3 + $0x108] ss:$16 sps:$4 sm:$0xff]   ;;  %v414_v23 = vpack.c.bf16 %v395_v19, %v394_v18  ;;  %v7103_v35 = vld [vmem:[#allocation3 + $0x184] ss:$16 sps:$4 sm:$0xff]  }
  0x62   : > { %2285 = vmatprep.subr.bf16.mxu0 %v7058_v33  ;;  %746 = vmatprep.mubr.bf16.mxu1 %v8269_v1  ;;  %v7109_v24 = vld [vmem:[#allocation3 + $0x12c] ss:$16 sps:$4 sm:$0xff]   ;;  %v7107_v27 = vld [vmem:[#allocation3 + $0x128] ss:$16 sps:$4 sm:$0xff]   ;;  %v7101_v37 = vld [vmem:[#allocation3 + $0x180] ss:$16 sps:$4 sm:$0xff]  }
  0x63   : > { %2668 = vmatpush1.bf16.msra.mxu1 %v7080_v41  ;;  %v7115_v28 = vld [vmem:[#allocation3 + $0x14c] ss:$16 sps:$4 sm:$0xff]   ;;  %v7113_v29 = vld [vmem:[#allocation3 + $0x148] ss:$16 sps:$4 sm:$0xff]   ;;  %v7110_v42 = vld [vmem:[#allocation3 + $0x1a0] ss:$16 sps:$4 sm:$0xff]  }
  0x64   : > { %2669 = vmatprep.subr.bf16.mxu1 %v7088_v46  ;;  %v7118_v31 = vld [vmem:[#allocation3 + $0x16c] ss:$16 sps:$4 sm:$0xff]   ;;  %v7116_v34 = vld [vmem:[#allocation3 + $0x168] ss:$16 sps:$4 sm:$0xff]   ;;  %v7121_v46 = vld [vmem:[#allocation3 + $0x1c4] ss:$16 sps:$4 sm:$0xff]  }
  0x65   : > { %2286 = vmatpush1.bf16.msra.mxu0 %v7056_v36  ;;  %v399_v33 = vld [vmem:[%s8421_s15 + $0xe8] sm:$0xff]  ;;  %v401_v45 = vld [vmem:[%s8421_s15 + $0xf8] sm:$0xff]  ;;  %v6484_v62 = vld.sshfl [vmem:[%s10129_s2] sm:$0x33 pattern:$0x75316420] }
  0x66   : > { %2287 = vmatprep.subr.bf16.mxu0 %v7061_v39  ;;  %v7124_v36 = vld [vmem:[#allocation3 + $0x18c] ss:$16 sps:$4 sm:$0xff]   ;;  %v416_v39 = vpack.c.bf16 %v399_v33, %v398_v32  ;;  %v7139_v55 = vld [vmem:[#allocation3 + $0x204] ss:$16 sps:$4 sm:$0xff]  }
  0x67   : > { %2670 = vmatpush1.bf16.msra.mxu1 %v7086_v48  ;;  %v7127_v41 = vld [vmem:[#allocation3 + $0x1ac] ss:$16 sps:$4 sm:$0xff]   ;;  %v7119_v48 = vld [vmem:[#allocation3 + $0x1c0] ss:$16 sps:$4 sm:$0xff]  }
  0x68   : > { %6455 = vmatmul.mubr.msk.bf16.gmra.mrb[12].mxu0 %vm442_vm0, %v405_v26  ;;  %6471 = vmatmul.mubr.msk.bf16.gmra.mrb[12].mxu1 %vm442_vm0, %v405_v26  ;;  %v397_v26 = vld [vmem:[%s8421_s15 + $0xd8] sm:$0xff]  ;;  %s10023_s15 = scalar_lea.vmem %s10136_s9, %s6445_s8 }
  0x69   : > { %563 = vmatprep.mubr.bf16.mxu0 %v8269_v1  ;;  %2288 = vmatpush1.bf16.msra.mxu0 %v7059_v40  ;;  %v415_v30 = vpack.c.bf16 %v397_v26, %v396_v25  ;;  %v7112_v40 = vld [vmem:[#allocation3 + $0x1a4] ss:$16 sps:$4 sm:$0xff]   ;;  %v7166_v56 = vld [vmem:[#allocation3 + $0x20c] ss:$16 sps:$4 sm:$0xff]  }
  0x6a   : > { %2289 = vmatprep.subr.bf16.mxu0 %v7064_v43  ;;  %756 = vmatprep.mubr.bf16.mxu1 %v8269_v1  ;;  %v7125_v43 = vld [vmem:[#allocation3 + $0x1a8] ss:$16 sps:$4 sm:$0xff]  }
  0x6b   : > { %2671 = vmatprep.subr.bf16.mxu1 %v7091_v50  ;;  %v417_v50 = vpack.c.bf16 %v401_v45, %v400_v44 }
  0x6c   : > { %2672 = vmatpush1.bf16.msra.mxu1 %v7089_v53  ;;  %v7128_v53 = vld [vmem:[#allocation3 + $0x1e0] ss:$16 sps:$4 sm:$0xff]  }
  0x6d   : > { %2290 = vmatpush1.bf16.msra.mxu0 %v7062_v47  ;;  %2673 = vmatprep.subr.bf16.mxu1 %v7097_v12  ;;  %v7133_v47 = vld [vmem:[#allocation3 + $0x1cc] ss:$16 sps:$4 sm:$0xff]  }
  0x6e   : > { %2291 = vmatprep.subr.bf16.mxu0 %v7067_v49  ;;  %v7131_v49 = vld [vmem:[#allocation3 + $0x1c8] ss:$16 sps:$4 sm:$0xff]  }
  0x70   : > { %6456 = vmatmul.mubr.msk.bf16.gmra.mrb[16].mxu0 %vm442_vm0, %v406_v38  ;;  %6472 = vmatmul.mubr.msk.bf16.gmra.mrb[16].mxu1 %vm442_vm0, %v406_v38  ;;  %v7122_v38 = vld [vmem:[#allocation3 + $0x188] ss:$16 sps:$4 sm:$0xff]  }
  0x71   : > { %573 = vmatprep.mubr.bf16.mxu0 %v8269_v1  ;;  %2292 = vmatpush1.bf16.msra.mxu0 %v7065_v52  ;;  %v7136_v52 = vld [vmem:[#allocation3 + $0x1ec] ss:$16 sps:$4 sm:$0xff]  }
  0x72   : > { %2293 = vmatprep.subr.bf16.mxu0 %v7076_v54  ;;  %766 = vmatprep.mubr.bf16.mxu1 %v8269_v1  ;;  %v7134_v54 = vld [vmem:[#allocation3 + $0x1e8] ss:$16 sps:$4 sm:$0xff]  }
  0x73   : > { %2674 = vmatpush1.bf16.msra.mxu1 %v7095_v15 }
  0x74   : > { %2675 = vmatprep.subr.bf16.mxu1 %v7100_v17 }
  0x75   : > { %2294 = vmatpush1.bf16.msra.mxu0 %v7074_v57  ;;  %v8270_v57 = vmov 1966171168  }
  0x76   : > { %2295 = vmatprep.subr.bf16.mxu0 %v7085_v58  ;;  %v952_v58 = vunpack.c.l.s4 %v8270_v57 }
  0x77   : > { %2676 = vmatpush1.bf16.msra.mxu1 %v7098_v20 }
  0x78   : > { %6457 = vmatmul.mubr.msk.bf16.gmra.mrb[20].mxu0 %vm442_vm0, %v407_v51  ;;  %6473 = vmatmul.mubr.msk.bf16.gmra.mrb[20].mxu1 %vm442_vm0, %v407_v51  ;;  %v7130_v51 = vld [vmem:[#allocation3 + $0x1e4] ss:$16 sps:$4 sm:$0xff]  }
  0x79   : > { %583 = vmatprep.mubr.bf16.mxu0 %v8269_v1  ;;  %2296 = vmatpush1.bf16.msra.mxu0 %v7083_v60  ;;  %v953_v60 = vunpack.c.0.s8 %v952_v58 }
  0x7a   : > { %776 = vmatprep.mubr.bf16.mxu1 %v8269_v1  ;;  %2297 = vmatprep.subr.bf16.mxu0 %v7094_v14 }
  0x7b   : > { %2677 = vmatprep.subr.bf16.mxu1 %v7106_v21 }
  0x7c   : > { %2678 = vmatpush1.bf16.msra.mxu1 %v7104_v22 }
  0x7d   : > { %2298 = vmatpush1.bf16.msra.mxu0 %v7092_v13  ;;  %2679 = vmatprep.subr.bf16.mxu1 %v7109_v24 }
  0x7e   : > { %2299 = vmatprep.subr.bf16.mxu0 %v7103_v35 }
  0x80   : > { %6458 = vmatmul.mubr.msk.bf16.gmra.mrb[24].mxu0 %vm442_vm0, %v408_v59  ;;  %6474 = vmatmul.mubr.msk.bf16.gmra.mrb[24].mxu1 %vm442_vm0, %v408_v59  ;;  %v954_v59 = vlaneseq }
  0x81   : > { %593 = vmatprep.mubr.bf16.mxu0 %v8269_v1  ;;  %786 = vmatprep.mubr.bf16.mxu1 %v8269_v1 }
  0x82   : > { %2680 = vmatpush1.bf16.msra.mxu1 %v7107_v27  ;;  %2300 = vmatpush1.bf16.msra.mxu0 %v7101_v37  ;;  %v8529_v61 = vshrl.u32 %v954_v59, 7 }
  0x83   : > { %2681 = vmatprep.subr.bf16.mxu1 %v7115_v28  ;;  %2301 = vmatprep.subr.bf16.mxu0 %v7112_v40 }
  0x84   : > { %10192 = vst [vmem:[#allocation9_spill] sm:$0xff] %v8529_v61  ;;  %v8546_v4 = vsub.s32 0, %v8529_v61 }
  0x86   : > { %2682 = vmatpush1.bf16.msra.mxu1 %v7113_v29  ;;  %2302 = vmatpush1.bf16.msra.mxu0 %v7110_v42  ;;  %10194 = vst [vmem:[#allocation11_spill] sm:$0xff] %v8546_v4 }
  0x87   : > { %2683 = vmatprep.subr.bf16.mxu1 %v7118_v31  ;;  %2303 = vmatprep.subr.bf16.mxu0 %v7121_v46 }
  0x88   : > { %6459 = vmatmul.mubr.msk.bf16.gmra.mrb[28].mxu0 %vm442_vm0, %v409_v63  ;;  %6475 = vmatmul.mubr.msk.bf16.gmra.mrb[28].mxu1 %vm442_vm0, %v409_v63  ;;  %v8535_v63 = vsub.s32 %v953_v60, %v8529_v61 }
  0x89   : > { %603 = vmatprep.mubr.bf16.mxu0 %v8269_v1  ;;  %796 = vmatprep.mubr.bf16.mxu1 %v8269_v1 }
  0x8a   : > { %2684 = vmatpush1.bf16.msra.mxu1 %v7116_v34  ;;  %2304 = vmatpush1.bf16.msra.mxu0 %v7119_v48  ;;  %10193 = vst [vmem:[#allocation10_spill] sm:$0xff] %v8535_v63  ;;  %v8538_v0 = vrot.slane %v6484_v62, %v8535_v63 }
  0x8b   : > { %2685 = vmatprep.subr.bf16.mxu1 %v7124_v36  ;;  %2305 = vmatprep.subr.bf16.mxu0 %v7130_v51 }
  0x8e   : > { %2686 = vmatpush1.bf16.msra.mxu1 %v7122_v38  ;;  %2306 = vmatpush1.bf16.msra.mxu0 %v7128_v53 }
  0x8f   : > { %2687 = vmatprep.subr.bf16.mxu1 %v7127_v41  ;;  %2468 = vmatprep.subr.bf16.mxu0 %v7139_v55 }
  0x90   : > { %6460 = vmatmul.mubr.msk.bf16.gmra.mrb[32].mxu0 %vm442_vm0, %v410_v3  ;;  %6476 = vmatmul.mubr.msk.bf16.gmra.mrb[32].mxu1 %vm442_vm0, %v410_v3  ;;  %v968_v3 = vpack.i.b16 %v8538_v0, %v8538_v0 }
  0x91   : > { %613 = vmatprep.mubr.bf16.mxu0 %v8269_v1  ;;  %806 = vmatprep.mubr.bf16.mxu1 %v8269_v1 }
  0x92   : > { %2688 = vmatpush1.bf16.msra.mxu1 %v7125_v43  ;;  %v8551_v8 = vrot.slane %v968_v3, %v8546_v4 }
  0x93   : > { %2689 = vmatprep.subr.bf16.mxu1 %v7133_v47 }
  0x96   : > { %2690 = vmatpush1.bf16.msra.mxu1 %v7131_v49 }
  0x97   : > { %2691 = vmatprep.subr.bf16.mxu1 %v7136_v52 }
  0x98   : > { %6461 = vmatmul.mubr.msk.bf16.gmra.mrb[36].mxu0 %vm442_vm0, %v411_v6  ;;  %6477 = vmatmul.mubr.msk.bf16.gmra.mrb[36].mxu1 %vm442_vm0, %v411_v6 }
  0x99   : > { %623 = vmatprep.mubr.bf16.mxu0 %v8269_v1  ;;  %816 = vmatprep.mubr.bf16.mxu1 %v8269_v1 }
  0x9a   : > { %2692 = vmatpush1.bf16.msra.mxu1 %v7134_v54 }
  0x9b   : > { %2854 = vmatprep.subr.bf16.mxu1 %v7166_v56 }
  0xa0   : > { %6462 = vmatmul.mubr.msk.bf16.gmra.mrb[40].mxu0 %vm442_vm0, %v412_v9  ;;  %6478 = vmatmul.mubr.msk.bf16.gmra.mrb[40].mxu1 %vm442_vm0, %v412_v9 }
  0xa1   : > { %633 = vmatprep.mubr.bf16.mxu0 %v8269_v1  ;;  %826 = vmatprep.mubr.bf16.mxu1 %v8269_v1 }
  0xa8   : > { %6463 = vmatmul.mubr.msk.bf16.gmra.mrb[44].mxu0 %vm442_vm0, %v413_v16  ;;  %6479 = vmatmul.mubr.msk.bf16.gmra.mrb[44].mxu1 %vm442_vm0, %v413_v16 }
  0xa9   : > { %643 = vmatprep.mubr.bf16.mxu0 %v8269_v1  ;;  %836 = vmatprep.mubr.bf16.mxu1 %v8269_v1 }
  0xb0   : > { %6464 = vmatmul.mubr.msk.bf16.gmra.mrb[48].mxu0 %vm442_vm0, %v414_v23  ;;  %6480 = vmatmul.mubr.msk.bf16.gmra.mrb[48].mxu1 %vm442_vm0, %v414_v23 }
  0xb1   : > { %653 = vmatprep.mubr.bf16.mxu0 %v8269_v1  ;;  %846 = vmatprep.mubr.bf16.mxu1 %v8269_v1 }
  0xb8   : > { %6465 = vmatmul.mubr.msk.bf16.gmra.mrb[52].mxu0 %vm442_vm0, %v415_v30  ;;  %6481 = vmatmul.mubr.msk.bf16.gmra.mrb[52].mxu1 %vm442_vm0, %v415_v30 }
  0xb9   : > { %663 = vmatprep.mubr.bf16.mxu0 %v8269_v1  ;;  %856 = vmatprep.mubr.bf16.mxu1 %v8269_v1 }
  0xc0   : > { %6466 = vmatmul.mubr.msk.bf16.gmra.mrb[56].mxu0 %vm442_vm0, %v416_v39  ;;  %6482 = vmatmul.mubr.msk.bf16.gmra.mrb[56].mxu1 %vm442_vm0, %v416_v39 }
  0xc1   : > { %673 = vmatprep.mubr.bf16.mxu0 %v8269_v1  ;;  %866 = vmatprep.mubr.bf16.mxu1 %v8269_v1  ;;  %v950_v1 = vcombine.high %v6484_v62, %v6484_v62 }
  0xc3   : > { %v8541_v2 = vrot.slane %v950_v1, %v8535_v63 }
  0xc5   : > { %v975_v5 = vpack.i.b16 %v8541_v2, %v8541_v2 }
  0xc7   : > { %v8554_v10 = vrot.slane %v975_v5, %v8546_v4 }
  0xc8   : > { %6467 = vmatmul.mubr.msk.bf16.gmra.mrb[60].mxu0 %vm442_vm0, %v417_v50  ;;  %6483 = vmatmul.mubr.msk.bf16.gmra.mrb[60].mxu1 %vm442_vm0, %v417_v50 }
 0x123   : > { %v525_v6 = vpop.f32.mrb[0].mxu0  ;;  %v8558_v26 = vpop.f32.mrb[0].mxu1 }
 0x124   : > { %v527_v7 = vpop.f32.mrb[1].mxu0  ;;  %v8561_v28 = vpop.f32.mrb[1].mxu1 }
 0x125   : > { %v529_v9 = vpop.f32.mrb[2].mxu0  ;;  %v8564_v30 = vpop.f32.mrb[2].mxu1 }
 0x126   : > { %v878_v11 = vpack.c.bf16 %v529_v9, %v525_v6  ;;  %v531_v12 = vpop.f32.mrb[3].mxu0  ;;  %v8568_v33 = vpop.f32.mrb[3].mxu1 }
 0x127   : > { %v879_v13 = vpack.c.bf16 %v531_v12, %v527_v7 }
 0x128   : > { %v995_v14 = vadd.bf16 %v8551_v8, %v878_v11 }
 0x129   : > { %v996_v15 = vadd.bf16 %v8554_v10, %v879_v13 }
 0x12a   : > { %v1059_v16 = vsub.bf16 0, %v995_v14 }
 0x12b   : > { %v1060_v17 = vsub.bf16 0, %v996_v15  ;;  %v535_v18 = vpop.f32.mrb[4].mxu0  ;;  %v8572_v44 = vpop.f32.mrb[4].mxu1 }
 0x12c   : > { %v1124_v19 = vmul.bf16 1069105081, %v1059_v16  ;;  %v537_v20 = vpop.f32.mrb[5].mxu0  ;;  %v8575_v46 = vpop.f32.mrb[5].mxu1 }
 0x12d   : > { %v1127_v21 = vmul.bf16 1069105081, %v1060_v17  ;;  %v539_v22 = vpop.f32.mrb[6].mxu0  ;;  %v8578_v49 = vpop.f32.mrb[6].mxu1 }
 0x12e   : > { %7425 = vpow.bf16 %v1124_v19  ;;  %v882_v23 = vpack.c.bf16 %v539_v22, %v535_v18  ;;  %v541_v24 = vpop.f32.mrb[7].mxu0  ;;  %v8582_v54 = vpop.f32.mrb[7].mxu1 }
 0x12f   : > { %7427 = vpow.bf16 %v1127_v21  ;;  %v883_v25 = vpack.c.bf16 %v541_v24, %v537_v20 }
 0x130   : > { %v999_v27 = vadd.bf16 %v8551_v8, %v882_v23 }
 0x131   : > { %v1000_v29 = vadd.bf16 %v8554_v10, %v883_v25 }
 0x132   : > { %v1063_v31 = vsub.bf16 0, %v999_v27 }
 0x133   : > { %v1064_v34 = vsub.bf16 0, %v1000_v29  ;;  %v545_v35 = vpop.f32.mrb[8].mxu0  ;;  %v8586_v7 = vpop.f32.mrb[8].mxu1 }
 0x134   : > { %v1136_v37 = vmul.bf16 1069105081, %v1063_v31  ;;  %v547_v38 = vpop.f32.mrb[9].mxu0  ;;  %v8589_v11 = vpop.f32.mrb[9].mxu1 }
 0x135   : > { %v1139_v39 = vmul.bf16 1069105081, %v1064_v34  ;;  %v549_v40 = vpop.f32.mrb[10].mxu0  ;;  %v8592_v14 = vpop.f32.mrb[10].mxu1 }
 0x136   : > { %7429 = vpow.bf16 %v1136_v37  ;;  %v886_v41 = vpack.c.bf16 %v549_v40, %v545_v35  ;;  %v551_v42 = vpop.f32.mrb[11].mxu0  ;;  %v8596_v19 = vpop.f32.mrb[11].mxu1 }
 0x137   : > { %7431 = vpow.bf16 %v1139_v39  ;;  %v887_v43 = vpack.c.bf16 %v551_v42, %v547_v38  ;;  %v7137_v38 = vld [vmem:[#allocation3 + $0x200] ss:$16 sps:$4 sm:$0xff]   ;;  %v7142_v42 = vld [vmem:[#allocation3 + $0x224] ss:$16 sps:$4 sm:$0xff]  }
 0x138   : > { %v1003_v45 = vadd.bf16 %v8551_v8, %v886_v41 }
 0x139   : > { %v7426_v47 = vpop.eup %7425  ;;  %v1004_v48 = vadd.bf16 %v8554_v10, %v887_v43  ;;  %v7164_v43 = vld [vmem:[#allocation3 + $0x208] ss:$16 sps:$4 sm:$0xff]  }
 0x13a   : > { %v7428_v50 = vpop.eup %7427  ;;  %v1315_v51 = vadd.bf16 1065369472, %v7426_v47  ;;  %v1067_v52 = vsub.bf16 0, %v1003_v45 }
 0x13b   : > { %v1316_v55 = vadd.bf16 1065369472, %v7428_v50  ;;  %v1068_v56 = vsub.bf16 0, %v1004_v48  ;;  %v555_v57 = vpop.f32.mrb[12].mxu0  ;;  %v8600_v39 = vpop.f32.mrb[12].mxu1 }
 0x13c   : > { %7433 = vrcp.bf16 %v1315_v51  ;;  %v1148_v59 = vmul.bf16 1069105081, %v1067_v52  ;;  %v557_v60 = vpop.f32.mrb[13].mxu0  ;;  %v8603_v45 = vpop.f32.mrb[13].mxu1  ;;  %v7169_v51 = vld [vmem:[#allocation3 + $0x22c] ss:$16 sps:$4 sm:$0xff]  }
 0x13d   : > { %v1151_v62 = vmul.bf16 1069105081, %v1068_v56  ;;  %v559_v1 = vpop.f32.mrb[14].mxu0  ;;  %7435 = vrcp.bf16 %v1316_v55  ;;  %v8606_v52 = vpop.f32.mrb[14].mxu1 }
 0x13e   : > { %7437 = vpow.bf16 %v1148_v59  ;;  %v890_v3 = vpack.c.bf16 %v559_v1, %v555_v57  ;;  %v561_v5 = vpop.f32.mrb[15].mxu0 }
 0x13f   : > { %7439 = vpow.bf16 %v1151_v62  ;;  %v891_v6 = vpack.c.bf16 %v561_v5, %v557_v60  ;;  %v8610_v62 = vpop.f32.mrb[15].mxu1 }
 0x140   : > { %v1007_v9 = vadd.bf16 %v8551_v8, %v890_v3 }
 0x141   : > { %v7430_v12 = vpop.eup %7429  ;;  %v1008_v13 = vadd.bf16 %v8554_v10, %v891_v6 }
 0x142   : > { %v7432_v15 = vpop.eup %7431  ;;  %v1319_v16 = vadd.bf16 1065369472, %v7430_v12  ;;  %v1071_v17 = vsub.bf16 0, %v1007_v9 }
 0x143   : > { %v1320_v20 = vadd.bf16 1065369472, %v7432_v15  ;;  %v1072_v21 = vsub.bf16 0, %v1008_v13  ;;  %v565_v22 = vpop.f32.mrb[16].mxu0  ;;  %v7140_v13 = vld [vmem:[#allocation3 + $0x220] ss:$16 sps:$4 sm:$0xff]  }
 0x144   : > { %v1160_v24 = vmul.bf16 1069105081, %v1071_v17  ;;  %v567_v25 = vpop.f32.mrb[17].mxu0  ;;  %7441 = vrcp.bf16 %v1319_v16  ;;  %v7167_v17 = vld [vmem:[#allocation3 + $0x228] ss:$16 sps:$4 sm:$0xff]  }
 0x145   : > { %v1163_v27 = vmul.bf16 1069105081, %v1072_v21  ;;  %v569_v29 = vpop.f32.mrb[18].mxu0  ;;  %7443 = vrcp.bf16 %v1320_v20 }
 0x146   : > { %7445 = vpow.bf16 %v1160_v24  ;;  %v894_v31 = vpack.c.bf16 %v569_v29, %v565_v22  ;;  %v571_v34 = vpop.f32.mrb[19].mxu0  ;;  %v7145_v22 = vld [vmem:[#allocation3 + $0x244] ss:$16 sps:$4 sm:$0xff]   ;;  %v7175_v24 = vld [vmem:[#allocation3 + $0x24c] ss:$16 sps:$4 sm:$0xff]  }
 0x147   : > { %v7434_v35 = vpop.eup %7433  ;;  %7447 = vpow.bf16 %v1163_v27  ;;  %v895_v37 = vpack.c.bf16 %v571_v34, %v567_v25  ;;  %v7143_v29 = vld [vmem:[#allocation3 + $0x240] ss:$16 sps:$4 sm:$0xff]  }
 0x148   : > { %v7436_v40 = vpop.eup %7435  ;;  %v1011_v41 = vadd.bf16 %v8551_v8, %v894_v31  ;;  %v1380_v56 = vmul.bf16 1065369472, %v7434_v35  ;;  %v8614_v31 = vpop.f32.mrb[16].mxu1 }
 0x149   : > { %v7438_v47 = vpop.eup %7437  ;;  %v1012_v48 = vadd.bf16 %v8554_v10, %v895_v37  ;;  %v1382_v50 = vmul.bf16 1065369472, %v7436_v40  ;;  %v7148_v37 = vld [vmem:[#allocation3 + $0x264] ss:$16 sps:$4 sm:$0xff]   ;;  %v8617_v40 = vpop.f32.mrb[17].mxu1 }
 0x14a   : > { %v7440_v55 = vpop.eup %7439  ;;  %v1323_v57 = vadd.bf16 1065369472, %v7438_v47  ;;  %v1075_v59 = vsub.bf16 0, %v1011_v41  ;;  %v7178_v47 = vld [vmem:[#allocation3 + $0x26c] ss:$16 sps:$4 sm:$0xff]  }
 0x14b   : > { %v1324_v1 = vadd.bf16 1065369472, %v7440_v55  ;;  %v1076_v3 = vsub.bf16 0, %v1012_v48  ;;  %v575_v5 = vpop.f32.mrb[20].mxu0  ;;  %2307 = vmatprep.mubr.bf16.mxu0 %v1382_v50  ;;  %2693 = vmatprep.mubr.bf16.mxu1 %v1382_v50  ;;  %v8620_v48 = vpop.f32.mrb[18].mxu1 }
 0x14c   : > { %v1172_v9 = vmul.bf16 1069105081, %v1075_v59  ;;  %v577_v12 = vpop.f32.mrb[21].mxu0  ;;  %2308 = vmatmul.mubr.bf16.vlgmr.msra.gmra.mrb[64].mxu0 %v1380_v56  ;;  %2694 = vmatmul.mubr.bf16.vlgmr.msra.gmra.mrb[64].mxu1 %v1380_v56  ;;  %7449 = vrcp.bf16 %v1323_v57  ;;  %v8624_v59 = vpop.f32.mrb[19].mxu1 }
 0x14d   : > { %v1175_v15 = vmul.bf16 1069105081, %v1076_v3  ;;  %2469 = vmatpush1.bf16.msra.mxu0 %v7137_v38  ;;  %v579_v16 = vpop.f32.mrb[22].mxu0  ;;  %7451 = vrcp.bf16 %v1324_v1  ;;  %2855 = vmatpush1.bf16.msra.mxu1 %v7164_v43  ;;  %v7173_v38 = vld [vmem:[#allocation3 + $0x248] ss:$16 sps:$4 sm:$0xff]  }
 0x14e   : > { %7453 = vpow.bf16 %v1172_v9  ;;  %v898_v20 = vpack.c.bf16 %v579_v16, %v575_v5  ;;  %v581_v21 = vpop.f32.mrb[23].mxu0  ;;  %2470 = vmatprep.subr.bf16.mxu0 %v7142_v42  ;;  %2856 = vmatprep.subr.bf16.mxu1 %v7169_v51 }
 0x14f   : > { %v7442_v25 = vpop.eup %7441  ;;  %7455 = vpow.bf16 %v1175_v15  ;;  %v899_v27 = vpack.c.bf16 %v581_v21, %v577_v12  ;;  %v7146_v15 = vld [vmem:[#allocation3 + $0x260] ss:$16 sps:$4 sm:$0xff]  }
 0x150   : > { %v7444_v34 = vpop.eup %7443  ;;  %v1015_v35 = vadd.bf16 %v8551_v8, %v898_v20  ;;  %v1388_v56 = vmul.bf16 1065369472, %v7442_v25  ;;  %v7176_v20 = vld [vmem:[#allocation3 + $0x268] ss:$16 sps:$4 sm:$0xff]   ;;  %v7184_v25 = vld [vmem:[#allocation3 + $0x28c] ss:$16 sps:$4 sm:$0xff]  }
 0x151   : > { %v7446_v41 = vpop.eup %7445  ;;  %v1016_v43 = vadd.bf16 %v8554_v10, %v899_v27  ;;  %v1390_v42 = vmul.bf16 1065369472, %v7444_v34  ;;  %2471 = vmatpush1.bf16.msra.mxu0 %v7140_v13  ;;  %2857 = vmatpush1.bf16.msra.mxu1 %v7167_v17 }
 0x152   : > { %v7448_v50 = vpop.eup %7447  ;;  %v1327_v51 = vadd.bf16 1065369472, %v7446_v41  ;;  %v1079_v55 = vsub.bf16 0, %v1015_v35  ;;  %2472 = vmatprep.subr.bf16.mxu0 %v7145_v22  ;;  %2858 = vmatprep.subr.bf16.mxu1 %v7175_v24  ;;  %v7151_v24 = vld [vmem:[#allocation3 + $0x284] ss:$16 sps:$4 sm:$0xff]   ;;  %v8628_v41 = vpop.f32.mrb[20].mxu1 }
 0x153   : > { %v1328_v1 = vadd.bf16 1065369472, %v7448_v50  ;;  %v1080_v3 = vsub.bf16 0, %v1016_v43  ;;  %v585_v5 = vpop.f32.mrb[24].mxu0  ;;  %2317 = vmatprep.mubr.bf16.mxu0 %v1390_v42  ;;  %2703 = vmatprep.mubr.bf16.mxu1 %v1390_v42  ;;  %v7149_v35 = vld [vmem:[#allocation3 + $0x280] ss:$16 sps:$4 sm:$0xff]  }
 0x154   : > { %v1184_v12 = vmul.bf16 1069105081, %v1079_v55  ;;  %v587_v13 = vpop.f32.mrb[25].mxu0  ;;  %2318 = vmatmul.mubr.bf16.gmra.mrb[68].mxu0 %v1388_v56  ;;  %2704 = vmatmul.mubr.bf16.gmra.mrb[68].mxu1 %v1388_v56  ;;  %7457 = vrcp.bf16 %v1327_v51  ;;  %v7182_v50 = vld [vmem:[#allocation3 + $0x288] ss:$16 sps:$4 sm:$0xff]  }
 0x155   : > { %v1187_v16 = vmul.bf16 1069105081, %v1080_v3  ;;  %v589_v17 = vpop.f32.mrb[26].mxu0  ;;  %2473 = vmatpush1.bf16.msra.mxu0 %v7143_v29  ;;  %7459 = vrcp.bf16 %v1328_v1  ;;  %2859 = vmatpush1.bf16.msra.mxu1 %v7173_v38  ;;  %v7154_v29 = vld [vmem:[#allocation3 + $0x2a4] ss:$16 sps:$4 sm:$0xff]   ;;  %v8631_v38 = vpop.f32.mrb[21].mxu1 }
 0x156   : > { %7461 = vpow.bf16 %v1184_v12  ;;  %v902_v21 = vpack.c.bf16 %v589_v17, %v585_v5  ;;  %v591_v22 = vpop.f32.mrb[27].mxu0  ;;  %2474 = vmatprep.subr.bf16.mxu0 %v7148_v37  ;;  %2860 = vmatprep.subr.bf16.mxu1 %v7178_v47  ;;  %v7187_v47 = vld [vmem:[#allocation3 + $0x2ac] ss:$16 sps:$4 sm:$0xff]   ;;  %v8634_v56 = vpop.f32.mrb[22].mxu1 }
 0x157   : > { %v7450_v27 = vpop.eup %7449  ;;  %7463 = vpow.bf16 %v1187_v16  ;;  %v903_v34 = vpack.c.bf16 %v591_v22, %v587_v13  ;;  %v8638_v16 = vpop.f32.mrb[23].mxu1  ;;  %v7155_v13 = vld [vmem:[#allocation3 + $0x2c0] ss:$16 sps:$4 sm:$0xff]  }
 0x158   : > { %v7452_v43 = vpop.eup %7451  ;;  %v1019_v42 = vadd.bf16 %v8551_v8, %v902_v21  ;;  %v1396_v12 = vmul.bf16 1065369472, %v7450_v27 }
 0x159   : > { %v7454_v51 = vpop.eup %7453  ;;  %v1020_v55 = vadd.bf16 %v8554_v10, %v903_v34  ;;  %v1398_v37 = vmul.bf16 1065369472, %v7452_v43  ;;  %2475 = vmatpush1.bf16.msra.mxu0 %v7146_v15  ;;  %2861 = vmatpush1.bf16.msra.mxu1 %v7176_v20  ;;  %v7185_v43 = vld [vmem:[#allocation3 + $0x2a8] ss:$16 sps:$4 sm:$0xff]  }
 0x15a   : > { %v7456_v1 = vpop.eup %7455  ;;  %v1331_v3 = vadd.bf16 1065369472, %v7454_v51  ;;  %v1083_v5 = vsub.bf16 0, %v1019_v42  ;;  %2476 = vmatprep.subr.bf16.mxu0 %v7151_v24  ;;  %2862 = vmatprep.subr.bf16.mxu1 %v7184_v25  ;;  %v7152_v24 = vld [vmem:[#allocation3 + $0x2a0] ss:$16 sps:$4 sm:$0xff]  }
 0x15b   : > { %v1332_v17 = vadd.bf16 1065369472, %v7456_v1  ;;  %v1084_v21 = vsub.bf16 0, %v1020_v55  ;;  %v595_v22 = vpop.f32.mrb[28].mxu0  ;;  %2327 = vmatprep.mubr.bf16.mxu0 %v1398_v37  ;;  %2713 = vmatprep.mubr.bf16.mxu1 %v1398_v37  ;;  %v7157_v55 = vld [vmem:[#allocation3 + $0x2c4] ss:$16 sps:$4 sm:$0xff]  }
 0x15c   : > { %v1196_v20 = vmul.bf16 1069105081, %v1083_v5  ;;  %v597_v34 = vpop.f32.mrb[29].mxu0  ;;  %2328 = vmatmul.mubr.bf16.gmra.mrb[72].mxu0 %v1396_v12  ;;  %2714 = vmatmul.mubr.bf16.gmra.mrb[72].mxu1 %v1396_v12  ;;  %7465 = vrcp.bf16 %v1331_v3  ;;  %v7193_v37 = vld [vmem:[#allocation3 + $0x2cc] ss:$16 sps:$4 sm:$0xff]   ;;  %v8642_v12 = vpop.f32.mrb[24].mxu1 }
 0x15d   : > { %v1199_v25 = vmul.bf16 1069105081, %v1084_v21  ;;  %v599_v27 = vpop.f32.mrb[30].mxu0  ;;  %7467 = vrcp.bf16 %v1332_v17  ;;  %2477 = vmatpush1.bf16.msra.mxu0 %v7149_v35  ;;  %2863 = vmatpush1.bf16.msra.mxu1 %v7182_v50  ;;  %v7160_v17 = vld [vmem:[#allocation3 + $0x2e4] ss:$16 sps:$4 sm:$0xff]   ;;  %v8645_v50 = vpop.f32.mrb[25].mxu1 }
 0x15e   : > { %7469 = vpow.bf16 %v1196_v20  ;;  %v906_v42 = vpack.c.bf16 %v599_v27, %v595_v22  ;;  %v601_v51 = vpop.f32.mrb[31].mxu0  ;;  %2478 = vmatprep.subr.bf16.mxu0 %v7154_v29  ;;  %2864 = vmatprep.subr.bf16.mxu1 %v7187_v47  ;;  %v7191_v35 = vld [vmem:[#allocation3 + $0x2c8] ss:$16 sps:$4 sm:$0xff]   ;;  %v7196_v47 = vld [vmem:[#allocation3 + $0x2ec] ss:$16 sps:$4 sm:$0xff]   ;;  %v8648_v27 = vpop.f32.mrb[26].mxu1 }
 0x15f   : > { %v7458_v1 = vpop.eup %7457  ;;  %7471 = vpow.bf16 %v1199_v25  ;;  %v907_v5 = vpack.c.bf16 %v601_v51, %v597_v34  ;;  %v8652_v57 = vpop.f32.mrb[27].mxu1 }
 0x160   : > { %v7460_v3 = vpop.eup %7459  ;;  %v1023_v21 = vadd.bf16 %v8551_v8, %v906_v42  ;;  %v1404_v15 = vmul.bf16 1065369472, %v7458_v1 }
 0x161   : > { %v7462_v20 = vpop.eup %7461  ;;  %v1024_v22 = vadd.bf16 %v8554_v10, %v907_v5  ;;  %v1406_v29 = vmul.bf16 1065369472, %v7460_v3  ;;  %2479 = vmatpush1.bf16.msra.mxu0 %v7152_v24  ;;  %2865 = vmatpush1.bf16.msra.mxu1 %v7185_v43  ;;  %v7161_v24 = vld [vmem:[#allocation3 + $0x300] ss:$16 sps:$4 sm:$0xff]  }
 0x162   : > { %v7464_v34 = vpop.eup %7463  ;;  %v1335_v25 = vadd.bf16 1065369472, %v7462_v20  ;;  %v1087_v51 = vsub.bf16 0, %v1023_v21  ;;  %2480 = vmatprep.subr.bf16.mxu0 %v7157_v55  ;;  %2866 = vmatprep.subr.bf16.mxu1 %v7193_v37  ;;  %v7158_v55 = vld [vmem:[#allocation3 + $0x2e0] ss:$16 sps:$4 sm:$0xff]  }
 0x163   : > { %v1336_v9 = vadd.bf16 1065369472, %v7464_v34  ;;  %v1088_v60 = vsub.bf16 0, %v1024_v22  ;;  %v605_v5 = vpop.f32.mrb[32].mxu0  ;;  %2337 = vmatprep.mubr.bf16.mxu0 %v1406_v29  ;;  %2723 = vmatprep.mubr.bf16.mxu1 %v1406_v29  ;;  %v7194_v21 = vld [vmem:[#allocation3 + $0x2e8] ss:$16 sps:$4 sm:$0xff]  }
 0x164   : > { %v1208_v43 = vmul.bf16 1069105081, %v1087_v51  ;;  %v607_v3 = vpop.f32.mrb[33].mxu0  ;;  %2338 = vmatmul.mubr.bf16.gmra.mrb[76].mxu0 %v1404_v15  ;;  %2724 = vmatmul.mubr.bf16.gmra.mrb[76].mxu1 %v1404_v15  ;;  %7473 = vrcp.bf16 %v1335_v25  ;;  %v7163_v29 = vld [vmem:[#allocation3 + $0x304] ss:$16 sps:$4 sm:$0xff]   ;;  %v8656_v15 = vpop.f32.mrb[28].mxu1 }
 0x165   : > { %v1211_v37 = vmul.bf16 1069105081, %v1088_v60  ;;  %v609_v1 = vpop.f32.mrb[34].mxu0  ;;  %7475 = vrcp.bf16 %v1336_v9  ;;  %2481 = vmatpush1.bf16.msra.mxu0 %v7155_v13  ;;  %2867 = vmatpush1.bf16.msra.mxu1 %v7191_v35  ;;  %v7202_v34 = vld [vmem:[#allocation3 + $0x30c] ss:$16 sps:$4 sm:$0xff]   ;;  %10195 = vst [vmem:[#allocation12_spill] sm:$0xff] %v8656_v15 }
 0x166   : > { %7477 = vpow.bf16 %v1208_v43  ;;  %v910_v20 = vpack.c.bf16 %v609_v1, %v605_v5  ;;  %v611_v22 = vpop.f32.mrb[35].mxu0  ;;  %2482 = vmatprep.subr.bf16.mxu0 %v7160_v17  ;;  %2868 = vmatprep.subr.bf16.mxu1 %v7196_v47  ;;  %v7172_v9 = vld [vmem:[#allocation3 + $0x324] ss:$16 sps:$4 sm:$0xff]   ;;  %v7200_v13 = vld [vmem:[#allocation3 + $0x308] ss:$16 sps:$4 sm:$0xff]   ;;  %v8659_v35 = vpop.f32.mrb[29].mxu1 }
 0x167   : > { %v7466_v42 = vpop.eup %7465  ;;  %7479 = vpow.bf16 %v1211_v37  ;;  %v911_v51 = vpack.c.bf16 %v611_v22, %v607_v3  ;;  %v7205_v47 = vld [vmem:[#allocation3 + $0x32c] ss:$16 sps:$4 sm:$0xff]   ;;  %v8662_v1 = vpop.f32.mrb[30].mxu1 }
 0x168   : > { %v7468_v25 = vpop.eup %7467  ;;  %v1027_v60 = vadd.bf16 %v8551_v8, %v910_v20  ;;  %v1412_v6 = vmul.bf16 1065369472, %v7466_v42  ;;  %v8666_v18 = vpop.f32.mrb[31].mxu1  ;;  %v7170_v42 = vld [vmem:[#allocation3 + $0x320] ss:$16 sps:$4 sm:$0xff]  }
 0x169   : > { %v7470_v43 = vpop.eup %7469  ;;  %v1028_v5 = vadd.bf16 %v8554_v10, %v911_v51  ;;  %v1414_v17 = vmul.bf16 1065369472, %v7468_v25  ;;  %2483 = vmatpush1.bf16.msra.mxu0 %v7158_v55  ;;  %2869 = vmatpush1.bf16.msra.mxu1 %v7194_v21  ;;  %v7179_v55 = vld [vmem:[#allocation3 + $0x340] ss:$16 sps:$4 sm:$0xff]  }
 0x16a   : > { %v7472_v3 = vpop.eup %7471  ;;  %v1339_v37 = vadd.bf16 1065369472, %v7470_v43  ;;  %v1091_v22 = vsub.bf16 0, %v1027_v60  ;;  %2484 = vmatprep.subr.bf16.mxu0 %v7163_v29  ;;  %2870 = vmatprep.subr.bf16.mxu1 %v7202_v34  ;;  %v7203_v60 = vld [vmem:[#allocation3 + $0x328] ss:$16 sps:$4 sm:$0xff]  }
 0x16b   : > { %v1340_v23 = vadd.bf16 1065369472, %v7472_v3  ;;  %v1092_v53 = vsub.bf16 0, %v1028_v5  ;;  %v615_v51 = vpop.f32.mrb[36].mxu0  ;;  %2347 = vmatprep.mubr.bf16.mxu0 %v1414_v17  ;;  %2733 = vmatprep.mubr.bf16.mxu1 %v1414_v17  ;;  %v7181_v17 = vld [vmem:[#allocation3 + $0x344] ss:$16 sps:$4 sm:$0xff]  }
 0x16c   : > { %v1220_v21 = vmul.bf16 1069105081, %v1091_v22  ;;  %v617_v25 = vpop.f32.mrb[37].mxu0  ;;  %2348 = vmatmul.mubr.bf16.gmra.mrb[80].mxu0 %v1412_v6  ;;  %2734 = vmatmul.mubr.bf16.gmra.mrb[80].mxu1 %v1412_v6  ;;  %7481 = vrcp.bf16 %v1339_v37  ;;  %v7211_v3 = vld [vmem:[#allocation3 + $0x34c] ss:$16 sps:$4 sm:$0xff]   ;;  %v8670_v6 = vpop.f32.mrb[32].mxu1 }
 0x16d   : > { %v1223_v29 = vmul.bf16 1069105081, %v1092_v53  ;;  %v619_v34 = vpop.f32.mrb[38].mxu0  ;;  %7483 = vrcp.bf16 %v1340_v23  ;;  %2485 = vmatpush1.bf16.msra.mxu0 %v7161_v24  ;;  %2871 = vmatpush1.bf16.msra.mxu1 %v7200_v13  ;;  %10196 = vst [vmem:[#allocation13_spill] sm:$0xff] %v8670_v6  ;;  %v7190_v23 = vld [vmem:[#allocation3 + $0x364] ss:$16 sps:$4 sm:$0xff]  }
 0x16e   : > { %7485 = vpow.bf16 %v1220_v21  ;;  %v914_v43 = vpack.c.bf16 %v619_v34, %v615_v51  ;;  %v621_v5 = vpop.f32.mrb[39].mxu0  ;;  %2486 = vmatprep.subr.bf16.mxu0 %v7172_v9  ;;  %2872 = vmatprep.subr.bf16.mxu1 %v7205_v47  ;;  %v7209_v24 = vld [vmem:[#allocation3 + $0x348] ss:$16 sps:$4 sm:$0xff]   ;;  %v8673_v13 = vpop.f32.mrb[33].mxu1  ;;  %v7214_v47 = vld [vmem:[#allocation3 + $0x36c] ss:$16 sps:$4 sm:$0xff]  }
 0x16f   : > { %v7474_v20 = vpop.eup %7473  ;;  %7487 = vpow.bf16 %v1223_v29  ;;  %v915_v22 = vpack.c.bf16 %v621_v5, %v617_v25  ;;  %v8676_v34 = vpop.f32.mrb[34].mxu1 }
 0x170   : > { %v7476_v37 = vpop.eup %7475  ;;  %v1031_v53 = vadd.bf16 %v8551_v8, %v914_v43  ;;  %10197 = vst [vmem:[#allocation14_spill] sm:$0xff] %v8676_v34  ;;  %v1420_v58 = vmul.bf16 1065369472, %v7474_v20  ;;  %v8680_v32 = vpop.f32.mrb[35].mxu1  ;;  %v7188_v20 = vld [vmem:[#allocation3 + $0x360] ss:$16 sps:$4 sm:$0xff]  }
 0x171   : > { %v7478_v21 = vpop.eup %7477  ;;  %v1032_v51 = vadd.bf16 %v8554_v10, %v915_v22  ;;  %v1422_v9 = vmul.bf16 1065369472, %v7476_v37  ;;  %2487 = vmatpush1.bf16.msra.mxu0 %v7170_v42  ;;  %2873 = vmatpush1.bf16.msra.mxu1 %v7203_v60  ;;  %v7197_v42 = vld [vmem:[#allocation3 + $0x380] ss:$16 sps:$4 sm:$0xff]  }
 0x172   : > { %v7480_v25 = vpop.eup %7479  ;;  %v1343_v29 = vadd.bf16 1065369472, %v7478_v21  ;;  %v1095_v5 = vsub.bf16 0, %v1031_v53  ;;  %2488 = vmatprep.subr.bf16.mxu0 %v7181_v17  ;;  %2874 = vmatprep.subr.bf16.mxu1 %v7211_v3  ;;  %v7212_v53 = vld [vmem:[#allocation3 + $0x368] ss:$16 sps:$4 sm:$0xff]  }
 0x173   : > { %v1344_v36 = vadd.bf16 1065369472, %v7480_v25  ;;  %v1096_v61 = vsub.bf16 0, %v1032_v51  ;;  %v625_v22 = vpop.f32.mrb[40].mxu0  ;;  %2357 = vmatprep.mubr.bf16.mxu0 %v1422_v9  ;;  %2743 = vmatprep.mubr.bf16.mxu1 %v1422_v9  ;;  %v7199_v9 = vld [vmem:[#allocation3 + $0x384] ss:$16 sps:$4 sm:$0xff]  }
 0x174   : > { %v1232_v60 = vmul.bf16 1069105081, %v1095_v5  ;;  %v627_v37 = vpop.f32.mrb[41].mxu0  ;;  %2358 = vmatmul.mubr.bf16.gmra.mrb[84].mxu0 %v1420_v58  ;;  %2744 = vmatmul.mubr.bf16.gmra.mrb[84].mxu1 %v1420_v58  ;;  %7489 = vrcp.bf16 %v1343_v29  ;;  %v7220_v25 = vld [vmem:[#allocation3 + $0x38c] ss:$16 sps:$4 sm:$0xff]   ;;  %v8684_v58 = vpop.f32.mrb[36].mxu1 }
 0x175   : > { %v1235_v17 = vmul.bf16 1069105081, %v1096_v61  ;;  %v629_v3 = vpop.f32.mrb[42].mxu0  ;;  %7491 = vrcp.bf16 %v1344_v36  ;;  %2489 = vmatpush1.bf16.msra.mxu0 %v7179_v55  ;;  %2875 = vmatpush1.bf16.msra.mxu1 %v7209_v24  ;;  %10198 = vst [vmem:[#allocation15_spill] sm:$0xff] %v8684_v58  ;;  %v7208_v36 = vld [vmem:[#allocation3 + $0x3a4] ss:$16 sps:$4 sm:$0xff]  }
 0x176   : > { %7493 = vpow.bf16 %v1232_v60  ;;  %v918_v21 = vpack.c.bf16 %v629_v3, %v625_v22  ;;  %v631_v51 = vpop.f32.mrb[43].mxu0  ;;  %2490 = vmatprep.subr.bf16.mxu0 %v7190_v23  ;;  %2876 = vmatprep.subr.bf16.mxu1 %v7214_v47  ;;  %v7218_v55 = vld [vmem:[#allocation3 + $0x388] ss:$16 sps:$4 sm:$0xff]   ;;  %v8687_v24 = vpop.f32.mrb[37].mxu1  ;;  %v7223_v47 = vld [vmem:[#allocation3 + $0x3ac] ss:$16 sps:$4 sm:$0xff]  }
 0x177   : > { %v7482_v43 = vpop.eup %7481  ;;  %7495 = vpow.bf16 %v1235_v17  ;;  %v919_v5 = vpack.c.bf16 %v631_v51, %v627_v37  ;;  %10199 = vst [vmem:[#allocation16_spill] sm:$0xff] %v8687_v24  ;;  %v8690_v3 = vpop.f32.mrb[38].mxu1 }
 0x178   : > { %v7484_v29 = vpop.eup %7483  ;;  %v1035_v61 = vadd.bf16 %v8551_v8, %v918_v21  ;;  %10200 = vst [vmem:[#allocation17_spill] sm:$0xff] %v8690_v3  ;;  %v1428_v63 = vmul.bf16 1065369472, %v7482_v43  ;;  %v8694_v6 = vpop.f32.mrb[39].mxu1  ;;  %v7206_v43 = vld [vmem:[#allocation3 + $0x3a0] ss:$16 sps:$4 sm:$0xff]  }
 0x179   : > { %v7486_v60 = vpop.eup %7485  ;;  %v1036_v22 = vadd.bf16 %v8554_v10, %v919_v5  ;;  %v1430_v23 = vmul.bf16 1065369472, %v7484_v29  ;;  %2491 = vmatpush1.bf16.msra.mxu0 %v7188_v20  ;;  %2877 = vmatpush1.bf16.msra.mxu1 %v7212_v53  ;;  %10201 = vst [vmem:[#allocation18_spill] sm:$0xff] %v8694_v6  ;;  %v7215_v20 = vld [vmem:[#allocation3 + $0x3c0] ss:$16 sps:$4 sm:$0xff]  }
 0x17a   : > { %v7488_v37 = vpop.eup %7487  ;;  %v1347_v17 = vadd.bf16 1065369472, %v7486_v60  ;;  %v1099_v51 = vsub.bf16 0, %v1035_v61  ;;  %2492 = vmatprep.subr.bf16.mxu0 %v7199_v9  ;;  %2878 = vmatprep.subr.bf16.mxu1 %v7220_v25  ;;  %v7221_v61 = vld [vmem:[#allocation3 + $0x3a8] ss:$16 sps:$4 sm:$0xff]  }
 0x17b   : > { %v1348_v34 = vadd.bf16 1065369472, %v7488_v37  ;;  %v1100_v15 = vsub.bf16 0, %v1036_v22  ;;  %v635_v5 = vpop.f32.mrb[44].mxu0  ;;  %2367 = vmatprep.mubr.bf16.mxu0 %v1430_v23  ;;  %2753 = vmatprep.mubr.bf16.mxu1 %v1430_v23  ;;  %v7217_v23 = vld [vmem:[#allocation3 + $0x3c4] ss:$16 sps:$4 sm:$0xff]  }
 0x17c   : > { %v1244_v53 = vmul.bf16 1069105081, %v1099_v51  ;;  %v637_v29 = vpop.f32.mrb[45].mxu0  ;;  %2368 = vmatmul.mubr.bf16.gmra.mrb[88].mxu0 %v1428_v63  ;;  %2754 = vmatmul.mubr.bf16.gmra.mrb[88].mxu1 %v1428_v63  ;;  %7497 = vrcp.bf16 %v1347_v17  ;;  %v7229_v37 = vld [vmem:[#allocation3 + $0x3cc] ss:$16 sps:$4 sm:$0xff]   ;;  %v8698_v63 = vpop.f32.mrb[40].mxu1 }
 0x17d   : > { %v1247_v9 = vmul.bf16 1069105081, %v1100_v15  ;;  %v639_v25 = vpop.f32.mrb[46].mxu0  ;;  %7499 = vrcp.bf16 %v1348_v34  ;;  %2493 = vmatpush1.bf16.msra.mxu0 %v7197_v42  ;;  %2879 = vmatpush1.bf16.msra.mxu1 %v7218_v55  ;;  %v7226_v34 = vld [vmem:[#allocation3 + $0x3e4] ss:$16 sps:$4 sm:$0xff]   ;;  %v8701_v55 = vpop.f32.mrb[41].mxu1 }
 0x17e   : > { %7501 = vpow.bf16 %v1244_v53  ;;  %v922_v60 = vpack.c.bf16 %v639_v25, %v635_v5  ;;  %v641_v22 = vpop.f32.mrb[47].mxu0  ;;  %2494 = vmatprep.subr.bf16.mxu0 %v7208_v36  ;;  %2880 = vmatprep.subr.bf16.mxu1 %v7223_v47  ;;  %v7227_v42 = vld [vmem:[#allocation3 + $0x3c8] ss:$16 sps:$4 sm:$0xff]   ;;  %v7232_v47 = vld [vmem:[#allocation3 + $0x3ec] ss:$16 sps:$4 sm:$0xff]   ;;  %v8704_v25 = vpop.f32.mrb[42].mxu1 }
 0x17f   : > { %v7490_v21 = vpop.eup %7489  ;;  %7503 = vpow.bf16 %v1247_v9  ;;  %v923_v51 = vpack.c.bf16 %v641_v22, %v637_v29  ;;  %v8708_v3 = vpop.f32.mrb[43].mxu1 }
 0x180   : > { %v7492_v17 = vpop.eup %7491  ;;  %v1039_v15 = vadd.bf16 %v8551_v8, %v922_v60  ;;  %v1436_v58 = vmul.bf16 1065369472, %v7490_v21  ;;  %v7224_v21 = vld [vmem:[#allocation3 + $0x3e0] ss:$16 sps:$4 sm:$0xff]  }
 0x181   : > { %v7494_v53 = vpop.eup %7493  ;;  %v1040_v5 = vadd.bf16 %v8554_v10, %v923_v51  ;;  %v1438_v36 = vmul.bf16 1065369472, %v7492_v17  ;;  %2495 = vmatpush1.bf16.msra.mxu0 %v7206_v43  ;;  %2881 = vmatpush1.bf16.msra.mxu1 %v7221_v61 }
 0x182   : > { %v7496_v29 = vpop.eup %7495  ;;  %v1351_v9 = vadd.bf16 1065369472, %v7494_v53  ;;  %v1103_v22 = vsub.bf16 0, %v1039_v15  ;;  %2496 = vmatprep.subr.bf16.mxu0 %v7217_v23  ;;  %2882 = vmatprep.subr.bf16.mxu1 %v7229_v37  ;;  %v7230_v15 = vld [vmem:[#allocation3 + $0x3e8] ss:$16 sps:$4 sm:$0xff]  }
 0x183   : > { %v1352_v24 = vadd.bf16 1065369472, %v7496_v29  ;;  %v1104_v6 = vsub.bf16 0, %v1040_v5  ;;  %v645_v51 = vpop.f32.mrb[48].mxu0  ;;  %2377 = vmatprep.mubr.bf16.mxu0 %v1438_v36  ;;  %2763 = vmatprep.mubr.bf16.mxu1 %v1438_v36 }
 0x184   : > { %v1256_v61 = vmul.bf16 1069105081, %v1103_v22  ;;  %v647_v17 = vpop.f32.mrb[49].mxu0  ;;  %2378 = vmatmul.mubr.bf16.gmra.mrb[92].mxu0 %v1436_v58  ;;  %2764 = vmatmul.mubr.bf16.gmra.mrb[92].mxu1 %v1436_v58  ;;  %7505 = vrcp.bf16 %v1351_v9  ;;  %v8712_v22 = vpop.f32.mrb[44].mxu1 }
 0x185   : > { %v1259_v23 = vmul.bf16 1069105081, %v1104_v6  ;;  %v649_v37 = vpop.f32.mrb[50].mxu0  ;;  %7507 = vrcp.bf16 %v1352_v24  ;;  %2497 = vmatpush1.bf16.msra.mxu0 %v7215_v20  ;;  %2883 = vmatpush1.bf16.msra.mxu1 %v7227_v42  ;;  %10202 = vst [vmem:[#allocation19_spill] sm:$0xff] %v8712_v22  ;;  %v8715_v9 = vpop.f32.mrb[45].mxu1  ;;  %v966_v42 = vcombine.high %v8541_v2, %v8541_v2 }
 0x186   : > { %7509 = vpow.bf16 %v1256_v61  ;;  %v926_v53 = vpack.c.bf16 %v649_v37, %v645_v51  ;;  %v651_v5 = vpop.f32.mrb[51].mxu0  ;;  %2498 = vmatprep.subr.bf16.mxu0 %v7226_v34  ;;  %2884 = vmatprep.subr.bf16.mxu1 %v7232_v47  ;;  %v8720_v34 = vpop.f32.mrb[46].mxu1 }
 0x187   : > { %v7498_v36 = vpop.eup %7497  ;;  %7511 = vpow.bf16 %v1259_v23  ;;  %v927_v29 = vpack.c.bf16 %v651_v5, %v647_v17  ;;  %10203 = vst [vmem:[#allocation20_spill] sm:$0xff] %v8720_v34  ;;  %v8724_v37 = vpop.f32.mrb[47].mxu1 }
 0x188   : > { %v7500_v60 = vpop.eup %7499  ;;  %v1043_v58 = vadd.bf16 %v8551_v8, %v926_v53  ;;  %v1444_v17 = vmul.bf16 1065369472, %v7498_v36  ;;  %v8728_v43 = vpop.f32.mrb[48].mxu1 }
 0x189   : > { %v7502_v6 = vpop.eup %7501  ;;  %v1044_v24 = vadd.bf16 %v8554_v10, %v927_v29  ;;  %v1446_v20 = vmul.bf16 1065369472, %v7500_v60  ;;  %2499 = vmatpush1.bf16.msra.mxu0 %v7224_v21  ;;  %2885 = vmatpush1.bf16.msra.mxu1 %v7230_v15  ;;  %10204 = vst [vmem:[#allocation21_spill] sm:$0xff] %v8728_v43 }
 0x18a   : > { %v7504_v47 = vpop.eup %7503  ;;  %v1355_v51 = vadd.bf16 1065369472, %v7502_v6  ;;  %v1107_v61 = vsub.bf16 0, %v1043_v58  ;;  %v989_v58 = vpack.i.b16 %v966_v42, %v966_v42 }
 0x18b   : > { %v1356_v53 = vadd.bf16 1065369472, %v7504_v47  ;;  %v1108_v5 = vsub.bf16 0, %v1044_v24  ;;  %v655_v29 = vpop.f32.mrb[52].mxu0  ;;  %2387 = vmatprep.mubr.bf16.mxu0 %v1446_v20  ;;  %2773 = vmatprep.mubr.bf16.mxu1 %v1446_v20 }
 0x18c   : > { %v1268_v60 = vmul.bf16 1069105081, %v1107_v61  ;;  %v657_v21 = vpop.f32.mrb[53].mxu0  ;;  %2388 = vmatmul.mubr.bf16.gmra.mrb[96].mxu0 %v1444_v17  ;;  %2774 = vmatmul.mubr.bf16.gmra.mrb[96].mxu1 %v1444_v17  ;;  %7513 = vrcp.bf16 %v1355_v51  ;;  %v965_v61 = vcombine.high %v8538_v0, %v8538_v0  ;;  %v8733_v17 = vpop.f32.mrb[49].mxu1 }
 0x18d   : > { %v1271_v15 = vmul.bf16 1069105081, %v1108_v5  ;;  %v659_v36 = vpop.f32.mrb[54].mxu0  ;;  %7515 = vrcp.bf16 %v1356_v53  ;;  %v8737_v5 = vrot.slane %v989_v58, %v8546_v4 }
 0x18e   : > { %7517 = vpow.bf16 %v1268_v60  ;;  %v930_v6 = vpack.c.bf16 %v659_v36, %v655_v29  ;;  %v661_v23 = vpop.f32.mrb[55].mxu0  ;;  %v8739_v29 = vpop.f32.mrb[50].mxu1  ;;  %v10206_v36 = vpack.c.bf16 %v8568_v33, %v8561_v28 }
 0x18f   : > { %v7506_v47 = vpop.eup %7505  ;;  %7519 = vpow.bf16 %v1271_v15  ;;  %v931_v24 = vpack.c.bf16 %v661_v23, %v657_v21  ;;  %10205 = vst [vmem:[#allocation22_spill] sm:$0xff] %v8739_v29 }
 0x190   : > { %v7508_v20 = vpop.eup %7507  ;;  %v1047_v2 = vadd.bf16 %v8551_v8, %v930_v6  ;;  %v1452_v15 = vmul.bf16 1065369472, %v7506_v47  ;;  %v8743_v6 = vpop.f32.mrb[51].mxu1 }
 0x191   : > { %v7510_v51 = vpop.eup %7509  ;;  %v1048_v53 = vadd.bf16 %v8554_v10, %v931_v24  ;;  %v1454_v42 = vmul.bf16 1065369472, %v7508_v20 }
 0x192   : > { %v7512_v23 = vpop.eup %7511  ;;  %v1359_v60 = vadd.bf16 1065369472, %v7510_v51  ;;  %v1111_v21 = vsub.bf16 0, %v1047_v2  ;;  %v982_v51 = vpack.i.b16 %v965_v61, %v965_v61 }
 0x193   : > { %v1360_v0 = vadd.bf16 1065369472, %v7512_v23  ;;  %v1112_v22 = vsub.bf16 0, %v1048_v53  ;;  %v665_v34 = vpop.f32.mrb[56].mxu0  ;;  %2397 = vmatprep.mubr.bf16.mxu0 %v1454_v42  ;;  %2783 = vmatprep.mubr.bf16.mxu1 %v1454_v42  ;;  %v998_v23 = vadd.bf16 %v8737_v5, %v10206_v36 }
 0x194   : > { %v1280_v24 = vmul.bf16 1069105081, %v1111_v21  ;;  %v667_v20 = vpop.f32.mrb[57].mxu0  ;;  %2398 = vmatmul.mubr.bf16.gmra.mrb[100].mxu0 %v1452_v15  ;;  %2784 = vmatmul.mubr.bf16.gmra.mrb[100].mxu1 %v1452_v15  ;;  %7521 = vrcp.bf16 %v1359_v60  ;;  %v8751_v21 = vpop.f32.mrb[52].mxu1 }
 0x195   : > { %v1283_v2 = vmul.bf16 1069105081, %v1112_v22  ;;  %v669_v47 = vpop.f32.mrb[58].mxu0  ;;  %7523 = vrcp.bf16 %v1360_v0  ;;  %10207 = vst [vmem:[#allocation23_spill] sm:$0xff] %v8751_v21  ;;  %v8755_v22 = vrot.slane %v982_v51, %v8546_v4  ;;  %v8757_v60 = vpop.f32.mrb[53].mxu1  ;;  %v1062_v36 = vsub.bf16 0, %v998_v23 }
 0x196   : > { %7525 = vpow.bf16 %v1280_v24  ;;  %v934_v53 = vpack.c.bf16 %v669_v47, %v665_v34  ;;  %v671_v42 = vpop.f32.mrb[59].mxu0  ;;  %v8760_v34 = vpop.f32.mrb[54].mxu1 }
 0x197   : > { %v7514_v43 = vpop.eup %7513  ;;  %7527 = vpow.bf16 %v1283_v2  ;;  %v935_v58 = vpack.c.bf16 %v671_v42, %v667_v20  ;;  %10208 = vst [vmem:[#allocation24_spill] sm:$0xff] %v8760_v34 }
 0x198   : > { %v7516_v29 = vpop.eup %7515  ;;  %v1051_v61 = vadd.bf16 %v8551_v8, %v934_v53  ;;  %v1460_v2 = vmul.bf16 1065369472, %v7514_v43  ;;  %v8764_v53 = vpop.f32.mrb[55].mxu1  ;;  %v10209_v43 = vpack.c.bf16 %v8564_v30, %v8558_v26 }
 0x199   : > { %v7518_v28 = vpop.eup %7517  ;;  %v1052_v33 = vadd.bf16 %v8554_v10, %v935_v58  ;;  %v1462_v15 = vmul.bf16 1065369472, %v7516_v29  ;;  %v8776_v34 = vpop.f32.mrb[56].mxu1 }
 0x19a   : > { %v7520_v0 = vpop.eup %7519  ;;  %v1363_v24 = vadd.bf16 1065369472, %v7518_v28  ;;  %v1115_v20 = vsub.bf16 0, %v1051_v61  ;;  %v997_v61 = vadd.bf16 %v8755_v22, %v10209_v43 }
 0x19b   : > { %v1364_v51 = vadd.bf16 1065369472, %v7520_v0  ;;  %v1116_v42 = vsub.bf16 0, %v1052_v33  ;;  %v675_v4 = vpop.f32.mrb[60].mxu0  ;;  %2407 = vmatprep.mubr.bf16.mxu0 %v1462_v15  ;;  %2793 = vmatprep.mubr.bf16.mxu1 %v1462_v15  ;;  %v1133_v0 = vmul.bf16 1069105081, %v1062_v36  ;;  %v10210_v33 = vpack.c.bf16 %v8582_v54, %v8575_v46 }
 0x19c   : > { %v1292_v58 = vmul.bf16 1069105081, %v1115_v20  ;;  %v677_v23 = vpop.f32.mrb[61].mxu0  ;;  %2408 = vmatmul.mubr.bf16.gmra.mrb[104].mxu0 %v1460_v2  ;;  %2794 = vmatmul.mubr.bf16.gmra.mrb[104].mxu1 %v1460_v2  ;;  %7529 = vrcp.bf16 %v1363_v24  ;;  %v1061_v24 = vsub.bf16 0, %v997_v61 }
 0x19d   : > { %v1295_v28 = vmul.bf16 1069105081, %v1116_v42  ;;  %v679_v47 = vpop.f32.mrb[62].mxu0  ;;  %v1002_v15 = vadd.bf16 %v8737_v5, %v10210_v33  ;;  %7531 = vrcp.bf16 %v1364_v51  ;;  %v8779_v42 = vpop.f32.mrb[57].mxu1 }
 0x19e   : > { %7533 = vpow.bf16 %v1292_v58  ;;  %v938_v20 = vpack.c.bf16 %v679_v47, %v675_v4  ;;  %v681_v29 = vpop.f32.mrb[63].mxu0  ;;  %v8782_v58 = vpop.f32.mrb[58].mxu1  ;;  %v1130_v33 = vmul.bf16 1069105081, %v1061_v24 }
 0x19f   : > { %v7522_v21 = vpop.eup %7521  ;;  %7535 = vpow.bf16 %v1295_v28  ;;  %v939_v2 = vpack.c.bf16 %v681_v29, %v677_v23  ;;  %v1066_v51 = vsub.bf16 0, %v1002_v15  ;;  %v936_v23 = vpack.c.bf16 %v8782_v58, %v8776_v34  ;;  %v8786_v28 = vpop.f32.mrb[59].mxu1 }
 0x1a0   : > { %v7524_v26 = vpop.eup %7523  ;;  %v1055_v30 = vadd.bf16 %v8551_v8, %v938_v20  ;;  %7537 = vpow.bf16 %v1133_v0  ;;  %v1468_v29 = vmul.bf16 1065369472, %v7522_v21  ;;  %v10211_v15 = vpack.c.bf16 %v8578_v49, %v8572_v44  ;;  %v8798_v24 = vpop.f32.mrb[60].mxu1 }
 0x1a1   : > { %v7526_v36 = vpop.eup %7525  ;;  %v1056_v46 = vadd.bf16 %v8554_v10, %v939_v2  ;;  %v1470_v54 = vmul.bf16 1065369472, %v7524_v26  ;;  %v937_v10 = vpack.c.bf16 %v8786_v28, %v8779_v42  ;;  %v1145_v2 = vmul.bf16 1069105081, %v1066_v51  ;;  %v8800_v44 = vpop.f32.mrb[61].mxu1 }
 0x1a2   : > { %v7528_v4 = vpop.eup %7527  ;;  %v1367_v47 = vadd.bf16 1065369472, %v7526_v36  ;;  %v1119_v43 = vsub.bf16 0, %v1055_v30  ;;  %v1001_v21 = vadd.bf16 %v8755_v22, %v10211_v15  ;;  %v10212_v26 = vpack.c.bf16 %v8596_v19, %v8589_v11 }
 0x1a3   : > { %v1368_v8 = vadd.bf16 1065369472, %v7528_v4  ;;  %v1120_v61 = vsub.bf16 0, %v1056_v46  ;;  %2417 = vmatprep.mubr.bf16.mxu0 %v1470_v54  ;;  %2803 = vmatprep.mubr.bf16.mxu1 %v1470_v54 }
 0x1a4   : > { %v1304_v0 = vmul.bf16 1069105081, %v1119_v43  ;;  %2418 = vmatmul.mubr.bf16.gmra.mrb[108].mxu0 %v1468_v29  ;;  %2804 = vmatmul.mubr.bf16.gmra.mrb[108].mxu1 %v1468_v29  ;;  %7539 = vrcp.bf16 %v1367_v47  ;;  %v1006_v30 = vadd.bf16 %v8737_v5, %v10212_v26  ;;  %v1065_v54 = vsub.bf16 0, %v1001_v21  ;;  %v8802_v47 = vpop.f32.mrb[62].mxu1 }
 0x1a5   : > { %v1307_v20 = vmul.bf16 1069105081, %v1120_v61  ;;  %7541 = vrcp.bf16 %v1368_v8  ;;  %v940_v29 = vpack.c.bf16 %v8802_v47, %v8798_v24  ;;  %v8806_v8 = vpop.f32.mrb[63].mxu1  ;;  %v10213_v21 = vpack.c.bf16 %v8592_v14, %v8586_v7 }
 0x1a6   : > { %7543 = vpow.bf16 %v1304_v0  ;;  %v1070_v51 = vsub.bf16 0, %v1006_v30  ;;  %v941_v0 = vpack.c.bf16 %v8806_v8, %v8800_v44  ;;  %v1142_v15 = vmul.bf16 1069105081, %v1065_v54 }
 0x1a7   : > { %v7530_v36 = vpop.eup %7529  ;;  %7545 = vpow.bf16 %v1307_v20  ;;  %v1005_v20 = vadd.bf16 %v8755_v22, %v10213_v21  ;;  %v10214_v26 = vpack.c.bf16 %v8610_v62, %v8603_v45  ;;  %v1057_v8 = vadd.bf16 %v8755_v22, %v940_v29  ;;  %v7299_v29 = vld [vmem:[#allocation5 + $0x160] ss:$16 sps:$4 sm:$0xff]  }
 0x1a8   : > { %v7532_v46 = vpop.eup %7531  ;;  %7547 = vpow.bf16 %v1130_v33  ;;  %v1476_v43 = vmul.bf16 1065369472, %v7530_v36 }
 0x1a9   : > { %v7534_v49 = vpop.eup %7533  ;;  %7549 = vpow.bf16 %v1145_v2  ;;  %v1478_v4 = vmul.bf16 1065369472, %v7532_v46  ;;  %v1157_v2 = vmul.bf16 1069105081, %v1070_v51  ;;  %v1010_v30 = vadd.bf16 %v8737_v5, %v10214_v26 }
 0x1aa   : > { %v7536_v11 = vpop.eup %7535  ;;  %v1371_v19 = vadd.bf16 1065369472, %v7534_v49  ;;  %v1069_v54 = vsub.bf16 0, %v1005_v20  ;;  %v10216_v20 = vpack.c.bf16 %v8624_v59, %v8617_v40 }
 0x1ab   : > { %v1372_v61 = vadd.bf16 1065369472, %v7536_v11  ;;  %2427 = vmatprep.mubr.bf16.mxu0 %v1478_v4  ;;  %2813 = vmatprep.mubr.bf16.mxu1 %v1478_v4  ;;  %v7538_v33 = vpop.eup %7537 }
 0x1ac   : > { %2428 = vmatmul.mubr.bf16.gmra.mrb[112].mxu0 %v1476_v43  ;;  %2814 = vmatmul.mubr.bf16.gmra.mrb[112].mxu1 %v1476_v43  ;;  %7551 = vrcp.bf16 %v1371_v19  ;;  %v1318_v46 = vadd.bf16 1065369472, %v7538_v33  ;;  %v1074_v43 = vsub.bf16 0, %v1010_v30  ;;  %v1154_v62 = vmul.bf16 1069105081, %v1069_v54 }
 0x1ad   : > { %7553 = vrcp.bf16 %v1372_v61  ;;  %v10215_v61 = vpack.c.bf16 %v8606_v52, %v8600_v39  ;;  %v10217_v52 = vpack.c.bf16 %v8620_v48, %v8614_v31 }
 0x1ae   : > { %7555 = vpow.bf16 %v1142_v15  ;;  %v1169_v15 = vmul.bf16 1069105081, %v1074_v43 }
 0x1af   : > { %v7540_v36 = vpop.eup %7539  ;;  %7557 = vpow.bf16 %v1157_v2  ;;  %v1009_v33 = vadd.bf16 %v8755_v22, %v10215_v61  ;;  %v1014_v2 = vadd.bf16 %v8737_v5, %v10216_v20 }
 0x1b0   : > { %v7542_v49 = vpop.eup %7541  ;;  %v1484_v21 = vmul.bf16 1065369472, %v7540_v36  ;;  %7559 = vrcp.bf16 %v1318_v46 }
 0x1b1   : > { %v7544_v4 = vpop.eup %7543  ;;  %v1486_v11 = vmul.bf16 1065369472, %v7542_v49  ;;  %v1073_v49 = vsub.bf16 0, %v1009_v33 }
 0x1b2   : > { %v7546_v7 = vpop.eup %7545  ;;  %v1375_v14 = vadd.bf16 1065369472, %v7544_v4  ;;  %v1078_v4 = vsub.bf16 0, %v1014_v2 }
 0x1b3   : > { %v7548_v19 = vpop.eup %7547  ;;  %v1376_v51 = vadd.bf16 1065369472, %v7546_v7  ;;  %2437 = vmatprep.mubr.bf16.mxu0 %v1486_v11  ;;  %2823 = vmatprep.mubr.bf16.mxu1 %v1486_v11  ;;  %v1013_v11 = vadd.bf16 %v8755_v22, %v10217_v52  ;;  %v1166_v43 = vmul.bf16 1069105081, %v1073_v49 }
 0x1b4   : > { %v7550_v45 = vpop.eup %7549  ;;  %2438 = vmatmul.mubr.bf16.gmra.mrb[116].mxu0 %v1484_v21  ;;  %2824 = vmatmul.mubr.bf16.gmra.mrb[116].mxu1 %v1484_v21  ;;  %7561 = vrcp.bf16 %v1375_v14  ;;  %v1317_v26 = vadd.bf16 1065369472, %v7548_v19  ;;  %v1181_v7 = vmul.bf16 1069105081, %v1078_v4  ;;  %v10218_v14 = vpack.c.bf16 %v8638_v16, %v8631_v38 }
 0x1b5   : > { %7563 = vrcp.bf16 %v1376_v51  ;;  %v1322_v36 = vadd.bf16 1065369472, %v7550_v45  ;;  %v1077_v45 = vsub.bf16 0, %v1013_v11 }
 0x1b6   : > { %7565 = vpow.bf16 %v1154_v62  ;;  %v1018_v21 = vadd.bf16 %v8737_v5, %v10218_v14  ;;  %v7233_v14 = vld [vmem:[#allocation5] ss:$16 sps:$4 sm:$0xff]  }
 0x1b7   : > { %v7552_v30 = vpop.eup %7551  ;;  %7567 = vpow.bf16 %v1169_v15  ;;  %v1178_v20 = vmul.bf16 1069105081, %v1077_v45 }
 0x1b8   : > { %v7554_v46 = vpop.eup %7553  ;;  %7569 = vrcp.bf16 %v1317_v26  ;;  %v1492_v39 = vmul.bf16 1065369472, %v7552_v30  ;;  %v1082_v15 = vsub.bf16 0, %v1018_v21  ;;  %v10219_v26 = vpack.c.bf16 %v8634_v56, %v8628_v41  ;;  %v7238_v56 = vld [vmem:[#allocation5 + $0xc] ss:$16 sps:$4 sm:$0xff]  }
 0x1b9   : > { %v1494_v54 = vmul.bf16 1065369472, %v7554_v46  ;;  %v7556_v40 = vpop.eup %7555  ;;  %7571 = vrcp.bf16 %v1322_v36  ;;  %v7235_v36 = vld [vmem:[#allocation5 + $0x4] ss:$16 sps:$4 sm:$0xff]   ;;  %4831 = vmatprep.subr.bf16.mxu1 %v7238_v56  ;;  %v7236_v21 = vld [vmem:[#allocation5 + $0x8] ss:$16 sps:$4 sm:$0xff]  }
 0x1ba   : > { %v7558_v59 = vpop.eup %7557  ;;  %v1321_v51 = vadd.bf16 1065369472, %v7556_v40  ;;  %7573 = vpow.bf16 %v1166_v43  ;;  %v1017_v38 = vadd.bf16 %v8755_v22, %v10219_v26  ;;  %v1193_v49 = vmul.bf16 1069105081, %v1082_v15  ;;  %4445 = vmatprep.subr.bf16.mxu0 %v7235_v36  ;;  %v7242_v26 = vld [vmem:[#allocation5 + $0x28] ss:$16 sps:$4 sm:$0xff]  }
 0x1bb   : > { %2447 = vmatprep.mubr.bf16.mxu0 %v1494_v54  ;;  %2833 = vmatprep.mubr.bf16.mxu1 %v1494_v54  ;;  %v7560_v19 = vpop.eup %7559  ;;  %v1326_v48 = vadd.bf16 1065369472, %v7558_v59  ;;  %7575 = vpow.bf16 %v1181_v7  ;;  %v10220_v54 = vpack.c.bf16 %v8652_v57, %v8645_v50  ;;  %v7241_v57 = vld [vmem:[#allocation5 + $0x24] ss:$16 sps:$4 sm:$0xff]   ;;  %v7244_v50 = vld [vmem:[#allocation5 + $0x2c] ss:$16 sps:$4 sm:$0xff]   ;;  %v10222_v15 = vpack.c.bf16 %v8648_v27, %v8642_v12 }
 0x1bc   : > { %2448 = vmatmul.mubr.bf16.gmra.mrb[120].mxu0 %v1492_v39  ;;  %2834 = vmatmul.mubr.bf16.gmra.mrb[120].mxu1 %v1492_v39  ;;  %v1386_v33 = vmul.bf16 1065369472, %v7560_v19  ;;  %7577 = vrcp.bf16 %v1321_v51  ;;  %v1081_v52 = vsub.bf16 0, %v1017_v38  ;;  %v7245_v12 = vld [vmem:[#allocation5 + $0x40] ss:$16 sps:$4 sm:$0xff]  }
 0x1bd   : > { %7579 = vrcp.bf16 %v1326_v48  ;;  %v1022_v41 = vadd.bf16 %v8737_v5, %v10220_v54  ;;  %v10221_v48 = vpack.c.bf16 %v8666_v18, %v8659_v35  ;;  %v7248_v27 = vld [vmem:[#allocation5 + $0x48] ss:$16 sps:$4 sm:$0xff]   ;;  %v7253_v54 = vld [vmem:[#allocation5 + $0x64] ss:$16 sps:$4 sm:$0xff]  }
 0x1be   : > { %7581 = vpow.bf16 %v1178_v20  ;;  %v1190_v7 = vmul.bf16 1069105081, %v1081_v52  ;;  %v1021_v20 = vadd.bf16 %v8755_v22, %v10222_v15  ;;  %v7268_v15 = vld [vmem:[#allocation5 + $0xac] ss:$16 sps:$4 sm:$0xff]  }
 0x1bf   : > { %v7562_v31 = vpop.eup %7561  ;;  %7583 = vpow.bf16 %v1193_v49  ;;  %v1086_v43 = vsub.bf16 0, %v1022_v41  ;;  %v7256_v41 = vld [vmem:[#allocation5 + $0x6c] ss:$16 sps:$4 sm:$0xff]  }
 0x1c0   : > { %v7564_v62 = vpop.eup %7563  ;;  %v1500_v2 = vmul.bf16 1065369472, %v7562_v31  ;;  %v1085_v49 = vsub.bf16 0, %v1021_v20 }
 0x1c1   : > { %v1502_v61 = vmul.bf16 1065369472, %v7564_v62  ;;  %v7566_v16 = vpop.eup %7565  ;;  %v1205_v31 = vmul.bf16 1069105081, %v1086_v43  ;;  %v1026_v62 = vadd.bf16 %v8737_v5, %v10221_v48 }
 0x1c2   : > { %v7568_v30 = vpop.eup %7567  ;;  %v1325_v39 = vadd.bf16 1065369472, %v7566_v16  ;;  %v7247_v16 = vld [vmem:[#allocation5 + $0x44] ss:$16 sps:$4 sm:$0xff]   ;;  %v1202_v43 = vmul.bf16 1069105081, %v1085_v49 }
 0x1c3   : > { %2457 = vmatprep.mubr.bf16.mxu0 %v1502_v61  ;;  %2843 = vmatprep.mubr.bf16.mxu1 %v1502_v61  ;;  %v7570_v46 = vpop.eup %7569  ;;  %v1330_v11 = vadd.bf16 1065369472, %v7568_v30  ;;  %v7250_v30 = vld [vmem:[#allocation5 + $0x4c] ss:$16 sps:$4 sm:$0xff]  }
 0x1c4   : > { %2458 = vmatmul.mubr.bf16.gmra.mrb[124].mxu0 %v1500_v2  ;;  %2844 = vmatmul.mubr.bf16.gmra.mrb[124].mxu1 %v1500_v2  ;;  %v7572_v4 = vpop.eup %7571  ;;  %v1384_v40 = vmul.bf16 1065369472, %v7570_v46  ;;  %7585 = vrcp.bf16 %v1325_v39  ;;  %v7239_v2 = vld [vmem:[#allocation5 + $0x20] ss:$16 sps:$4 sm:$0xff]   ;;  %v1090_v46 = vsub.bf16 0, %v1026_v62  ;;  %v10229_v49 = vld [vmem:[#allocation14_spill] sm:$0xff] }
 0x1c5   : > { %2500 = vmatprep.mubr.bf16.mxu0 %v1386_v33  ;;  %2886 = vmatprep.mubr.bf16.mxu1 %v1386_v33  ;;  %v1394_v59 = vmul.bf16 1065369472, %v7572_v4  ;;  %v7574_v19 = vpop.eup %7573  ;;  %7587 = vrcp.bf16 %v1330_v11  ;;  %v10223_v11 = vpack.c.bf16 %v8680_v32, %v8673_v13 }
 0x1c6   : > { %v7576_v51 = vpop.eup %7575  ;;  %v1329_v33 = vadd.bf16 1065369472, %v7574_v19  ;;  %7589 = vpow.bf16 %v1190_v7  ;;  %v1217_v52 = vmul.bf16 1069105081, %v1090_v46  ;;  %v10224_v7 = vld [vmem:[#allocation12_spill] sm:$0xff] }
 0x1c7   : > { %v7578_v45 = vpop.eup %7577  ;;  %v1334_v38 = vadd.bf16 1065369472, %v7576_v51  ;;  %7591 = vpow.bf16 %v1205_v31  ;;  %v7251_v19 = vld [vmem:[#allocation5 + $0x60] ss:$16 sps:$4 sm:$0xff]   ;;  %v7259_v51 = vld [vmem:[#allocation5 + $0x84] ss:$16 sps:$4 sm:$0xff]  }
 0x1c8   : > { %v7580_v61 = vpop.eup %7579  ;;  %v1392_v35 = vmul.bf16 1065369472, %v7578_v45  ;;  %7593 = vrcp.bf16 %v1329_v33  ;;  %v7262_v45 = vld [vmem:[#allocation5 + $0x8c] ss:$16 sps:$4 sm:$0xff]   ;;  %v7265_v33 = vld [vmem:[#allocation5 + $0xa4] ss:$16 sps:$4 sm:$0xff]  }
 0x1c9   : > { %v7582_v18 = vpop.eup %7581  ;;  %v1402_v36 = vmul.bf16 1065369472, %v7580_v61  ;;  %7595 = vrcp.bf16 %v1334_v38  ;;  %v7260_v61 = vld [vmem:[#allocation5 + $0x88] ss:$16 sps:$4 sm:$0xff]  }
 0x1ca   : > { %v7584_v56 = vpop.eup %7583  ;;  %v1333_v4 = vadd.bf16 1065369472, %v7582_v18 }
 0x1cc   : > { %2501 = vmatmul.mubr.bf16.vlgmr.msra.gmra.mrb[64].mxu0 %v1384_v40  ;;  %2887 = vmatmul.mubr.bf16.vlgmr.msra.gmra.mrb[64].mxu1 %v1384_v40  ;;  %v1030_v40 = vadd.bf16 %v8737_v5, %v10223_v11  ;;  %7597 = vrcp.bf16 %v1333_v4 }
 0x1cd   : > { %2510 = vmatprep.mubr.bf16.mxu0 %v1394_v59  ;;  %2896 = vmatprep.mubr.bf16.mxu1 %v1394_v59  ;;  %7599 = vpow.bf16 %v1217_v52  ;;  %v7274_v52 = vld [vmem:[#allocation5 + $0xcc] ss:$16 sps:$4 sm:$0xff]  }
 0x1ce   : > { %4446 = vmatpush1.bf16.msra.mxu0 %v7233_v14  ;;  %4832 = vmatpush1.bf16.msra.mxu1 %v7236_v21  ;;  %v10225_v14 = vpack.c.bf16 %v8662_v1, %v10224_v7  ;;  %v1094_v48 = vsub.bf16 0, %v1030_v40  ;;  %7601 = vpow.bf16 %v1202_v43  ;;  %v7257_v1 = vld [vmem:[#allocation5 + $0x80] ss:$16 sps:$4 sm:$0xff]  }
 0x1cf   : > { %4447 = vmatprep.subr.bf16.mxu0 %v7241_v57  ;;  %4833 = vmatprep.subr.bf16.mxu1 %v7244_v50  ;;  %v7586_v39 = vpop.eup %7585  ;;  %v7254_v57 = vld [vmem:[#allocation5 + $0x68] ss:$16 sps:$4 sm:$0xff]   ;;  %v1338_v50 = vadd.bf16 1065369472, %v7584_v56  ;;  %v7269_v7 = vld [vmem:[#allocation5 + $0xc0] ss:$16 sps:$4 sm:$0xff]  }
 0x1d0   : > { %v7588_v59 = vpop.eup %7587  ;;  %v1025_v21 = vadd.bf16 %v8755_v22, %v10225_v14  ;;  %v1400_v13 = vmul.bf16 1065369472, %v7586_v39  ;;  %v1229_v38 = vmul.bf16 1069105081, %v1094_v48  ;;  %v7266_v56 = vld [vmem:[#allocation5 + $0xa8] ss:$16 sps:$4 sm:$0xff]  }
 0x1d1   : > { %v7590_v32 = vpop.eup %7589  ;;  %v1410_v31 = vmul.bf16 1065369472, %v7588_v59  ;;  %7603 = vrcp.bf16 %v1338_v50  ;;  %v7271_v39 = vld [vmem:[#allocation5 + $0xc4] ss:$16 sps:$4 sm:$0xff]   ;;  %v7272_v14 = vld [vmem:[#allocation5 + $0xc8] ss:$16 sps:$4 sm:$0xff]  }
 0x1d2   : > { %4448 = vmatpush1.bf16.msra.mxu0 %v7239_v2  ;;  %4834 = vmatpush1.bf16.msra.mxu1 %v7242_v26  ;;  %v1089_v62 = vsub.bf16 0, %v1025_v21  ;;  %v7592_v20 = vpop.eup %7591  ;;  %v1337_v2 = vadd.bf16 1065369472, %v7590_v32  ;;  %v10232_v32 = vpack.c.bf16 %v8708_v3, %v8701_v55 }
 0x1d3   : > { %4449 = vmatprep.subr.bf16.mxu0 %v7247_v16  ;;  %4835 = vmatprep.subr.bf16.mxu1 %v7250_v30  ;;  %v7594_v26 = vpop.eup %7593  ;;  %v10226_v16 = vld [vmem:[#allocation18_spill] sm:$0xff]  ;;  %v10227_v30 = vld [vmem:[#allocation16_spill] sm:$0xff]  ;;  %v1342_v4 = vadd.bf16 1065369472, %v7592_v20 }
 0x1d4   : > { %2511 = vmatmul.mubr.bf16.gmra.mrb[68].mxu0 %v1392_v35  ;;  %2897 = vmatmul.mubr.bf16.gmra.mrb[68].mxu1 %v1392_v35  ;;  %v10228_v18 = vpack.c.bf16 %v10226_v16, %v10227_v30  ;;  %v1214_v46 = vmul.bf16 1069105081, %v1089_v62  ;;  %7605 = vrcp.bf16 %v1337_v2  ;;  %v1408_v11 = vmul.bf16 1065369472, %v7594_v26  ;;  %v10233_v62 = vld [vmem:[#allocation17_spill] sm:$0xff] }
 0x1d5   : > { %2520 = vmatprep.mubr.bf16.mxu0 %v1402_v36  ;;  %2906 = vmatprep.mubr.bf16.mxu1 %v1402_v36  ;;  %v7596_v36 = vpop.eup %7595  ;;  %7607 = vpow.bf16 %v1229_v38  ;;  %v7278_v20 = vld [vmem:[#allocation5 + $0xe8] ss:$16 sps:$4 sm:$0xff]   ;;  %v7283_v26 = vld [vmem:[#allocation5 + $0x104] ss:$16 sps:$4 sm:$0xff]   ;;  %v7286_v38 = vld [vmem:[#allocation5 + $0x10c] ss:$16 sps:$4 sm:$0xff]  }
 0x1d6   : > { %4450 = vmatpush1.bf16.msra.mxu0 %v7245_v12  ;;  %4836 = vmatpush1.bf16.msra.mxu1 %v7248_v27  ;;  %v1034_v35 = vadd.bf16 %v8737_v5, %v10228_v18  ;;  %v10230_v12 = vld [vmem:[#allocation13_spill] sm:$0xff]  ;;  %v1418_v40 = vmul.bf16 1065369472, %v7596_v36  ;;  %7609 = vpow.bf16 %v1214_v46  ;;  %v7284_v36 = vld [vmem:[#allocation5 + $0x108] ss:$16 sps:$4 sm:$0xff]  }
 0x1d7   : > { %4451 = vmatprep.subr.bf16.mxu0 %v7253_v54  ;;  %4837 = vmatprep.subr.bf16.mxu1 %v7256_v41  ;;  %v10231_v27 = vpack.c.bf16 %v10229_v49, %v10230_v12  ;;  %v7263_v41 = vld [vmem:[#allocation5 + $0xa0] ss:$16 sps:$4 sm:$0xff]   ;;  %v7598_v21 = vpop.eup %7597  ;;  %7611 = vrcp.bf16 %v1342_v4  ;;  %v7289_v49 = vld [vmem:[#allocation5 + $0x124] ss:$16 sps:$4 sm:$0xff]   ;;  %v7292_v12 = vld [vmem:[#allocation5 + $0x12c] ss:$16 sps:$4 sm:$0xff]  }
 0x1d8   : > { %v1098_v59 = vsub.bf16 0, %v1034_v35  ;;  %v7600_v50 = vpop.eup %7599  ;;  %v1416_v3 = vmul.bf16 1065369472, %v7598_v21  ;;  %v7281_v35 = vld [vmem:[#allocation5 + $0x100] ss:$16 sps:$4 sm:$0xff]  }
 0x1d9   : > { %v1029_v54 = vadd.bf16 %v8755_v22, %v10231_v27  ;;  %v1346_v2 = vadd.bf16 1065369472, %v7600_v50  ;;  %v7298_v21 = vld [vmem:[#allocation5 + $0x14c] ss:$16 sps:$4 sm:$0xff]  }
 0x1da   : > { %4452 = vmatpush1.bf16.msra.mxu0 %v7251_v19  ;;  %4838 = vmatpush1.bf16.msra.mxu1 %v7254_v57  ;;  %v7277_v19 = vld [vmem:[#allocation5 + $0xe4] ss:$16 sps:$4 sm:$0xff]   ;;  %v7280_v57 = vld [vmem:[#allocation5 + $0xec] ss:$16 sps:$4 sm:$0xff]  }
 0x1db   : > { %4453 = vmatprep.subr.bf16.mxu0 %v7259_v51  ;;  %4839 = vmatprep.subr.bf16.mxu1 %v7262_v45  ;;  %v1093_v43 = vsub.bf16 0, %v1029_v54  ;;  %v7602_v51 = vpop.eup %7601  ;;  %v1241_v45 = vmul.bf16 1069105081, %v1098_v59  ;;  %v7287_v59 = vld [vmem:[#allocation5 + $0x120] ss:$16 sps:$4 sm:$0xff]  }
 0x1dc   : > { %2521 = vmatmul.mubr.bf16.gmra.mrb[72].mxu0 %v1400_v13  ;;  %2907 = vmatmul.mubr.bf16.gmra.mrb[72].mxu1 %v1400_v13  ;;  %v1038_v13 = vadd.bf16 %v8737_v5, %v10232_v32  ;;  %v1341_v16 = vadd.bf16 1065369472, %v7602_v51 }
 0x1dd   : > { %2530 = vmatprep.mubr.bf16.mxu0 %v1410_v31  ;;  %2916 = vmatprep.mubr.bf16.mxu1 %v1410_v31  ;;  %v7604_v31 = vpop.eup %7603  ;;  %v1226_v48 = vmul.bf16 1069105081, %v1093_v43  ;;  %7613 = vpow.bf16 %v1241_v45  ;;  %v7290_v43 = vld [vmem:[#allocation5 + $0x128] ss:$16 sps:$4 sm:$0xff]  }
 0x1de   : > { %4454 = vmatpush1.bf16.msra.mxu0 %v7257_v1  ;;  %4840 = vmatpush1.bf16.msra.mxu1 %v7260_v61  ;;  %v10234_v1 = vld [vmem:[#allocation15_spill] sm:$0xff]  ;;  %v1426_v55 = vmul.bf16 1065369472, %v7604_v31  ;;  %v1102_v30 = vsub.bf16 0, %v1038_v13  ;;  %v10238_v13 = vpack.c.bf16 %v8743_v6, %v8733_v17 }
 0x1df   : > { %4455 = vmatprep.subr.bf16.mxu0 %v7265_v33  ;;  %4841 = vmatprep.subr.bf16.mxu1 %v7268_v15  ;;  %v10235_v61 = vpack.c.bf16 %v10233_v62, %v10234_v1  ;;  %v7275_v15 = vld [vmem:[#allocation5 + $0xe0] ss:$16 sps:$4 sm:$0xff]   ;;  %7615 = vpow.bf16 %v1226_v48  ;;  %v7606_v46 = vpop.eup %7605  ;;  %v10239_v1 = vld [vmem:[#allocation20_spill] sm:$0xff] }
 0x1e0   : > { %7617 = vrcp.bf16 %v1346_v2  ;;  %v7608_v27 = vpop.eup %7607  ;;  %v1046_v31 = vadd.bf16 %v8737_v5, %v10238_v13  ;;  %v1058_v13 = vadd.bf16 %v8737_v5, %v941_v0 }
 0x1e1   : > { %v1033_v33 = vadd.bf16 %v8755_v22, %v10235_v61  ;;  %7619 = vrcp.bf16 %v1341_v16  ;;  %v7610_v54 = vpop.eup %7609  ;;  %v10240_v61 = vld [vmem:[#allocation19_spill] sm:$0xff] }
 0x1e2   : > { %4456 = vmatpush1.bf16.msra.mxu0 %v7263_v41  ;;  %4842 = vmatpush1.bf16.msra.mxu1 %v7266_v56  ;;  %v1253_v41 = vmul.bf16 1069105081, %v1102_v30  ;;  %v10236_v56 = vpack.c.bf16 %v8724_v37, %v8715_v9  ;;  %v1424_v9 = vmul.bf16 1065369472, %v7606_v46  ;;  %v1110_v16 = vsub.bf16 0, %v1046_v31 }
 0x1e3   : > { %4457 = vmatprep.subr.bf16.mxu0 %v7271_v39  ;;  %4843 = vmatprep.subr.bf16.mxu1 %v7274_v52  ;;  %v1097_v18 = vsub.bf16 0, %v1033_v33  ;;  %v7612_v39 = vpop.eup %7611  ;;  %v10241_v33 = vpack.c.bf16 %v10239_v1, %v10240_v61 }
 0x1e4   : > { %2531 = vmatmul.mubr.bf16.gmra.mrb[76].mxu0 %v1408_v11  ;;  %2917 = vmatmul.mubr.bf16.gmra.mrb[76].mxu1 %v1408_v11  ;;  %v1042_v4 = vadd.bf16 %v8737_v5, %v10236_v56  ;;  %v10237_v11 = vpack.c.bf16 %v8704_v25, %v8698_v63  ;;  %7621 = vpow.bf16 %v1253_v41  ;;  %v1434_v37 = vmul.bf16 1065369472, %v7612_v39  ;;  %v7293_v63 = vld [vmem:[#allocation5 + $0x140] ss:$16 sps:$4 sm:$0xff]   ;;  %v7296_v25 = vld [vmem:[#allocation5 + $0x148] ss:$16 sps:$4 sm:$0xff]  }
 0x1e5   : > { %2540 = vmatprep.mubr.bf16.mxu0 %v1418_v40  ;;  %2926 = vmatprep.mubr.bf16.mxu1 %v1418_v40  ;;  %v1238_v52 = vmul.bf16 1069105081, %v1097_v18  ;;  %v1277_v30 = vmul.bf16 1069105081, %v1110_v16  ;;  %v10242_v18 = vpack.c.bf16 %v8764_v53, %v8757_v60 }
 0x1e6   : > { %4458 = vmatpush1.bf16.msra.mxu0 %v7269_v7  ;;  %4844 = vmatpush1.bf16.msra.mxu1 %v7272_v14  ;;  %v1037_v40 = vadd.bf16 %v8755_v22, %v10237_v11  ;;  %v1350_v7 = vadd.bf16 1065369472, %v7608_v27  ;;  %v7295_v14 = vld [vmem:[#allocation5 + $0x144] ss:$16 sps:$4 sm:$0xff]  }
 0x1e7   : > { %4459 = vmatprep.subr.bf16.mxu0 %v7277_v19  ;;  %4845 = vmatprep.subr.bf16.mxu1 %v7280_v57  ;;  %v1345_v19 = vadd.bf16 1065369472, %v7610_v54  ;;  %v1106_v57 = vsub.bf16 0, %v1042_v4  ;;  %7623 = vpow.bf16 %v1238_v52 }
 0x1e8   : > { %v1101_v50 = vsub.bf16 0, %v1037_v40  ;;  %7625 = vrcp.bf16 %v1350_v7  ;;  %v7614_v51 = vpop.eup %7613 }
 0x1e9   : > { %7627 = vrcp.bf16 %v1345_v19  ;;  %v1265_v32 = vmul.bf16 1069105081, %v1106_v57  ;;  %v1354_v2 = vadd.bf16 1065369472, %v7614_v51  ;;  %v10247_v19 = vld [vmem:[#allocation23_spill] sm:$0xff] }
 0x1ea   : > { %4460 = vmatpush1.bf16.msra.mxu0 %v7275_v15  ;;  %4846 = vmatpush1.bf16.msra.mxu1 %v7278_v20  ;;  %v7616_v45 = vpop.eup %7615  ;;  %v1250_v62 = vmul.bf16 1069105081, %v1101_v50  ;;  %v1041_v15 = vadd.bf16 %v8755_v22, %v10241_v33 }
 0x1eb   : > { %4461 = vmatprep.subr.bf16.mxu0 %v7283_v26  ;;  %4847 = vmatprep.subr.bf16.mxu1 %v7286_v38  ;;  %v7618_v48 = vpop.eup %7617  ;;  %v1349_v26 = vadd.bf16 1065369472, %v7616_v45  ;;  %7629 = vpow.bf16 %v1265_v32 }
 0x1ec   : > { %2541 = vmatmul.mubr.bf16.gmra.mrb[80].mxu0 %v1416_v3  ;;  %2927 = vmatmul.mubr.bf16.gmra.mrb[80].mxu1 %v1416_v3  ;;  %v7620_v20 = vpop.eup %7619  ;;  %v1442_v38 = vmul.bf16 1065369472, %v7618_v48  ;;  %7631 = vpow.bf16 %v1250_v62  ;;  %v1105_v3 = vsub.bf16 0, %v1041_v15  ;;  %v1053_v62 = vadd.bf16 %v8755_v22, %v936_v23 }
 0x1ed   : > { %2550 = vmatprep.mubr.bf16.mxu0 %v1426_v55  ;;  %2936 = vmatprep.mubr.bf16.mxu1 %v1426_v55  ;;  %v1432_v17 = vmul.bf16 1065369472, %v7620_v20  ;;  %7633 = vrcp.bf16 %v1354_v2  ;;  %v1122_v20 = vsub.bf16 0, %v1058_v13  ;;  %v7317_v13 = vld [vmem:[#allocation5 + $0x1c0] ss:$16 sps:$4 sm:$0xff]  }
 0x1ee   : > { %4462 = vmatpush1.bf16.msra.mxu0 %v7281_v35  ;;  %4848 = vmatpush1.bf16.msra.mxu1 %v7284_v36  ;;  %7635 = vrcp.bf16 %v1349_v26  ;;  %v1050_v35 = vadd.bf16 %v8737_v5, %v10242_v18  ;;  %v1262_v46 = vmul.bf16 1069105081, %v1105_v3  ;;  %v1117_v2 = vsub.bf16 0, %v1053_v62  ;;  %v7320_v62 = vld [vmem:[#allocation5 + $0x1c8] ss:$16 sps:$4 sm:$0xff]  }
 0x1ef   : > { %4463 = vmatprep.subr.bf16.mxu0 %v7289_v49  ;;  %4849 = vmatprep.subr.bf16.mxu1 %v7292_v12  ;;  %v7622_v6 = vpop.eup %7621  ;;  %v10243_v49 = vld [vmem:[#allocation22_spill] sm:$0xff]  ;;  %v10244_v12 = vld [vmem:[#allocation21_spill] sm:$0xff]  ;;  %7637 = vpow.bf16 %v1277_v30  ;;  %v1313_v34 = vmul.bf16 1069105081, %v1122_v20 }
 0x1f0   : > { %v10245_v27 = vpack.c.bf16 %v10243_v49, %v10244_v12  ;;  %v1358_v56 = vadd.bf16 1065369472, %v7622_v6  ;;  %v1114_v52 = vsub.bf16 0, %v1050_v35  ;;  %7639 = vpow.bf16 %v1262_v46  ;;  %v7301_v35 = vld [vmem:[#allocation5 + $0x164] ss:$16 sps:$4 sm:$0xff]  }
 0x1f1   : > { %v1298_v23 = vmul.bf16 1069105081, %v1117_v2  ;;  %v7331_v20 = vld [vmem:[#allocation5 + $0x204] ss:$16 sps:$4 sm:$0xff]   ;;  %v7334_v2 = vld [vmem:[#allocation5 + $0x20c] ss:$16 sps:$4 sm:$0xff]  }
 0x1f2   : > { %4464 = vmatpush1.bf16.msra.mxu0 %v7287_v59  ;;  %4850 = vmatpush1.bf16.msra.mxu1 %v7290_v43  ;;  %v7624_v55 = vpop.eup %7623  ;;  %v1045_v54 = vadd.bf16 %v8755_v22, %v10245_v27  ;;  %7641 = vrcp.bf16 %v1358_v56  ;;  %v1289_v59 = vmul.bf16 1069105081, %v1114_v52  ;;  %v1054_v43 = vadd.bf16 %v8737_v5, %v937_v10 }
 0x1f3   : > { %4465 = vmatprep.subr.bf16.mxu0 %v7295_v14  ;;  %4851 = vmatprep.subr.bf16.mxu1 %v7298_v21  ;;  %v7626_v36 = vpop.eup %7625  ;;  %v1353_v4 = vadd.bf16 1065369472, %v7624_v55  ;;  %v10246_v21 = vld [vmem:[#allocation24_spill] sm:$0xff] }
 0x1f4   : > { %2551 = vmatmul.mubr.bf16.gmra.mrb[84].mxu0 %v1424_v9  ;;  %2937 = vmatmul.mubr.bf16.gmra.mrb[84].mxu1 %v1424_v9  ;;  %v7628_v41 = vpop.eup %7627  ;;  %v1450_v39 = vmul.bf16 1065369472, %v7626_v36  ;;  %v1109_v11 = vsub.bf16 0, %v1045_v54  ;;  %v10248_v9 = vpack.c.bf16 %v10246_v21, %v10247_v19  ;;  %v1118_v51 = vsub.bf16 0, %v1054_v43 }
 0x1f5   : > { %2560 = vmatprep.mubr.bf16.mxu0 %v1434_v37  ;;  %2946 = vmatprep.mubr.bf16.mxu1 %v1434_v37  ;;  %v1440_v40 = vmul.bf16 1065369472, %v7628_v41  ;;  %7643 = vrcp.bf16 %v1353_v4 }
 0x1f6   : > { %4466 = vmatpush1.bf16.msra.mxu0 %v7293_v63  ;;  %4852 = vmatpush1.bf16.msra.mxu1 %v7296_v25  ;;  %v7630_v60 = vpop.eup %7629  ;;  %v1274_v14 = vmul.bf16 1069105081, %v1109_v11  ;;  %v1049_v37 = vadd.bf16 %v8755_v22, %v10248_v9  ;;  %7645 = vpow.bf16 %v1289_v59  ;;  %v1301_v10 = vmul.bf16 1069105081, %v1118_v51  ;;  %v7307_v9 = vld [vmem:[#allocation5 + $0x184] ss:$16 sps:$4 sm:$0xff]  }
 0x1f7   : > { %v7632_v53 = vpop.eup %7631  ;;  %v1362_v50 = vadd.bf16 1065369472, %v7630_v60  ;;  %4467 = vmatprep.subr.bf16.mxu0 %v7301_v35  ;;  %v7313_v51 = vld [vmem:[#allocation5 + $0x1a4] ss:$16 sps:$4 sm:$0xff]  }
 0x1f8   : > { %v7634_v7 = vpop.eup %7633  ;;  %v1357_v63 = vadd.bf16 1065369472, %v7632_v53  ;;  %7647 = vpow.bf16 %v1274_v14  ;;  %v1113_v45 = vsub.bf16 0, %v1049_v37  ;;  %v7302_v14 = vld [vmem:[#allocation5 + $0x168] ss:$16 sps:$4 sm:$0xff]  }
 0x1f9   : > { %v7636_v57 = vpop.eup %7635  ;;  %v1458_v25 = vmul.bf16 1065369472, %v7634_v7  ;;  %7649 = vrcp.bf16 %v1362_v50  ;;  %v7304_v7 = vld [vmem:[#allocation5 + $0x16c] ss:$16 sps:$4 sm:$0xff]   ;;  %v7305_v50 = vld [vmem:[#allocation5 + $0x180] ss:$16 sps:$4 sm:$0xff]  }
 0x1fa   : > { %v1448_v32 = vmul.bf16 1065369472, %v7636_v57  ;;  %v7638_v42 = vpop.eup %7637  ;;  %7651 = vrcp.bf16 %v1357_v63  ;;  %v1286_v48 = vmul.bf16 1069105081, %v1113_v45  ;;  %4468 = vmatpush1.bf16.msra.mxu0 %v7299_v29  ;;  %4853 = vmatprep.subr.bf16.mxu1 %v7304_v7  ;;  %v7310_v37 = vld [vmem:[#allocation5 + $0x18c] ss:$16 sps:$4 sm:$0xff]  }
 0x1fb   : > { %v7640_v28 = vpop.eup %7639  ;;  %v1366_v61 = vadd.bf16 1065369472, %v7638_v42  ;;  %7653 = vpow.bf16 %v1301_v10  ;;  %4854 = vmatpush1.bf16.msra.mxu1 %v7302_v14  ;;  %v7308_v63 = vld [vmem:[#allocation5 + $0x188] ss:$16 sps:$4 sm:$0xff]   ;;  %4469 = vmatprep.subr.bf16.mxu0 %v7307_v9  ;;  %v7316_v45 = vld [vmem:[#allocation5 + $0x1ac] ss:$16 sps:$4 sm:$0xff]  }
 0x1fc   : > { %2561 = vmatmul.mubr.bf16.gmra.mrb[88].mxu0 %v1432_v17  ;;  %2947 = vmatmul.mubr.bf16.gmra.mrb[88].mxu1 %v1432_v17  ;;  %v1361_v33 = vadd.bf16 1065369472, %v7640_v28  ;;  %7655 = vpow.bf16 %v1286_v48  ;;  %v1121_v17 = vsub.bf16 0, %v1057_v8  ;;  %v7314_v42 = vld [vmem:[#allocation5 + $0x1a8] ss:$16 sps:$4 sm:$0xff]  }
 0x1fd   : > { %2570 = vmatprep.mubr.bf16.mxu0 %v1442_v38  ;;  %2956 = vmatprep.mubr.bf16.mxu1 %v1442_v38  ;;  %v7642_v31 = vpop.eup %7641  ;;  %7657 = vrcp.bf16 %v1366_v61  ;;  %v7319_v10 = vld [vmem:[#allocation5 + $0x1c4] ss:$16 sps:$4 sm:$0xff]   ;;  %v7322_v48 = vld [vmem:[#allocation5 + $0x1cc] ss:$16 sps:$4 sm:$0xff]  }
 0x1fe   : > { %v1466_v15 = vmul.bf16 1065369472, %v7642_v31  ;;  %7659 = vrcp.bf16 %v1361_v33  ;;  %v1310_v24 = vmul.bf16 1069105081, %v1121_v17  ;;  %4855 = vmatprep.subr.bf16.mxu1 %v7310_v37  ;;  %4470 = vmatpush1.bf16.msra.mxu0 %v7305_v50  ;;  %v7328_v61 = vld [vmem:[#allocation5 + $0x1ec] ss:$16 sps:$4 sm:$0xff]  }
 0x1ff   : > { %7661 = vpow.bf16 %v1313_v34  ;;  %4856 = vmatpush1.bf16.msra.mxu1 %v7308_v63  ;;  %4471 = vmatprep.subr.bf16.mxu0 %v7313_v51  ;;  %v7323_v33 = vld [vmem:[#allocation5 + $0x1e0] ss:$16 sps:$4 sm:$0xff]  }
 0x200   : > { %v7644_v1 = vpop.eup %7643  ;;  %7663 = vpow.bf16 %v1298_v23  ;;  %4857 = vmatprep.subr.bf16.mxu1 %v7316_v45  ;;  %v10250_v17 = vld [vmem:[#allocation11_spill] sm:$0xff] }
 0x201   : > { %v1456_v26 = vmul.bf16 1065369472, %v7644_v1  ;;  %v7646_v44 = vpop.eup %7645  ;;  %v7325_v1 = vld [vmem:[#allocation5 + $0x1e4] ss:$16 sps:$4 sm:$0xff]  }
 0x202   : > { %v1370_v38 = vadd.bf16 1065369472, %v7646_v44 }
 0x203   : > { %v7648_v5 = vpop.eup %7647  ;;  %4858 = vmatpush1.bf16.msra.mxu1 %v7314_v42 }
 0x204   : > { %2571 = vmatmul.mubr.bf16.gmra.mrb[92].mxu0 %v1440_v40  ;;  %2957 = vmatmul.mubr.bf16.gmra.mrb[92].mxu1 %v1440_v40  ;;  %v7650_v58 = vpop.eup %7649  ;;  %v1365_v16 = vadd.bf16 1065369472, %v7648_v5  ;;  %7665 = vrcp.bf16 %v1370_v38  ;;  %v10249_v5 = vld [vmem:[#allocation10_spill] sm:$0xff] }
 0x205   : > { %2580 = vmatprep.mubr.bf16.mxu0 %v1450_v39  ;;  %2966 = vmatprep.mubr.bf16.mxu1 %v1450_v39  ;;  %v7652_v0 = vpop.eup %7651  ;;  %v1474_v3 = vmul.bf16 1065369472, %v7650_v58 }
 0x206   : > { %v1464_v6 = vmul.bf16 1065369472, %v7652_v0  ;;  %v7654_v55 = vpop.eup %7653  ;;  %7667 = vrcp.bf16 %v1365_v16  ;;  %4859 = vmatprep.subr.bf16.mxu1 %v7322_v48 }
 0x207   : > { %v7656_v30 = vpop.eup %7655  ;;  %v1374_v22 = vadd.bf16 1065369472, %v7654_v55  ;;  %7669 = vpow.bf16 %v1310_v24  ;;  %4860 = vmatpush1.bf16.msra.mxu1 %v7320_v62 }
 0x208   : > { %v7658_v18 = vpop.eup %7657  ;;  %v1369_v36 = vadd.bf16 1065369472, %v7656_v30  ;;  %4861 = vmatprep.subr.bf16.mxu1 %v7328_v61 }
 0x209   : > { %v7660_v47 = vpop.eup %7659  ;;  %v1482_v46 = vmul.bf16 1065369472, %v7658_v18  ;;  %7671 = vrcp.bf16 %v1374_v22 }
 0x20a   : > { %v1472_v49 = vmul.bf16 1065369472, %v7660_v47  ;;  %v7662_v12 = vpop.eup %7661  ;;  %7673 = vrcp.bf16 %v1369_v36  ;;  %v7370_v47 = vld [vmem:[#allocation5 + $0x2cc] ss:$16 sps:$4 sm:$0xff]  }
 0x20b   : > { %v7664_v27 = vpop.eup %7663  ;;  %v1378_v56 = vadd.bf16 1065369472, %v7662_v12 }
 0x20c   : > { %2581 = vmatmul.mubr.bf16.gmra.mrb[96].mxu0 %v1448_v32  ;;  %2967 = vmatmul.mubr.bf16.gmra.mrb[96].mxu1 %v1448_v32  ;;  %v1373_v4 = vadd.bf16 1065369472, %v7664_v27  ;;  %v7311_v32 = vld [vmem:[#allocation5 + $0x1a0] ss:$16 sps:$4 sm:$0xff]  }
 0x20d   : > { %2590 = vmatprep.mubr.bf16.mxu0 %v1458_v25  ;;  %2976 = vmatprep.mubr.bf16.mxu1 %v1458_v25  ;;  %7675 = vrcp.bf16 %v1378_v56 }
 0x20e   : > { %7677 = vrcp.bf16 %v1373_v4  ;;  %4472 = vmatpush1.bf16.msra.mxu0 %v7311_v32 }
 0x20f   : > { %v7666_v54 = vpop.eup %7665  ;;  %4473 = vmatprep.subr.bf16.mxu0 %v7319_v10 }
 0x210   : > { %v1490_v39 = vmul.bf16 1065369472, %v7666_v54 }
 0x211   : > { %v7668_v41 = vpop.eup %7667 }
 0x212   : > { %v1480_v52 = vmul.bf16 1065369472, %v7668_v41  ;;  %v7670_v11 = vpop.eup %7669  ;;  %4474 = vmatpush1.bf16.msra.mxu0 %v7317_v13 }
 0x213   : > { %v1377_v53 = vadd.bf16 1065369472, %v7670_v11  ;;  %4475 = vmatprep.subr.bf16.mxu0 %v7325_v1 }
 0x214   : > { %2591 = vmatmul.mubr.bf16.gmra.mrb[100].mxu0 %v1456_v26  ;;  %2977 = vmatmul.mubr.bf16.gmra.mrb[100].mxu1 %v1456_v26  ;;  %v7672_v40 = vpop.eup %7671  ;;  %v6613_v26 = vld.sshfl [vmem:[%s10131_s4] sm:$0x33 pattern:$0x75316420] }
 0x215   : > { %2600 = vmatprep.mubr.bf16.mxu0 %v1466_v15  ;;  %2986 = vmatprep.mubr.bf16.mxu1 %v1466_v15  ;;  %v7674_v60 = vpop.eup %7673  ;;  %v1498_v59 = vmul.bf16 1065369472, %v7672_v40  ;;  %7679 = vrcp.bf16 %v1377_v53  ;;  %v7326_v15 = vld [vmem:[#allocation5 + $0x1e8] ss:$16 sps:$4 sm:$0xff]   ;;  %v3120_v44 = vcombine.high %v6613_v26, %v6613_v26  ;;  %v8922_v34 = vrot.slane %v6613_v26, %v10249_v5 }
 0x216   : > { %v1488_v43 = vmul.bf16 1065369472, %v7674_v60  ;;  %4476 = vmatpush1.bf16.msra.mxu0 %v7323_v33  ;;  %4862 = vmatpush1.bf16.msra.mxu1 %v7326_v15 }
 0x217   : > { %4638 = vmatprep.subr.bf16.mxu0 %v7331_v20  ;;  %5024 = vmatprep.subr.bf16.mxu1 %v7334_v2  ;;  %v8925_v58 = vrot.slane %v3120_v44, %v10249_v5  ;;  %v3138_v23 = vpack.i.b16 %v8922_v34, %v8922_v34 }
 0x218   : > { %v7676_v21 = vpop.eup %7675 }
 0x219   : > { %v7678_v19 = vpop.eup %7677  ;;  %v1506_v57 = vmul.bf16 1065369472, %v7676_v21  ;;  %v3145_v8 = vpack.i.b16 %v8925_v58, %v8925_v58 }
 0x21a   : > { %v1496_v25 = vmul.bf16 1065369472, %v7678_v19 }
 0x21b   : > { %v8941_v18 = vrot.slane %v3145_v8, %v10250_v17 }
 0x21c   : > { %2601 = vmatmul.mubr.bf16.gmra.mrb[104].mxu0 %v1464_v6  ;;  %2987 = vmatmul.mubr.bf16.gmra.mrb[104].mxu1 %v1464_v6  ;;  %v8936_v6 = vrot.slane %v3138_v23, %v10250_v17 }
 0x21d   : > { %2610 = vmatprep.mubr.bf16.mxu0 %v1474_v3  ;;  %2996 = vmatprep.mubr.bf16.mxu1 %v1474_v3 }
 0x220   : > { %v7680_v28 = vpop.eup %7679 }
 0x221   : > { %v1504_v31 = vmul.bf16 1065369472, %v7680_v28 }
 0x224   : > { %2611 = vmatmul.mubr.bf16.gmra.mrb[108].mxu0 %v1472_v49  ;;  %2997 = vmatmul.mubr.bf16.gmra.mrb[108].mxu1 %v1472_v49 }
 0x225   : > { %2620 = vmatprep.mubr.bf16.mxu0 %v1482_v46  ;;  %3006 = vmatprep.mubr.bf16.mxu1 %v1482_v46 }
 0x22c   : > { %2621 = vmatmul.mubr.bf16.gmra.mrb[112].mxu0 %v1480_v52  ;;  %3007 = vmatmul.mubr.bf16.gmra.mrb[112].mxu1 %v1480_v52 }
 0x22d   : > { %2630 = vmatprep.mubr.bf16.mxu0 %v1490_v39  ;;  %3016 = vmatprep.mubr.bf16.mxu1 %v1490_v39 }
 0x234   : > { %2631 = vmatmul.mubr.bf16.gmra.mrb[116].mxu0 %v1488_v43  ;;  %3017 = vmatmul.mubr.bf16.gmra.mrb[116].mxu1 %v1488_v43 }
 0x235   : > { %2640 = vmatprep.mubr.bf16.mxu0 %v1498_v59  ;;  %3026 = vmatprep.mubr.bf16.mxu1 %v1498_v59 }
 0x23c   : > { %2641 = vmatmul.mubr.bf16.gmra.mrb[120].mxu0 %v1496_v25  ;;  %3027 = vmatmul.mubr.bf16.gmra.mrb[120].mxu1 %v1496_v25 }
 0x23d   : > { %2650 = vmatprep.mubr.bf16.mxu0 %v1506_v57  ;;  %3036 = vmatprep.mubr.bf16.mxu1 %v1506_v57 }
 0x244   : > { %2651 = vmatmul.mubr.bf16.gmra.mrb[124].mxu0 %v1504_v31  ;;  %3037 = vmatmul.mubr.bf16.gmra.mrb[124].mxu1 %v1504_v31 }
 0x29f   : > { %v2502_v0 = vpop.f32.mrb[64].mxu0  ;;  %v8931_v38 = vpop.f32.mrb[64].mxu1 }
 0x2a0   : > { %v2504_v16 = vpop.f32.mrb[65].mxu0  ;;  %v8933_v3 = vpop.f32.mrb[65].mxu1 }
 0x2a1   : > { %v2506_v55 = vpop.f32.mrb[66].mxu0  ;;  %v8938_v30 = vpop.f32.mrb[66].mxu1 }
 0x2a2   : > { %v3048_v24 = vpack.c.bf16 %v2506_v55, %v2502_v0  ;;  %v2508_v22 = vpop.f32.mrb[67].mxu0  ;;  %v8945_v29 = vpop.f32.mrb[67].mxu1 }
 0x2a3   : > { %v3049_v35 = vpack.c.bf16 %v2508_v22, %v2504_v16 }
 0x2a4   : > { %v3165_v46 = vadd.bf16 %v8936_v6, %v3048_v24 }
 0x2a5   : > { %v3166_v49 = vadd.bf16 %v8941_v18, %v3049_v35 }
 0x2a6   : > { %v3229_v12 = vsub.bf16 0, %v3165_v46 }
 0x2a7   : > { %v3230_v27 = vsub.bf16 0, %v3166_v49  ;;  %v2512_v54 = vpop.f32.mrb[68].mxu0  ;;  %v8951_v41 = vpop.f32.mrb[68].mxu1 }
 0x2a8   : > { %v3294_v56 = vmul.bf16 1069105081, %v3229_v12  ;;  %v2514_v4 = vpop.f32.mrb[69].mxu0  ;;  %v8953_v39 = vpop.f32.mrb[69].mxu1 }
 0x2a9   : > { %v3297_v52 = vmul.bf16 1069105081, %v3230_v27  ;;  %v2516_v11 = vpop.f32.mrb[70].mxu0  ;;  %v8955_v40 = vpop.f32.mrb[70].mxu1 }
 0x2aa   : > { %7681 = vpow.bf16 %v3294_v56  ;;  %v3052_v60 = vpack.c.bf16 %v2516_v11, %v2512_v54  ;;  %v2518_v59 = vpop.f32.mrb[71].mxu0  ;;  %v8959_v43 = vpop.f32.mrb[71].mxu1 }
 0x2ab   : > { %v3053_v7 = vpack.c.bf16 %v2518_v59, %v2514_v4  ;;  %7683 = vpow.bf16 %v3297_v52 }
 0x2ac   : > { %v3169_v21 = vadd.bf16 %v8936_v6, %v3052_v60 }
 0x2ad   : > { %v3170_v19 = vadd.bf16 %v8941_v18, %v3053_v7 }
 0x2ae   : > { %v3233_v9 = vsub.bf16 0, %v3169_v21 }
 0x2af   : > { %v3234_v37 = vsub.bf16 0, %v3170_v19  ;;  %v2522_v57 = vpop.f32.mrb[72].mxu0  ;;  %v8965_v50 = vpop.f32.mrb[72].mxu1 }
 0x2b0   : > { %v3306_v63 = vmul.bf16 1069105081, %v3233_v9  ;;  %v2524_v25 = vpop.f32.mrb[73].mxu0  ;;  %v8967_v51 = vpop.f32.mrb[73].mxu1 }
 0x2b1   : > { %v2526_v45 = vpop.f32.mrb[74].mxu0  ;;  %v8969_v32 = vpop.f32.mrb[74].mxu1  ;;  %v3309_v42 = vmul.bf16 1069105081, %v3234_v37 }
 0x2b2   : > { %v3056_v28 = vpack.c.bf16 %v2526_v45, %v2522_v57  ;;  %v2528_v13 = vpop.f32.mrb[75].mxu0  ;;  %v8973_v31 = vpop.f32.mrb[75].mxu1  ;;  %7685 = vpow.bf16 %v3306_v63 }
 0x2b3   : > { %v3057_v48 = vpack.c.bf16 %v2528_v13, %v2524_v25  ;;  %7687 = vpow.bf16 %v3309_v42 }
 0x2b4   : > { %v3173_v1 = vadd.bf16 %v8936_v6, %v3056_v28 }
 0x2b5   : > { %v7682_v61 = vpop.eup %7681  ;;  %v3174_v33 = vadd.bf16 %v8941_v18, %v3057_v48 }
 0x2b6   : > { %v3237_v15 = vsub.bf16 0, %v3173_v1  ;;  %v7684_v20 = vpop.eup %7683  ;;  %v3485_v2 = vadd.bf16 1065369472, %v7682_v61 }
 0x2b7   : > { %v3238_v26 = vsub.bf16 0, %v3174_v33  ;;  %v2532_v44 = vpop.f32.mrb[76].mxu0  ;;  %v8979_v23 = vpop.f32.mrb[76].mxu1  ;;  %v3486_v16 = vadd.bf16 1065369472, %v7684_v20 }
 0x2b8   : > { %v3318_v8 = vmul.bf16 1069105081, %v3237_v15  ;;  %v2534_v55 = vpop.f32.mrb[77].mxu0  ;;  %v8981_v24 = vpop.f32.mrb[77].mxu1  ;;  %7689 = vrcp.bf16 %v3485_v2 }
 0x2b9   : > { %v3321_v0 = vmul.bf16 1069105081, %v3238_v26  ;;  %v2536_v22 = vpop.f32.mrb[78].mxu0  ;;  %v8983_v35 = vpop.f32.mrb[78].mxu1 }
 0x2ba   : > { %v3060_v46 = vpack.c.bf16 %v2536_v22, %v2532_v44  ;;  %v2538_v12 = vpop.f32.mrb[79].mxu0  ;;  %v8987_v27 = vpop.f32.mrb[79].mxu1 }
 0x2bb   : > { %7691 = vpow.bf16 %v3321_v0  ;;  %v3061_v54 = vpack.c.bf16 %v2538_v12, %v2534_v55  ;;  %v7329_v12 = vld [vmem:[#allocation5 + $0x200] ss:$16 sps:$4 sm:$0xff]  }
 0x2bc   : > { %7693 = vpow.bf16 %v3318_v8  ;;  %v3177_v52 = vadd.bf16 %v8936_v6, %v3060_v46 }
 0x2bd   : > { %v7686_v4 = vpop.eup %7685  ;;  %7695 = vrcp.bf16 %v3486_v16  ;;  %v3178_v11 = vadd.bf16 %v8941_v18, %v3061_v54  ;;  %v7332_v54 = vld [vmem:[#allocation5 + $0x208] ss:$16 sps:$4 sm:$0xff]  }
 0x2be   : > { %v3241_v7 = vsub.bf16 0, %v3177_v52  ;;  %v7688_v9 = vpop.eup %7687  ;;  %v3489_v37 = vadd.bf16 1065369472, %v7686_v4 }
 0x2bf   : > { %v2542_v60 = vpop.f32.mrb[80].mxu0  ;;  %v8993_v59 = vpop.f32.mrb[80].mxu1  ;;  %v3242_v57 = vsub.bf16 0, %v3178_v11  ;;  %v3490_v15 = vadd.bf16 1065369472, %v7688_v9 }
 0x2c0   : > { %v2544_v21 = vpop.f32.mrb[81].mxu0  ;;  %v8995_v19 = vpop.f32.mrb[81].mxu1  ;;  %v3330_v48 = vmul.bf16 1069105081, %v3241_v7  ;;  %7697 = vrcp.bf16 %v3489_v37  ;;  %v7337_v11 = vld [vmem:[#allocation5 + $0x224] ss:$16 sps:$4 sm:$0xff]  }
 0x2c1   : > { %v2546_v63 = vpop.f32.mrb[82].mxu0  ;;  %v8997_v25 = vpop.f32.mrb[82].mxu1  ;;  %v3333_v1 = vmul.bf16 1069105081, %v3242_v57 }
 0x2c2   : > { %v3064_v45 = vpack.c.bf16 %v2546_v63, %v2542_v60  ;;  %v2548_v28 = vpop.f32.mrb[83].mxu0  ;;  %v9001_v13 = vpop.f32.mrb[83].mxu1  ;;  %v7340_v60 = vld [vmem:[#allocation5 + $0x22c] ss:$16 sps:$4 sm:$0xff]  }
 0x2c3   : > { %v3065_v61 = vpack.c.bf16 %v2548_v28, %v2544_v21  ;;  %v7690_v26 = vpop.eup %7689  ;;  %7699 = vpow.bf16 %v3333_v1 }
 0x2c4   : > { %v3181_v20 = vadd.bf16 %v8936_v6, %v3064_v45  ;;  %7701 = vpow.bf16 %v3330_v48  ;;  %v3550_v57 = vmul.bf16 1065369472, %v7690_v26 }
 0x2c5   : > { %v3182_v2 = vadd.bf16 %v8941_v18, %v3065_v61  ;;  %7703 = vrcp.bf16 %v3490_v15 }
 0x2c6   : > { %v3245_v44 = vsub.bf16 0, %v3181_v20  ;;  %v7692_v8 = vpop.eup %7691 }
 0x2c7   : > { %v3246_v0 = vsub.bf16 0, %v3182_v2  ;;  %v2552_v16 = vpop.f32.mrb[84].mxu0  ;;  %v9007_v55 = vpop.f32.mrb[84].mxu1  ;;  %v3494_v7 = vadd.bf16 1065369472, %v7692_v8 }
 0x2c8   : > { %v7694_v22 = vpop.eup %7693  ;;  %v3342_v46 = vmul.bf16 1069105081, %v3245_v44  ;;  %v2554_v9 = vpop.f32.mrb[85].mxu0  ;;  %v7335_v44 = vld [vmem:[#allocation5 + $0x220] ss:$16 sps:$4 sm:$0xff]  }
 0x2c9   : > { %v7696_v4 = vpop.eup %7695  ;;  %v3345_v52 = vmul.bf16 1069105081, %v3246_v0  ;;  %v9009_v37 = vpop.f32.mrb[85].mxu1  ;;  %v3493_v63 = vadd.bf16 1065369472, %v7694_v22 }
 0x2ca   : > { %v3552_v21 = vmul.bf16 1065369472, %v7696_v4  ;;  %7705 = vpow.bf16 %v3342_v46  ;;  %v2556_v45 = vpop.f32.mrb[86].mxu0  ;;  %v9011_v28 = vpop.f32.mrb[86].mxu1  ;;  %v7338_v8 = vld [vmem:[#allocation5 + $0x228] ss:$16 sps:$4 sm:$0xff]  }
 0x2cb   : > { %7707 = vpow.bf16 %v3345_v52  ;;  %v3068_v48 = vpack.c.bf16 %v2556_v45, %v2552_v16  ;;  %v2558_v61 = vpop.f32.mrb[87].mxu0  ;;  %v9015_v15 = vpop.f32.mrb[87].mxu1  ;;  %v7343_v46 = vld [vmem:[#allocation5 + $0x244] ss:$16 sps:$4 sm:$0xff]   ;;  %v7346_v4 = vld [vmem:[#allocation5 + $0x24c] ss:$16 sps:$4 sm:$0xff]  }
 0x2cc   : > { %4477 = vmatprep.mubr.bf16.mxu0 %v3552_v21  ;;  %4863 = vmatprep.mubr.bf16.mxu1 %v3552_v21  ;;  %v3069_v20 = vpack.c.bf16 %v2558_v61, %v2554_v9  ;;  %7709 = vrcp.bf16 %v3494_v7  ;;  %v7698_v52 = vpop.eup %7697  ;;  %v7344_v2 = vld [vmem:[#allocation5 + $0x248] ss:$16 sps:$4 sm:$0xff]  }
 0x2cd   : > { %4478 = vmatmul.mubr.bf16.vlgmr.msra.gmra.mrb[128].mxu0 %v3550_v57  ;;  %4864 = vmatmul.mubr.bf16.vlgmr.msra.gmra.mrb[128].mxu1 %v3550_v57  ;;  %v3185_v26 = vadd.bf16 %v8936_v6, %v3068_v48  ;;  %7711 = vrcp.bf16 %v3493_v63  ;;  %v3558_v63 = vmul.bf16 1065369472, %v7698_v52  ;;  %v7349_v52 = vld [vmem:[#allocation5 + $0x264] ss:$16 sps:$4 sm:$0xff]  }
 0x2ce   : > { %4639 = vmatpush1.bf16.msra.mxu0 %v7329_v12  ;;  %5025 = vmatpush1.bf16.msra.mxu1 %v7332_v54  ;;  %v3186_v0 = vadd.bf16 %v8941_v18, %v3069_v20  ;;  %v7700_v57 = vpop.eup %7699 }
 0x2cf   : > { %v2562_v16 = vpop.f32.mrb[88].mxu0  ;;  %v9021_v22 = vpop.f32.mrb[88].mxu1  ;;  %4640 = vmatprep.subr.bf16.mxu0 %v7337_v11  ;;  %5026 = vmatprep.subr.bf16.mxu1 %v7340_v60  ;;  %v3249_v21 = vsub.bf16 0, %v3185_v26  ;;  %v7341_v11 = vld [vmem:[#allocation5 + $0x240] ss:$16 sps:$4 sm:$0xff]  }
 0x2d0   : > { %v2564_v9 = vpop.f32.mrb[89].mxu0  ;;  %v9023_v12 = vpop.f32.mrb[89].mxu1  ;;  %v3250_v54 = vsub.bf16 0, %v3186_v0  ;;  %v3498_v42 = vadd.bf16 1065369472, %v7700_v57 }
 0x2d1   : > { %v2566_v45 = vpop.f32.mrb[90].mxu0  ;;  %v9025_v48 = vpop.f32.mrb[90].mxu1  ;;  %v3354_v61 = vmul.bf16 1069105081, %v3249_v21  ;;  %v7352_v21 = vld [vmem:[#allocation5 + $0x26c] ss:$16 sps:$4 sm:$0xff]  }
 0x2d2   : > { %v7702_v7 = vpop.eup %7701  ;;  %4641 = vmatpush1.bf16.msra.mxu0 %v7335_v44  ;;  %v3072_v20 = vpack.c.bf16 %v2566_v45, %v2562_v16  ;;  %5027 = vmatpush1.bf16.msra.mxu1 %v7338_v8  ;;  %v3357_v1 = vmul.bf16 1069105081, %v3250_v54  ;;  %v2568_v49 = vpop.f32.mrb[91].mxu0 }
 0x2d3   : > { %v7704_v60 = vpop.eup %7703  ;;  %4642 = vmatprep.subr.bf16.mxu0 %v7343_v46  ;;  %5028 = vmatprep.subr.bf16.mxu1 %v7346_v4  ;;  %v9030_v56 = vpop.f32.mrb[91].mxu1  ;;  %v3497_v44 = vadd.bf16 1065369472, %v7702_v7  ;;  %7713 = vpow.bf16 %v3354_v61  ;;  %v3073_v8 = vpack.c.bf16 %v2568_v49, %v2564_v9  ;;  %v7347_v7 = vld [vmem:[#allocation5 + $0x260] ss:$16 sps:$4 sm:$0xff]  }
 0x2d4   : > { %v3560_v0 = vmul.bf16 1065369472, %v7704_v60  ;;  %v3189_v33 = vadd.bf16 %v8936_v6, %v3072_v20  ;;  %7715 = vpow.bf16 %v3357_v1  ;;  %v7350_v49 = vld [vmem:[#allocation5 + $0x268] ss:$16 sps:$4 sm:$0xff]  }
 0x2d5   : > { %v7706_v54 = vpop.eup %7705  ;;  %v3190_v57 = vadd.bf16 %v8941_v18, %v3073_v8  ;;  %7717 = vrcp.bf16 %v3498_v42  ;;  %v7358_v8 = vld [vmem:[#allocation5 + $0x28c] ss:$16 sps:$4 sm:$0xff]  }
 0x2d6   : > { %4487 = vmatprep.mubr.bf16.mxu0 %v3560_v0  ;;  %4873 = vmatprep.mubr.bf16.mxu1 %v3560_v0  ;;  %v3253_v46 = vsub.bf16 0, %v3189_v33  ;;  %v7708_v4 = vpop.eup %7707  ;;  %7719 = vrcp.bf16 %v3497_v44  ;;  %v3501_v10 = vadd.bf16 1065369472, %v7706_v54 }
 0x2d7   : > { %4488 = vmatmul.mubr.bf16.gmra.mrb[132].mxu0 %v3558_v63  ;;  %4874 = vmatmul.mubr.bf16.gmra.mrb[132].mxu1 %v3558_v63  ;;  %v2572_v45 = vpop.f32.mrb[92].mxu0  ;;  %v9035_v20 = vpop.f32.mrb[92].mxu1  ;;  %v3502_v9 = vadd.bf16 1065369472, %v7708_v4  ;;  %v3254_v33 = vsub.bf16 0, %v3190_v57 }
 0x2d8   : > { %10251 = vst [vmem:[#allocation12_spill] sm:$0xff] %v9035_v20  ;;  %v3366_v61 = vmul.bf16 1069105081, %v3253_v46  ;;  %v2574_v60 = vpop.f32.mrb[93].mxu0  ;;  %v9037_v26 = vpop.f32.mrb[93].mxu1  ;;  %4643 = vmatpush1.bf16.msra.mxu0 %v7341_v11  ;;  %5029 = vmatpush1.bf16.msra.mxu1 %v7344_v2 }
 0x2d9   : > { %v7710_v1 = vpop.eup %7709  ;;  %v2576_v0 = vpop.f32.mrb[94].mxu0  ;;  %4644 = vmatprep.subr.bf16.mxu0 %v7349_v52  ;;  %5030 = vmatprep.subr.bf16.mxu1 %v7352_v21  ;;  %v7355_v63 = vld [vmem:[#allocation5 + $0x284] ss:$16 sps:$4 sm:$0xff]   ;;  %v3369_v14 = vmul.bf16 1069105081, %v3254_v33 }
 0x2da   : > { %v7712_v16 = vpop.eup %7711  ;;  %v3568_v62 = vmul.bf16 1065369472, %v7710_v1  ;;  %v3076_v53 = vpack.c.bf16 %v2576_v0, %v2572_v45  ;;  %v9039_v4 = vpop.f32.mrb[94].mxu1  ;;  %7721 = vpow.bf16 %v3366_v61  ;;  %v7353_v57 = vld [vmem:[#allocation5 + $0x280] ss:$16 sps:$4 sm:$0xff]  }
 0x2db   : > { %v2578_v46 = vpop.f32.mrb[95].mxu0  ;;  %v9043_v11 = vpop.f32.mrb[95].mxu1  ;;  %7723 = vrcp.bf16 %v3502_v9  ;;  %v3566_v21 = vmul.bf16 1065369472, %v7712_v16  ;;  %v7356_v45 = vld [vmem:[#allocation5 + $0x288] ss:$16 sps:$4 sm:$0xff]  }
 0x2dc   : > { %v3077_v2 = vpack.c.bf16 %v2578_v46, %v2574_v60  ;;  %4497 = vmatprep.mubr.bf16.mxu0 %v3568_v62  ;;  %4883 = vmatprep.mubr.bf16.mxu1 %v3568_v62  ;;  %v3193_v44 = vadd.bf16 %v8936_v6, %v3076_v53  ;;  %7725 = vpow.bf16 %v3369_v14  ;;  %v7361_v60 = vld [vmem:[#allocation5 + $0x2a4] ss:$16 sps:$4 sm:$0xff]   ;;  %v7364_v1 = vld [vmem:[#allocation5 + $0x2ac] ss:$16 sps:$4 sm:$0xff]   ;;  %v7362_v46 = vld [vmem:[#allocation5 + $0x2a8] ss:$16 sps:$4 sm:$0xff]  }
 0x2dd   : > { %4645 = vmatpush1.bf16.msra.mxu0 %v7347_v7  ;;  %5031 = vmatpush1.bf16.msra.mxu1 %v7350_v49  ;;  %7727 = vrcp.bf16 %v3501_v10  ;;  %v7359_v49 = vld [vmem:[#allocation5 + $0x2a0] ss:$16 sps:$4 sm:$0xff]  }
 0x2de   : > { %v3194_v54 = vadd.bf16 %v8941_v18, %v3077_v2  ;;  %v3257_v61 = vsub.bf16 0, %v3193_v44  ;;  %4646 = vmatprep.subr.bf16.mxu0 %v7355_v63  ;;  %5032 = vmatprep.subr.bf16.mxu1 %v7358_v8  ;;  %v7714_v14 = vpop.eup %7713 }
 0x2df   : > { %4498 = vmatmul.mubr.bf16.gmra.mrb[136].mxu0 %v3566_v21  ;;  %4884 = vmatmul.mubr.bf16.gmra.mrb[136].mxu1 %v3566_v21  ;;  %v2582_v62 = vpop.f32.mrb[96].mxu0  ;;  %v9049_v33 = vpop.f32.mrb[96].mxu1  ;;  %v3505_v21 = vadd.bf16 1065369472, %v7714_v14  ;;  %v7365_v14 = vld [vmem:[#allocation5 + $0x2c0] ss:$16 sps:$4 sm:$0xff]  }
 0x2e0   : > { %v3258_v53 = vsub.bf16 0, %v3194_v54  ;;  %10252 = vst [vmem:[#allocation18_spill] sm:$0xff] %v9049_v33  ;;  %v3378_v16 = vmul.bf16 1069105081, %v3257_v61  ;;  %v2584_v9 = vpop.f32.mrb[97].mxu0  ;;  %v7716_v0 = vpop.eup %7715 }
 0x2e1   : > { %4647 = vmatpush1.bf16.msra.mxu0 %v7353_v57  ;;  %5033 = vmatpush1.bf16.msra.mxu1 %v7356_v45  ;;  %v3506_v63 = vadd.bf16 1065369472, %v7716_v0  ;;  %v9051_v8 = vpop.f32.mrb[97].mxu1  ;;  %v2586_v2 = vpop.f32.mrb[98].mxu0  ;;  %v7367_v61 = vld [vmem:[#allocation5 + $0x2c4] ss:$16 sps:$4 sm:$0xff]  }
 0x2e2   : > { %v3381_v7 = vmul.bf16 1069105081, %v3258_v53  ;;  %10253 = vst [vmem:[#allocation16_spill] sm:$0xff] %v9051_v8  ;;  %4648 = vmatprep.subr.bf16.mxu0 %v7361_v60  ;;  %5034 = vmatprep.subr.bf16.mxu1 %v7364_v1  ;;  %v7718_v44 = vpop.eup %7717  ;;  %v3080_v54 = vpack.c.bf16 %v2586_v2, %v2582_v62  ;;  %v9053_v42 = vpop.f32.mrb[98].mxu1  ;;  %7729 = vpow.bf16 %v3378_v16  ;;  %v7368_v2 = vld [vmem:[#allocation5 + $0x2c8] ss:$16 sps:$4 sm:$0xff]  }
 0x2e3   : > { %10254 = vst [vmem:[#allocation14_spill] sm:$0xff] %v9053_v42  ;;  %v2588_v10 = vpop.f32.mrb[99].mxu0  ;;  %v7720_v52 = vpop.eup %7719  ;;  %v3576_v53 = vmul.bf16 1065369472, %v7718_v44  ;;  %v7371_v57 = vld [vmem:[#allocation5 + $0x2e0] ss:$16 sps:$4 sm:$0xff]  }
 0x2e4   : > { %v3081_v45 = vpack.c.bf16 %v2588_v10, %v2584_v9  ;;  %v9057_v0 = vpop.f32.mrb[99].mxu1  ;;  %7731 = vpow.bf16 %v3381_v7  ;;  %v3574_v60 = vmul.bf16 1065369472, %v7720_v52  ;;  %v3197_v1 = vadd.bf16 %v8936_v6, %v3080_v54  ;;  %v7373_v9 = vld [vmem:[#allocation5 + $0x2e4] ss:$16 sps:$4 sm:$0xff]  }
 0x2e5   : > { %10255 = vst [vmem:[#allocation13_spill] sm:$0xff] %v9057_v0  ;;  %4649 = vmatpush1.bf16.msra.mxu0 %v7359_v49  ;;  %5035 = vmatpush1.bf16.msra.mxu1 %v7362_v46  ;;  %v7722_v16 = vpop.eup %7721  ;;  %7733 = vrcp.bf16 %v3506_v63  ;;  %v7374_v49 = vld [vmem:[#allocation5 + $0x2e8] ss:$16 sps:$4 sm:$0xff]   ;;  %v7376_v46 = vld [vmem:[#allocation5 + $0x2ec] ss:$16 sps:$4 sm:$0xff]  }
 0x2e6   : > { %4507 = vmatprep.mubr.bf16.mxu0 %v3576_v53  ;;  %4893 = vmatprep.mubr.bf16.mxu1 %v3576_v53  ;;  %v3198_v44 = vadd.bf16 %v8941_v18, %v3081_v45  ;;  %v7724_v10 = vpop.eup %7723  ;;  %v3261_v52 = vsub.bf16 0, %v3197_v1  ;;  %7735 = vrcp.bf16 %v3505_v21  ;;  %v3509_v42 = vadd.bf16 1065369472, %v7722_v16  ;;  %v7382_v0 = vld [vmem:[#allocation5 + $0x30c] ss:$16 sps:$4 sm:$0xff]  }
 0x2e7   : > { %4508 = vmatmul.mubr.bf16.gmra.mrb[140].mxu0 %v3574_v60  ;;  %4894 = vmatmul.mubr.bf16.gmra.mrb[140].mxu1 %v3574_v60  ;;  %v2592_v7 = vpop.f32.mrb[100].mxu0  ;;  %v9063_v54 = vpop.f32.mrb[100].mxu1  ;;  %v3584_v5 = vmul.bf16 1065369472, %v7724_v10  ;;  %v7379_v60 = vld [vmem:[#allocation5 + $0x304] ss:$16 sps:$4 sm:$0xff]  }
 0x2e8   : > { %10256 = vst [vmem:[#allocation17_spill] sm:$0xff] %v9063_v54  ;;  %v7726_v62 = vpop.eup %7725  ;;  %v3262_v36 = vsub.bf16 0, %v3198_v44  ;;  %v2594_v33 = vpop.f32.mrb[101].mxu0  ;;  %4650 = vmatprep.subr.bf16.mxu0 %v7367_v61  ;;  %5036 = vmatprep.subr.bf16.mxu1 %v7370_v47  ;;  %v3390_v63 = vmul.bf16 1069105081, %v3261_v52 }
 0x2e9   : > { %v9065_v53 = vpop.f32.mrb[101].mxu1  ;;  %v2596_v45 = vpop.f32.mrb[102].mxu0  ;;  %4651 = vmatpush1.bf16.msra.mxu0 %v7365_v14  ;;  %5037 = vmatpush1.bf16.msra.mxu1 %v7368_v2  ;;  %v3510_v20 = vadd.bf16 1065369472, %v7726_v62  ;;  %v7377_v62 = vld [vmem:[#allocation5 + $0x300] ss:$16 sps:$4 sm:$0xff]  }
 0x2ea   : > { %10257 = vst [vmem:[#allocation15_spill] sm:$0xff] %v9065_v53  ;;  %v7728_v1 = vpop.eup %7727  ;;  %v3393_v8 = vmul.bf16 1069105081, %v3262_v36  ;;  %4517 = vmatprep.mubr.bf16.mxu0 %v3584_v5  ;;  %4903 = vmatprep.mubr.bf16.mxu1 %v3584_v5  ;;  %v3084_v21 = vpack.c.bf16 %v2596_v45, %v2592_v7  ;;  %v9067_v44 = vpop.f32.mrb[102].mxu1  ;;  %7737 = vpow.bf16 %v3390_v63  ;;  %v7380_v16 = vld [vmem:[#allocation5 + $0x308] ss:$16 sps:$4 sm:$0xff]  }
 0x2eb   : > { %10258 = vst [vmem:[#allocation20_spill] sm:$0xff] %v9067_v44  ;;  %v2598_v10 = vpop.f32.mrb[103].mxu0  ;;  %4652 = vmatprep.subr.bf16.mxu0 %v7373_v9  ;;  %5038 = vmatprep.subr.bf16.mxu1 %v7376_v46  ;;  %v9072_v2 = vpop.f32.mrb[103].mxu1  ;;  %v3582_v36 = vmul.bf16 1065369472, %v7728_v1 }
 0x2ec   : > { %v3201_v47 = vadd.bf16 %v8936_v6, %v3084_v21  ;;  %v3085_v14 = vpack.c.bf16 %v2598_v10, %v2594_v33  ;;  %10259 = vst [vmem:[#allocation19_spill] sm:$0xff] %v9072_v2  ;;  %7739 = vpow.bf16 %v3393_v8  ;;  %v7385_v52 = vld [vmem:[#allocation5 + $0x324] ss:$16 sps:$4 sm:$0xff]   ;;  %v7388_v7 = vld [vmem:[#allocation5 + $0x32c] ss:$16 sps:$4 sm:$0xff]  }
 0x2ed   : > { %4653 = vmatpush1.bf16.msra.mxu0 %v7371_v57  ;;  %5039 = vmatpush1.bf16.msra.mxu1 %v7374_v49  ;;  %7741 = vrcp.bf16 %v3509_v42  ;;  %v7730_v46 = vpop.eup %7729  ;;  %v7383_v45 = vld [vmem:[#allocation5 + $0x320] ss:$16 sps:$4 sm:$0xff]   ;;  %v7386_v57 = vld [vmem:[#allocation5 + $0x328] ss:$16 sps:$4 sm:$0xff]   ;;  %v7391_v10 = vld [vmem:[#allocation5 + $0x344] ss:$16 sps:$4 sm:$0xff]  }
 0x2ee   : > { %v3265_v9 = vsub.bf16 0, %v3201_v47  ;;  %4654 = vmatprep.subr.bf16.mxu0 %v7379_v60  ;;  %5040 = vmatprep.subr.bf16.mxu1 %v7382_v0  ;;  %v3202_v33 = vadd.bf16 %v8941_v18, %v3085_v14  ;;  %7743 = vrcp.bf16 %v3510_v20  ;;  %v3513_v14 = vadd.bf16 1065369472, %v7730_v46 }
 0x2ef   : > { %4518 = vmatmul.mubr.bf16.gmra.mrb[144].mxu0 %v3582_v36  ;;  %4904 = vmatmul.mubr.bf16.gmra.mrb[144].mxu1 %v3582_v36  ;;  %v2602_v8 = vpop.f32.mrb[104].mxu0  ;;  %v9077_v63 = vpop.f32.mrb[104].mxu1  ;;  %v7394_v36 = vld [vmem:[#allocation5 + $0x34c] ss:$16 sps:$4 sm:$0xff]  }
 0x2f0   : > { %10260 = vst [vmem:[#allocation22_spill] sm:$0xff] %v9077_v63  ;;  %v7732_v49 = vpop.eup %7731  ;;  %v3402_v1 = vmul.bf16 1069105081, %v3265_v9  ;;  %v2604_v21 = vpop.f32.mrb[105].mxu0  ;;  %v3266_v60 = vsub.bf16 0, %v3202_v33 }
 0x2f1   : > { %v7734_v42 = vpop.eup %7733  ;;  %v9079_v0 = vpop.f32.mrb[105].mxu1  ;;  %4655 = vmatpush1.bf16.msra.mxu0 %v7377_v62  ;;  %5041 = vmatpush1.bf16.msra.mxu1 %v7380_v16  ;;  %v3514_v9 = vadd.bf16 1065369472, %v7732_v49 }
 0x2f2   : > { %10261 = vst [vmem:[#allocation21_spill] sm:$0xff] %v9079_v0  ;;  %v2606_v47 = vpop.f32.mrb[106].mxu0  ;;  %v7736_v61 = vpop.eup %7735  ;;  %v3592_v5 = vmul.bf16 1065369472, %v7734_v42  ;;  %4656 = vmatprep.subr.bf16.mxu0 %v7385_v52  ;;  %5042 = vmatprep.subr.bf16.mxu1 %v7388_v7  ;;  %v3405_v53 = vmul.bf16 1069105081, %v3266_v60  ;;  %7745 = vpow.bf16 %v3402_v1 }
 0x2f3   : > { %v3088_v54 = vpack.c.bf16 %v2606_v47, %v2602_v8  ;;  %v9081_v44 = vpop.f32.mrb[106].mxu1  ;;  %v2608_v20 = vpop.f32.mrb[107].mxu0  ;;  %v3590_v46 = vmul.bf16 1065369472, %v7736_v61  ;;  %v7389_v52 = vld [vmem:[#allocation5 + $0x340] ss:$16 sps:$4 sm:$0xff]  }
 0x2f4   : > { %10262 = vst [vmem:[#allocation24_spill] sm:$0xff] %v9081_v44  ;;  %4527 = vmatprep.mubr.bf16.mxu0 %v3592_v5  ;;  %4913 = vmatprep.mubr.bf16.mxu1 %v3592_v5  ;;  %v3089_v16 = vpack.c.bf16 %v2608_v20, %v2604_v21  ;;  %v9086_v2 = vpop.f32.mrb[107].mxu1  ;;  %7747 = vpow.bf16 %v3405_v53  ;;  %v7392_v7 = vld [vmem:[#allocation5 + $0x348] ss:$16 sps:$4 sm:$0xff]   ;;  %v7397_v5 = vld [vmem:[#allocation5 + $0x364] ss:$16 sps:$4 sm:$0xff]  }
 0x2f5   : > { %v3205_v62 = vadd.bf16 %v8936_v6, %v3088_v54  ;;  %4657 = vmatpush1.bf16.msra.mxu0 %v7383_v45  ;;  %5043 = vmatpush1.bf16.msra.mxu1 %v7386_v57  ;;  %7749 = vrcp.bf16 %v3513_v14  ;;  %v7400_v54 = vld [vmem:[#allocation5 + $0x36c] ss:$16 sps:$4 sm:$0xff]   ;;  %v7738_v1 = vpop.eup %7737 }
 0x2f6   : > { %v3206_v42 = vadd.bf16 %v8941_v18, %v3089_v16  ;;  %4658 = vmatprep.subr.bf16.mxu0 %v7391_v10  ;;  %5044 = vmatprep.subr.bf16.mxu1 %v7394_v36  ;;  %7751 = vrcp.bf16 %v3514_v9  ;;  %v7395_v10 = vld [vmem:[#allocation5 + $0x360] ss:$16 sps:$4 sm:$0xff]   ;;  %v7398_v36 = vld [vmem:[#allocation5 + $0x368] ss:$16 sps:$4 sm:$0xff]   ;;  %v7406_v44 = vld [vmem:[#allocation5 + $0x38c] ss:$16 sps:$4 sm:$0xff]  }
 0x2f7   : > { %v3269_v49 = vsub.bf16 0, %v3205_v62  ;;  %4528 = vmatmul.mubr.bf16.gmra.mrb[148].mxu0 %v3590_v46  ;;  %4914 = vmatmul.mubr.bf16.gmra.mrb[148].mxu1 %v3590_v46  ;;  %v2612_v53 = vpop.f32.mrb[108].mxu0  ;;  %v9091_v61 = vpop.f32.mrb[108].mxu1  ;;  %v3517_v62 = vadd.bf16 1065369472, %v7738_v1 }
 0x2f8   : > { %10263 = vst [vmem:[#allocation23_spill] sm:$0xff] %v9091_v61  ;;  %v7740_v21 = vpop.eup %7739  ;;  %v3270_v57 = vsub.bf16 0, %v3206_v42  ;;  %v2614_v60 = vpop.f32.mrb[109].mxu0  ;;  %v7407_v1 = vld [vmem:[#allocation5 + $0x3a0] ss:$16 sps:$4 sm:$0xff]  }
 0x2f9   : > { %v3414_v45 = vmul.bf16 1069105081, %v3269_v49  ;;  %v7742_v47 = vpop.eup %7741  ;;  %v9093_v20 = vpop.f32.mrb[109].mxu1  ;;  %4659 = vmatpush1.bf16.msra.mxu0 %v7389_v52  ;;  %5045 = vmatpush1.bf16.msra.mxu1 %v7392_v7  ;;  %v3518_v9 = vadd.bf16 1065369472, %v7740_v21 }
 0x2fa   : > { %10264 = vst [vmem:[#allocation11_spill] sm:$0xff] %v9093_v20  ;;  %v7744_v14 = vpop.eup %7743  ;;  %v3417_v16 = vmul.bf16 1069105081, %v3270_v57  ;;  %v2616_v33 = vpop.f32.mrb[110].mxu0  ;;  %4660 = vmatprep.subr.bf16.mxu0 %v7397_v5  ;;  %5046 = vmatprep.subr.bf16.mxu1 %v7400_v54  ;;  %v7403_v57 = vld [vmem:[#allocation5 + $0x384] ss:$16 sps:$4 sm:$0xff]  }
 0x2fb   : > { %v9095_v46 = vpop.f32.mrb[110].mxu1  ;;  %v3600_v8 = vmul.bf16 1065369472, %v7744_v14  ;;  %v3092_v49 = vpack.c.bf16 %v2616_v33, %v2612_v53  ;;  %v2618_v42 = vpop.f32.mrb[111].mxu0  ;;  %7753 = vpow.bf16 %v3414_v45  ;;  %v3598_v5 = vmul.bf16 1065369472, %v7742_v47 }
 0x2fc   : > { %10265 = vst [vmem:[#allocation25_spill] sm:$0xff] %v9095_v46  ;;  %v9097_v63 = vpop.f32.mrb[111].mxu1  ;;  %v3093_v7 = vpack.c.bf16 %v2618_v42, %v2614_v60  ;;  %7755 = vpow.bf16 %v3417_v16  ;;  %v7401_v53 = vld [vmem:[#allocation5 + $0x380] ss:$16 sps:$4 sm:$0xff]   ;;  %v7404_v21 = vld [vmem:[#allocation5 + $0x388] ss:$16 sps:$4 sm:$0xff]  }
 0x2fd   : > { %10266 = vst [vmem:[#allocation26_spill] sm:$0xff] %v9097_v63  ;;  %4537 = vmatprep.mubr.bf16.mxu0 %v3600_v8  ;;  %4923 = vmatprep.mubr.bf16.mxu1 %v3600_v8  ;;  %v3209_v54 = vadd.bf16 %v8936_v6, %v3092_v49  ;;  %7757 = vrcp.bf16 %v3517_v62  ;;  %v7409_v45 = vld [vmem:[#allocation5 + $0x3a4] ss:$16 sps:$4 sm:$0xff]   ;;  %v7746_v60 = vpop.eup %7745  ;;  %v7412_v8 = vld [vmem:[#allocation5 + $0x3ac] ss:$16 sps:$4 sm:$0xff]  }
 0x2fe   : > { %v3210_v33 = vadd.bf16 %v8941_v18, %v3093_v7  ;;  %4661 = vmatpush1.bf16.msra.mxu0 %v7395_v10  ;;  %5047 = vmatpush1.bf16.msra.mxu1 %v7398_v36  ;;  %7759 = vrcp.bf16 %v3518_v9  ;;  %v3521_v46 = vadd.bf16 1065369472, %v7746_v60  ;;  %v7410_v20 = vld [vmem:[#allocation5 + $0x3a8] ss:$16 sps:$4 sm:$0xff]  }
 0x2ff   : > { %4538 = vmatmul.mubr.bf16.gmra.mrb[152].mxu0 %v3598_v5  ;;  %4924 = vmatmul.mubr.bf16.gmra.mrb[152].mxu1 %v3598_v5  ;;  %v3273_v14 = vsub.bf16 0, %v3209_v54  ;;  %v2622_v42 = vpop.f32.mrb[112].mxu0  ;;  %v9105_v52 = vpop.f32.mrb[112].mxu1 }
 0x300   : > { %10267 = vst [vmem:[#allocation27_spill] sm:$0xff] %v9105_v52  ;;  %v7748_v47 = vpop.eup %7747  ;;  %v3274_v16 = vsub.bf16 0, %v3210_v33  ;;  %v2624_v49 = vpop.f32.mrb[113].mxu0  ;;  %4662 = vmatprep.subr.bf16.mxu0 %v7403_v57  ;;  %5048 = vmatprep.subr.bf16.mxu1 %v7406_v44  ;;  %v7419_v57 = vld [vmem:[#allocation5 + $0x3e0] ss:$16 sps:$4 sm:$0xff]  }
 0x301   : > { %v7750_v62 = vpop.eup %7749  ;;  %v3426_v10 = vmul.bf16 1069105081, %v3273_v14  ;;  %v9107_v36 = vpop.f32.mrb[113].mxu1  ;;  %v3522_v9 = vadd.bf16 1065369472, %v7748_v47 }
 0x302   : > { %10268 = vst [vmem:[#allocation28_spill] sm:$0xff] %v9107_v36  ;;  %v2626_v7 = vpop.f32.mrb[114].mxu0  ;;  %v7752_v61 = vpop.eup %7751  ;;  %v3429_v5 = vmul.bf16 1069105081, %v3274_v16  ;;  %4663 = vmatpush1.bf16.msra.mxu0 %v7401_v53  ;;  %5049 = vmatpush1.bf16.msra.mxu1 %v7404_v21  ;;  %v7418_v53 = vld [vmem:[#allocation5 + $0x3cc] ss:$16 sps:$4 sm:$0xff]  }
 0x303   : > { %v3096_v54 = vpack.c.bf16 %v2626_v7, %v2622_v42  ;;  %v3608_v63 = vmul.bf16 1065369472, %v7752_v61  ;;  %v9109_v0 = vpop.f32.mrb[114].mxu1  ;;  %v2628_v33 = vpop.f32.mrb[115].mxu0  ;;  %4664 = vmatprep.subr.bf16.mxu0 %v7409_v45  ;;  %5050 = vmatprep.subr.bf16.mxu1 %v7412_v8  ;;  %7761 = vpow.bf16 %v3426_v10  ;;  %v7415_v42 = vld [vmem:[#allocation5 + $0x3c4] ss:$16 sps:$4 sm:$0xff]  }
 0x304   : > { %10269 = vst [vmem:[#allocation29_spill] sm:$0xff] %v9109_v0  ;;  %v3097_v14 = vpack.c.bf16 %v2628_v33, %v2624_v49  ;;  %v9114_v60 = vpop.f32.mrb[115].mxu1  ;;  %7763 = vpow.bf16 %v3429_v5  ;;  %v3606_v61 = vmul.bf16 1065369472, %v7750_v62  ;;  %v7413_v8 = vld [vmem:[#allocation5 + $0x3c0] ss:$16 sps:$4 sm:$0xff]  }
 0x305   : > { %v3213_v44 = vadd.bf16 %v8936_v6, %v3096_v54  ;;  %10270 = vst [vmem:[#allocation30_spill] sm:$0xff] %v9114_v60  ;;  %4547 = vmatprep.mubr.bf16.mxu0 %v3608_v63  ;;  %4933 = vmatprep.mubr.bf16.mxu1 %v3608_v63  ;;  %7765 = vrcp.bf16 %v3521_v46  ;;  %v7416_v47 = vld [vmem:[#allocation5 + $0x3c8] ss:$16 sps:$4 sm:$0xff]   ;;  %v7421_v63 = vld [vmem:[#allocation5 + $0x3e4] ss:$16 sps:$4 sm:$0xff]  }
 0x306   : > { %4665 = vmatpush1.bf16.msra.mxu0 %v7407_v1  ;;  %5051 = vmatpush1.bf16.msra.mxu1 %v7410_v20  ;;  %v7754_v16 = vpop.eup %7753  ;;  %v3214_v49 = vadd.bf16 %v8941_v18, %v3097_v14  ;;  %7767 = vrcp.bf16 %v3522_v9  ;;  %v7424_v62 = vld [vmem:[#allocation5 + $0x3ec] ss:$16 sps:$4 sm:$0xff]   ;;  %v7422_v9 = vld [vmem:[#allocation5 + $0x3e8] ss:$16 sps:$4 sm:$0xff]  }
 0x307   : > { %v3277_v45 = vsub.bf16 0, %v3213_v44  ;;  %4548 = vmatmul.mubr.bf16.gmra.mrb[156].mxu0 %v3606_v61  ;;  %4934 = vmatmul.mubr.bf16.gmra.mrb[156].mxu1 %v3606_v61  ;;  %v2632_v10 = vpop.f32.mrb[116].mxu0  ;;  %v9119_v7 = vpop.f32.mrb[116].mxu1  ;;  %v3525_v21 = vadd.bf16 1065369472, %v7754_v16 }
 0x308   : > { %10271 = vst [vmem:[#allocation31_spill] sm:$0xff] %v9119_v7  ;;  %v7756_v5 = vpop.eup %7755  ;;  %v2634_v33 = vpop.f32.mrb[117].mxu0  ;;  %4666 = vmatprep.subr.bf16.mxu0 %v7415_v42  ;;  %5052 = vmatprep.subr.bf16.mxu1 %v7418_v53  ;;  %v3278_v20 = vsub.bf16 0, %v3214_v49 }
 0x309   : > { %v3438_v54 = vmul.bf16 1069105081, %v3277_v45  ;;  %v7758_v46 = vpop.eup %7757  ;;  %v9121_v1 = vpop.f32.mrb[117].mxu1  ;;  %v3526_v36 = vadd.bf16 1065369472, %v7756_v5 }
 0x30a   : > { %v2636_v44 = vpop.f32.mrb[118].mxu0  ;;  %v7760_v61 = vpop.eup %7759  ;;  %4667 = vmatpush1.bf16.msra.mxu0 %v7413_v8  ;;  %5053 = vmatpush1.bf16.msra.mxu1 %v7416_v47  ;;  %v3441_v45 = vmul.bf16 1069105081, %v3278_v20  ;;  %v3614_v8 = vmul.bf16 1065369472, %v7758_v46 }
 0x30b   : > { %v3100_v14 = vpack.c.bf16 %v2636_v44, %v2632_v10  ;;  %v9123_v52 = vpop.f32.mrb[118].mxu1  ;;  %v2638_v0 = vpop.f32.mrb[119].mxu0  ;;  %v3616_v60 = vmul.bf16 1065369472, %v7760_v61  ;;  %4668 = vmatprep.subr.bf16.mxu0 %v7421_v63  ;;  %5054 = vmatprep.subr.bf16.mxu1 %v7424_v62  ;;  %7769 = vpow.bf16 %v3438_v54  ;;  %v3136_v10 = vcombine.high %v8925_v58, %v8925_v58 }
 0x30c   : > { %v3101_v49 = vpack.c.bf16 %v2638_v0, %v2634_v33  ;;  %v9128_v16 = vpop.f32.mrb[119].mxu1  ;;  %7771 = vpow.bf16 %v3441_v45 }
 0x30d   : > { %v3217_v53 = vadd.bf16 %v8936_v6, %v3100_v14  ;;  %4557 = vmatprep.mubr.bf16.mxu0 %v3616_v60  ;;  %4943 = vmatprep.mubr.bf16.mxu1 %v3616_v60  ;;  %7773 = vrcp.bf16 %v3525_v21  ;;  %v3159_v14 = vpack.i.b16 %v3136_v10, %v3136_v10  ;;  %v3135_v10 = vcombine.high %v8922_v34, %v8922_v34 }
 0x30e   : > { %v3218_v63 = vadd.bf16 %v8941_v18, %v3101_v49  ;;  %4669 = vmatpush1.bf16.msra.mxu0 %v7419_v57  ;;  %5055 = vmatpush1.bf16.msra.mxu1 %v7422_v9  ;;  %v7762_v62 = vpop.eup %7761  ;;  %7775 = vrcp.bf16 %v3526_v36 }
 0x30f   : > { %v3281_v5 = vsub.bf16 0, %v3217_v53  ;;  %4558 = vmatmul.mubr.bf16.gmra.mrb[160].mxu0 %v3614_v8  ;;  %4944 = vmatmul.mubr.bf16.gmra.mrb[160].mxu1 %v3614_v8  ;;  %v2642_v0 = vpop.f32.mrb[120].mxu0  ;;  %v9135_v54 = vpop.f32.mrb[120].mxu1  ;;  %v3529_v45 = vadd.bf16 1065369472, %v7762_v62 }
 0x310   : > { %10272 = vst [vmem:[#allocation32_spill] sm:$0xff] %v9135_v54  ;;  %v7764_v60 = vpop.eup %7763  ;;  %v3282_v33 = vsub.bf16 0, %v3218_v63  ;;  %v2644_v46 = vpop.f32.mrb[121].mxu0 }
 0x311   : > { %v7766_v20 = vpop.eup %7765  ;;  %v3450_v44 = vmul.bf16 1069105081, %v3281_v5  ;;  %v9137_v61 = vpop.f32.mrb[121].mxu1  ;;  %v3530_v53 = vadd.bf16 1065369472, %v7764_v60  ;;  %v9151_v60 = vrot.slane %v3159_v14, %v10250_v17 }
 0x312   : > { %10273 = vst [vmem:[#allocation33_spill] sm:$0xff] %v9137_v61  ;;  %v7768_v58 = vpop.eup %7767  ;;  %v3453_v21 = vmul.bf16 1069105081, %v3282_v33  ;;  %v2646_v57 = vpop.f32.mrb[122].mxu0  ;;  %v3622_v62 = vmul.bf16 1065369472, %v7766_v20 }
 0x313   : > { %v9139_v9 = vpop.f32.mrb[122].mxu1  ;;  %v3624_v49 = vmul.bf16 1065369472, %v7768_v58  ;;  %v3104_v8 = vpack.c.bf16 %v2646_v57, %v2642_v0  ;;  %v2648_v42 = vpop.f32.mrb[123].mxu0 }
 0x314   : > { %10274 = vst [vmem:[#allocation34_spill] sm:$0xff] %v9139_v9  ;;  %v9141_v47 = vpop.f32.mrb[123].mxu1  ;;  %7777 = vpow.bf16 %v3453_v21  ;;  %v3105_v5 = vpack.c.bf16 %v2648_v42, %v2644_v46 }
 0x315   : > { %10275 = vst [vmem:[#allocation35_spill] sm:$0xff] %v9141_v47  ;;  %7779 = vpow.bf16 %v3450_v44  ;;  %4567 = vmatprep.mubr.bf16.mxu0 %v3624_v49  ;;  %4953 = vmatprep.mubr.bf16.mxu1 %v3624_v49  ;;  %v3221_v0 = vadd.bf16 %v8936_v6, %v3104_v8  ;;  %v3152_v49 = vpack.i.b16 %v3135_v10, %v3135_v10 }
 0x316   : > { %v3222_v33 = vadd.bf16 %v8941_v18, %v3105_v5  ;;  %7781 = vrcp.bf16 %v3529_v45  ;;  %v7770_v58 = vpop.eup %7769  ;;  %v10276_v45 = vpack.c.bf16 %v8945_v29, %v8933_v3 }
 0x317   : > { %4568 = vmatmul.mubr.bf16.gmra.mrb[164].mxu0 %v3622_v62  ;;  %4954 = vmatmul.mubr.bf16.gmra.mrb[164].mxu1 %v3622_v62  ;;  %v3285_v42 = vsub.bf16 0, %v3221_v0  ;;  %v2652_v46 = vpop.f32.mrb[124].mxu0  ;;  %v9154_v21 = vpop.f32.mrb[124].mxu1  ;;  %7783 = vrcp.bf16 %v3530_v53  ;;  %v3533_v62 = vadd.bf16 1065369472, %v7770_v58  ;;  %v9170_v3 = vrot.slane %v3152_v49, %v10250_v17 }
 0x318   : > { %v7772_v34 = vpop.eup %7771  ;;  %v3286_v44 = vsub.bf16 0, %v3222_v33  ;;  %v2654_v57 = vpop.f32.mrb[125].mxu0  ;;  %v3168_v5 = vadd.bf16 %v9151_v60, %v10276_v45 }
 0x319   : > { %v7774_v20 = vpop.eup %7773  ;;  %v3462_v8 = vmul.bf16 1069105081, %v3285_v42  ;;  %v9156_v36 = vpop.f32.mrb[125].mxu1  ;;  %v3534_v9 = vadd.bf16 1065369472, %v7772_v34 }
 0x31a   : > { %v2656_v14 = vpop.f32.mrb[126].mxu0  ;;  %v7776_v63 = vpop.eup %7775  ;;  %v3465_v0 = vmul.bf16 1069105081, %v3286_v44  ;;  %v3630_v29 = vmul.bf16 1065369472, %v7774_v20  ;;  %v3232_v58 = vsub.bf16 0, %v3168_v5 }
 0x31b   : > { %v3108_v54 = vpack.c.bf16 %v2656_v14, %v2652_v46  ;;  %v3632_v53 = vmul.bf16 1065369472, %v7776_v63  ;;  %v9162_v61 = vpop.f32.mrb[126].mxu1  ;;  %v2658_v33 = vpop.f32.mrb[127].mxu0  ;;  %7785 = vpow.bf16 %v3462_v8  ;;  %v10277_v8 = vpack.c.bf16 %v8938_v30, %v8931_v38 }
 0x31c   : > { %v3110_v42 = vpack.c.bf16 %v9162_v61, %v9154_v21  ;;  %v3109_v47 = vpack.c.bf16 %v2658_v33, %v2654_v57  ;;  %v9167_v7 = vpop.f32.mrb[127].mxu1  ;;  %7787 = vpow.bf16 %v3465_v0  ;;  %v3303_v5 = vmul.bf16 1069105081, %v3232_v58 }
 0x31d   : > { %v3225_v10 = vadd.bf16 %v8936_v6, %v3108_v54  ;;  %4577 = vmatprep.mubr.bf16.mxu0 %v3632_v53  ;;  %4963 = vmatprep.mubr.bf16.mxu1 %v3632_v53  ;;  %v3111_v63 = vpack.c.bf16 %v9167_v7, %v9156_v36  ;;  %7789 = vrcp.bf16 %v3533_v62  ;;  %v3167_v20 = vadd.bf16 %v9170_v3, %v10277_v8 }
 0x31e   : > { %v3226_v54 = vadd.bf16 %v8941_v18, %v3109_v47  ;;  %7791 = vrcp.bf16 %v3534_v9  ;;  %v10278_v62 = vpack.c.bf16 %v8959_v43, %v8953_v39  ;;  %v3227_v36 = vadd.bf16 %v9170_v3, %v3110_v42 }
 0x31f   : > { %v3289_v46 = vsub.bf16 0, %v3225_v10  ;;  %v7778_v6 = vpop.eup %7777  ;;  %4578 = vmatmul.mubr.bf16.gmra.mrb[168].mxu0 %v3630_v29  ;;  %4964 = vmatmul.mubr.bf16.gmra.mrb[168].mxu1 %v3630_v29  ;;  %v3231_v9 = vsub.bf16 0, %v3167_v20  ;;  %v10279_v29 = vpack.c.bf16 %v8955_v40, %v8951_v41 }
 0x320   : > { %v7780_v34 = vpop.eup %7779  ;;  %v3538_v44 = vadd.bf16 1065369472, %v7778_v6  ;;  %v3290_v14 = vsub.bf16 0, %v3226_v54  ;;  %v3172_v0 = vadd.bf16 %v9151_v60, %v10278_v62  ;;  %v10281_v62 = vpack.c.bf16 %v8969_v32, %v8965_v50 }
 0x321   : > { %v3474_v57 = vmul.bf16 1069105081, %v3289_v46  ;;  %v7782_v49 = vpop.eup %7781  ;;  %v3537_v53 = vadd.bf16 1065369472, %v7780_v34  ;;  %v3300_v43 = vmul.bf16 1069105081, %v3231_v9  ;;  %v3171_v58 = vadd.bf16 %v9170_v3, %v10279_v29 }
 0x322   : > { %v7784_v45 = vpop.eup %7783  ;;  %v3477_v18 = vmul.bf16 1069105081, %v3290_v14  ;;  %7793 = vrcp.bf16 %v3538_v44  ;;  %v3638_v38 = vmul.bf16 1065369472, %v7782_v49  ;;  %v3236_v30 = vsub.bf16 0, %v3172_v0 }
 0x323   : > { %v3640_v47 = vmul.bf16 1065369472, %v7784_v45  ;;  %7795 = vpow.bf16 %v3474_v57  ;;  %v10280_v34 = vpack.c.bf16 %v8973_v31, %v8967_v51  ;;  %v3235_v8 = vsub.bf16 0, %v3171_v58 }
 0x324   : > { %7797 = vpow.bf16 %v3477_v18  ;;  %v3315_v54 = vmul.bf16 1069105081, %v3236_v30  ;;  %v3175_v0 = vadd.bf16 %v9170_v3, %v10281_v62  ;;  %v10282_v9 = vpack.c.bf16 %v8987_v27, %v8981_v24 }
 0x325   : > { %4587 = vmatprep.mubr.bf16.mxu0 %v3640_v47  ;;  %4973 = vmatprep.mubr.bf16.mxu1 %v3640_v47  ;;  %7799 = vpow.bf16 %v3303_v5  ;;  %v3176_v44 = vadd.bf16 %v9151_v60, %v10280_v34  ;;  %v3312_v31 = vmul.bf16 1069105081, %v3235_v8  ;;  %v10283_v24 = vpack.c.bf16 %v8983_v35, %v8979_v23 }
 0x326   : > { %v7786_v33 = vpop.eup %7785  ;;  %7801 = vrcp.bf16 %v3537_v53  ;;  %v10284_v34 = vpack.c.bf16 %v9001_v13, %v8995_v19  ;;  %v10285_v19 = vpack.c.bf16 %v8997_v25, %v8993_v59 }
 0x327   : > { %4588 = vmatmul.mubr.bf16.gmra.mrb[172].mxu0 %v3638_v38  ;;  %4974 = vmatmul.mubr.bf16.gmra.mrb[172].mxu1 %v3638_v38  ;;  %v7788_v10 = vpop.eup %7787  ;;  %v3541_v57 = vadd.bf16 1065369472, %v7786_v33  ;;  %v3240_v41 = vsub.bf16 0, %v3176_v44  ;;  %v3180_v38 = vadd.bf16 %v9151_v60, %v10282_v9  ;;  %v3179_v27 = vadd.bf16 %v9170_v3, %v10283_v24 }
 0x328   : > { %v7790_v39 = vpop.eup %7789  ;;  %v3542_v46 = vadd.bf16 1065369472, %v7788_v10  ;;  %v3239_v10 = vsub.bf16 0, %v3175_v0  ;;  %v3184_v44 = vadd.bf16 %v9151_v60, %v10284_v34  ;;  %v3183_v13 = vadd.bf16 %v9170_v3, %v10285_v19 }
 0x329   : > { %v7792_v6 = vpop.eup %7791  ;;  %v3646_v20 = vmul.bf16 1065369472, %v7790_v39  ;;  %v3327_v47 = vmul.bf16 1069105081, %v3240_v41  ;;  %v3244_v50 = vsub.bf16 0, %v3180_v38  ;;  %v3243_v8 = vsub.bf16 0, %v3179_v27 }
 0x32a   : > { %v3648_v49 = vmul.bf16 1065369472, %v7792_v6  ;;  %7803 = vrcp.bf16 %v3542_v46  ;;  %v3324_v46 = vmul.bf16 1069105081, %v3239_v10  ;;  %v3248_v41 = vsub.bf16 0, %v3184_v44 }
 0x32b   : > { %7805 = vpow.bf16 %v3300_v43 }
 0x32c   : > { %4597 = vmatprep.mubr.bf16.mxu0 %v3648_v49  ;;  %4983 = vmatprep.mubr.bf16.mxu1 %v3648_v49  ;;  %7807 = vpow.bf16 %v3315_v54  ;;  %v3339_v54 = vmul.bf16 1069105081, %v3244_v50 }
 0x32d   : > { %v7794_v14 = vpop.eup %7793  ;;  %7809 = vrcp.bf16 %v3541_v57 }
 0x32e   : > { %v7796_v40 = vpop.eup %7795  ;;  %v3656_v45 = vmul.bf16 1065369472, %v7794_v14 }
 0x32f   : > { %4598 = vmatmul.mubr.bf16.gmra.mrb[176].mxu0 %v3646_v20  ;;  %4984 = vmatmul.mubr.bf16.gmra.mrb[176].mxu1 %v3646_v20  ;;  %v7798_v5 = vpop.eup %7797  ;;  %v3545_v30 = vadd.bf16 1065369472, %v7796_v40 }
 0x330   : > { %v7800_v51 = vpop.eup %7799  ;;  %v3546_v53 = vadd.bf16 1065369472, %v7798_v5  ;;  %4607 = vmatprep.mubr.bf16.mxu0 %v3656_v45  ;;  %4993 = vmatprep.mubr.bf16.mxu1 %v3656_v45  ;;  %v3336_v45 = vmul.bf16 1069105081, %v3243_v8 }
 0x331   : > { %v7802_v18 = vpop.eup %7801  ;;  %v3488_v33 = vadd.bf16 1065369472, %v7800_v51  ;;  %v3351_v51 = vmul.bf16 1069105081, %v3248_v41 }
 0x332   : > { %7811 = vrcp.bf16 %v3546_v53  ;;  %v3654_v39 = vmul.bf16 1065369472, %v7802_v18 }
 0x333   : > { %7813 = vpow.bf16 %v3312_v31  ;;  %v10286_v31 = vpack.c.bf16 %v9015_v15, %v9009_v37  ;;  %v10287_v15 = vpack.c.bf16 %v9011_v28, %v9007_v55 }
 0x334   : > { %7815 = vpow.bf16 %v3327_v47  ;;  %v3247_v47 = vsub.bf16 0, %v3183_v13 }
 0x335   : > { %v7804_v43 = vpop.eup %7803  ;;  %7817 = vrcp.bf16 %v3545_v30  ;;  %v3188_v62 = vadd.bf16 %v9151_v60, %v10286_v31  ;;  %v10294_v31 = vld [vmem:[#allocation16_spill] sm:$0xff] }
 0x336   : > { %v3664_v32 = vmul.bf16 1065369472, %v7804_v43  ;;  %v7806_v29 = vpop.eup %7805  ;;  %7819 = vrcp.bf16 %v3488_v33  ;;  %v3348_v37 = vmul.bf16 1069105081, %v3247_v47  ;;  %v3187_v33 = vadd.bf16 %v9170_v3, %v10287_v15  ;;  %v10296_v15 = vld [vmem:[#allocation14_spill] sm:$0xff] }
 0x337   : > { %4608 = vmatmul.mubr.bf16.gmra.mrb[180].mxu0 %v3654_v39  ;;  %4994 = vmatmul.mubr.bf16.gmra.mrb[180].mxu1 %v3654_v39  ;;  %v7808_v58 = vpop.eup %7807  ;;  %v3487_v57 = vadd.bf16 1065369472, %v7806_v29  ;;  %7821 = vpow.bf16 %v3324_v46  ;;  %v3252_v38 = vsub.bf16 0, %v3188_v62  ;;  %v10288_v43 = vpack.c.bf16 %v9030_v56, %v9023_v12 }
 0x338   : > { %4617 = vmatprep.mubr.bf16.mxu0 %v3664_v32  ;;  %5003 = vmatprep.mubr.bf16.mxu1 %v3664_v32  ;;  %v7810_v6 = vpop.eup %7809  ;;  %v3492_v49 = vadd.bf16 1065369472, %v7808_v58  ;;  %7823 = vpow.bf16 %v3339_v54  ;;  %v3251_v24 = vsub.bf16 0, %v3187_v33  ;;  %v10289_v12 = vpack.c.bf16 %v9025_v48, %v9021_v22  ;;  %v10297_v33 = vld [vmem:[#allocation18_spill] sm:$0xff] }
 0x339   : > { %v3662_v20 = vmul.bf16 1065369472, %v7810_v6  ;;  %7825 = vrcp.bf16 %v3487_v57  ;;  %v3363_v39 = vmul.bf16 1069105081, %v3252_v38  ;;  %v3192_v50 = vadd.bf16 %v9151_v60, %v10288_v43 }
 0x33a   : > { %7827 = vrcp.bf16 %v3492_v49  ;;  %v3360_v56 = vmul.bf16 1069105081, %v3251_v24  ;;  %v3191_v54 = vadd.bf16 %v9170_v3, %v10289_v12  ;;  %v10290_v57 = vpack.c.bf16 %v9043_v11, %v9037_v26  ;;  %v10291_v11 = vld [vmem:[#allocation12_spill] sm:$0xff] }
 0x33b   : > { %7829 = vpow.bf16 %v3336_v45  ;;  %v3256_v27 = vsub.bf16 0, %v3192_v50  ;;  %v10292_v45 = vpack.c.bf16 %v9039_v4, %v10291_v11 }
 0x33c   : > { %7831 = vpow.bf16 %v3351_v51  ;;  %v3196_v49 = vadd.bf16 %v9151_v60, %v10290_v57  ;;  %v3255_v41 = vsub.bf16 0, %v3191_v54  ;;  %v10293_v51 = vld [vmem:[#allocation13_spill] sm:$0xff]  ;;  %v10302_v57 = vld [vmem:[#allocation20_spill] sm:$0xff] }
 0x33d   : > { %v7812_v14 = vpop.eup %7811  ;;  %v3375_v44 = vmul.bf16 1069105081, %v3256_v27  ;;  %v3195_v19 = vadd.bf16 %v9170_v3, %v10292_v45  ;;  %v10295_v62 = vpack.c.bf16 %v10293_v51, %v10294_v31  ;;  %v10307_v31 = vld [vmem:[#allocation24_spill] sm:$0xff] }
 0x33e   : > { %v3672_v23 = vmul.bf16 1065369472, %v7812_v14  ;;  %v7814_v35 = vpop.eup %7813  ;;  %v3372_v26 = vmul.bf16 1069105081, %v3255_v41 }
 0x33f   : > { %4618 = vmatmul.mubr.bf16.gmra.mrb[184].mxu0 %v3662_v20  ;;  %5004 = vmatmul.mubr.bf16.gmra.mrb[184].mxu1 %v3662_v20  ;;  %v7816_v40 = vpop.eup %7815  ;;  %v3491_v53 = vadd.bf16 1065369472, %v7814_v35  ;;  %v3260_v35 = vsub.bf16 0, %v3196_v49  ;;  %v10303_v49 = vld [vmem:[#allocation17_spill] sm:$0xff] }
 0x340   : > { %4627 = vmatprep.mubr.bf16.mxu0 %v3672_v23  ;;  %5013 = vmatprep.mubr.bf16.mxu1 %v3672_v23  ;;  %v7818_v5 = vpop.eup %7817  ;;  %v3496_v18 = vadd.bf16 1065369472, %v7816_v40 }
 0x341   : > { %v7820_v0 = vpop.eup %7819  ;;  %v3670_v9 = vmul.bf16 1065369472, %v7818_v5  ;;  %7833 = vrcp.bf16 %v3491_v53  ;;  %v3387_v5 = vmul.bf16 1069105081, %v3260_v35 }
 0x342   : > { %v3556_v59 = vmul.bf16 1065369472, %v7820_v0  ;;  %v7822_v25 = vpop.eup %7821  ;;  %7835 = vrcp.bf16 %v3496_v18  ;;  %v3200_v0 = vadd.bf16 %v9151_v60, %v10295_v62  ;;  %v10308_v62 = vld [vmem:[#allocation22_spill] sm:$0xff] }
 0x343   : > { %v7824_v30 = vpop.eup %7823  ;;  %v3495_v29 = vadd.bf16 1065369472, %v7822_v25  ;;  %7837 = vpow.bf16 %v3348_v37 }
 0x344   : > { %v7826_v10 = vpop.eup %7825  ;;  %v3500_v58 = vadd.bf16 1065369472, %v7824_v30  ;;  %7839 = vpow.bf16 %v3363_v39 }
 0x345   : > { %v7828_v32 = vpop.eup %7827  ;;  %v3554_v46 = vmul.bf16 1065369472, %v7826_v10  ;;  %7841 = vrcp.bf16 %v3495_v29  ;;  %v10298_v10 = vpack.c.bf16 %v10296_v15, %v10297_v33  ;;  %v10300_v29 = vld [vmem:[#allocation15_spill] sm:$0xff] }
 0x346   : > { %v3564_v6 = vmul.bf16 1065369472, %v7828_v32  ;;  %v7830_v55 = vpop.eup %7829  ;;  %7843 = vrcp.bf16 %v3500_v58  ;;  %v10299_v32 = vld [vmem:[#allocation19_spill] sm:$0xff] }
 0x347   : > { %4628 = vmatmul.mubr.bf16.gmra.mrb[188].mxu0 %v3670_v9  ;;  %5014 = vmatmul.mubr.bf16.gmra.mrb[188].mxu1 %v3670_v9  ;;  %v7832_v28 = vpop.eup %7831  ;;  %v3499_v20 = vadd.bf16 1065369472, %v7830_v55  ;;  %7845 = vpow.bf16 %v3360_v56  ;;  %v3259_v9 = vsub.bf16 0, %v3195_v19  ;;  %v3199_v39 = vadd.bf16 %v9170_v3, %v10298_v10 }
 0x348   : > { %4670 = vmatprep.mubr.bf16.mxu0 %v3556_v59  ;;  %5056 = vmatprep.mubr.bf16.mxu1 %v3556_v59  ;;  %v3504_v14 = vadd.bf16 1065369472, %v7832_v28  ;;  %7847 = vpow.bf16 %v3375_v44  ;;  %v3264_v59 = vsub.bf16 0, %v3200_v0  ;;  %v10301_v58 = vpack.c.bf16 %v10299_v32, %v10300_v29  ;;  %v10313_v29 = vld [vmem:[#allocation25_spill] sm:$0xff] }
 0x349   : > { %7849 = vrcp.bf16 %v3499_v20  ;;  %v3384_v37 = vmul.bf16 1069105081, %v3259_v9  ;;  %v3263_v55 = vsub.bf16 0, %v3199_v39  ;;  %v10309_v0 = vpack.c.bf16 %v10307_v31, %v10308_v62  ;;  %v10310_v9 = vld [vmem:[#allocation26_spill] sm:$0xff] }
 0x34a   : > { %7851 = vrcp.bf16 %v3504_v14  ;;  %v3399_v50 = vmul.bf16 1069105081, %v3264_v59 }
 0x34b   : > { %7853 = vpow.bf16 %v3372_v26  ;;  %v3396_v44 = vmul.bf16 1069105081, %v3263_v55  ;;  %v10316_v55 = vld [vmem:[#allocation30_spill] sm:$0xff] }
 0x34c   : > { %v7834_v34 = vpop.eup %7833  ;;  %7855 = vpow.bf16 %v3387_v5 }
 0x34d   : > { %v7836_v8 = vpop.eup %7835  ;;  %v3562_v23 = vmul.bf16 1065369472, %v7834_v34 }
 0x34e   : > { %v3572_v40 = vmul.bf16 1065369472, %v7836_v8  ;;  %v7838_v22 = vpop.eup %7837  ;;  %v10304_v8 = vpack.c.bf16 %v10302_v57, %v10303_v49 }
 0x34f   : > { %4671 = vmatmul.mubr.bf16.vlgmr.msra.gmra.mrb[128].mxu0 %v3554_v46  ;;  %5057 = vmatmul.mubr.bf16.vlgmr.msra.gmra.mrb[128].mxu1 %v3554_v46  ;;  %v7840_v48 = vpop.eup %7839  ;;  %v3503_v18 = vadd.bf16 1065369472, %v7838_v22  ;;  %v3204_v46 = vadd.bf16 %v9151_v60, %v10301_v58  ;;  %v10314_v58 = vld [vmem:[#allocation23_spill] sm:$0xff] }
 0x350   : > { %4680 = vmatprep.mubr.bf16.mxu0 %v3564_v6  ;;  %5066 = vmatprep.mubr.bf16.mxu1 %v3564_v6  ;;  %v7842_v13 = vpop.eup %7841  ;;  %v3508_v47 = vadd.bf16 1065369472, %v7840_v48  ;;  %v3203_v20 = vadd.bf16 %v9170_v3, %v10304_v8 }
 0x351   : > { %v7844_v53 = vpop.eup %7843  ;;  %v3570_v38 = vmul.bf16 1065369472, %v7842_v13  ;;  %7857 = vrcp.bf16 %v3503_v18  ;;  %v3268_v56 = vsub.bf16 0, %v3204_v46  ;;  %v10315_v46 = vpack.c.bf16 %v10313_v29, %v10314_v58 }
 0x352   : > { %v3580_v25 = vmul.bf16 1065369472, %v7844_v53  ;;  %v7846_v4 = vpop.eup %7845  ;;  %7859 = vrcp.bf16 %v3508_v47  ;;  %v3267_v11 = vsub.bf16 0, %v3203_v20  ;;  %v3207_v53 = vadd.bf16 %v9170_v3, %v10309_v0 }
 0x353   : > { %v7848_v30 = vpop.eup %7847  ;;  %v3507_v27 = vadd.bf16 1065369472, %v7846_v4  ;;  %7861 = vpow.bf16 %v3384_v37  ;;  %v3411_v41 = vmul.bf16 1069105081, %v3268_v56 }
 0x354   : > { %v7850_v43 = vpop.eup %7849  ;;  %v3512_v6 = vadd.bf16 1065369472, %v7848_v30  ;;  %7863 = vpow.bf16 %v3399_v50  ;;  %v3271_v15 = vsub.bf16 0, %v3207_v53 }
 0x355   : > { %v7852_v24 = vpop.eup %7851  ;;  %v3578_v28 = vmul.bf16 1065369472, %v7850_v43  ;;  %7865 = vrcp.bf16 %v3507_v27 }
 0x356   : > { %v3588_v12 = vmul.bf16 1065369472, %v7852_v24  ;;  %v7854_v54 = vpop.eup %7853  ;;  %7867 = vrcp.bf16 %v3512_v6  ;;  %v3420_v32 = vmul.bf16 1069105081, %v3271_v15  ;;  %v3211_v24 = vadd.bf16 %v9170_v3, %v10315_v46  ;;  %v10328_v46 = vld [vmem:[#allocation34_spill] sm:$0xff] }
 0x357   : > { %4681 = vmatmul.mubr.bf16.gmra.mrb[132].mxu0 %v3562_v23  ;;  %5067 = vmatmul.mubr.bf16.gmra.mrb[132].mxu1 %v3562_v23  ;;  %v7856_v34 = vpop.eup %7855  ;;  %v10305_v23 = vld [vmem:[#allocation21_spill] sm:$0xff]  ;;  %v3511_v48 = vadd.bf16 1065369472, %v7854_v54  ;;  %7869 = vpow.bf16 %v3396_v44 }
 0x358   : > { %4690 = vmatprep.mubr.bf16.mxu0 %v3572_v40  ;;  %5076 = vmatprep.mubr.bf16.mxu1 %v3572_v40  ;;  %v10306_v35 = vpack.c.bf16 %v9086_v2, %v10305_v23  ;;  %v3516_v26 = vadd.bf16 1065369472, %v7856_v34  ;;  %7871 = vpow.bf16 %v3411_v41  ;;  %v3408_v2 = vmul.bf16 1069105081, %v3267_v11 }
 0x359   : > { %7873 = vrcp.bf16 %v3511_v48  ;;  %v3275_v57 = vsub.bf16 0, %v3211_v24  ;;  %v10329_v24 = vld [vmem:[#allocation32_spill] sm:$0xff] }
 0x35a   : > { %v3208_v40 = vadd.bf16 %v9151_v60, %v10306_v35  ;;  %7875 = vrcp.bf16 %v3516_v26  ;;  %v10319_v35 = vld [vmem:[#allocation29_spill] sm:$0xff] }
 0x35b   : > { %7877 = vpow.bf16 %v3408_v2  ;;  %v3432_v23 = vmul.bf16 1069105081, %v3275_v57 }
 0x35c   : > { %v7858_v14 = vpop.eup %7857  ;;  %v3272_v19 = vsub.bf16 0, %v3208_v40  ;;  %v10320_v40 = vld [vmem:[#allocation27_spill] sm:$0xff] }
 0x35d   : > { %v7860_v22 = vpop.eup %7859  ;;  %v3586_v45 = vmul.bf16 1065369472, %v7858_v14 }
 0x35e   : > { %v3596_v13 = vmul.bf16 1065369472, %v7860_v22  ;;  %v7862_v5 = vpop.eup %7861  ;;  %v3423_v47 = vmul.bf16 1069105081, %v3272_v19  ;;  %v10321_v22 = vpack.c.bf16 %v10319_v35, %v10320_v40  ;;  %v3291_v40 = vsub.bf16 0, %v3227_v36 }
 0x35f   : > { %4691 = vmatmul.mubr.bf16.gmra.mrb[136].mxu0 %v3570_v38  ;;  %5077 = vmatmul.mubr.bf16.gmra.mrb[136].mxu1 %v3570_v38  ;;  %v7864_v51 = vpop.eup %7863  ;;  %v10311_v38 = vld [vmem:[#allocation11_spill] sm:$0xff]  ;;  %v3515_v30 = vadd.bf16 1065369472, %v7862_v5 }
 0x360   : > { %4700 = vmatprep.mubr.bf16.mxu0 %v3580_v25  ;;  %5086 = vmatprep.mubr.bf16.mxu1 %v3580_v25  ;;  %v7866_v18 = vpop.eup %7865  ;;  %v10312_v59 = vpack.c.bf16 %v10310_v9, %v10311_v38  ;;  %v3520_v37 = vadd.bf16 1065369472, %v7864_v51  ;;  %7879 = vpow.bf16 %v3423_v47  ;;  %v3215_v48 = vadd.bf16 %v9170_v3, %v10321_v22 }
 0x361   : > { %v7868_v4 = vpop.eup %7867  ;;  %v3594_v33 = vmul.bf16 1065369472, %v7866_v18  ;;  %7881 = vrcp.bf16 %v3515_v30  ;;  %v3480_v21 = vmul.bf16 1069105081, %v3291_v40 }
 0x362   : > { %v3212_v25 = vadd.bf16 %v9151_v60, %v10312_v59  ;;  %v3604_v39 = vmul.bf16 1065369472, %v7868_v4  ;;  %v7870_v43 = vpop.eup %7869  ;;  %7883 = vrcp.bf16 %v3520_v37  ;;  %v3279_v2 = vsub.bf16 0, %v3215_v48  ;;  %v10326_v4 = vld [vmem:[#allocation33_spill] sm:$0xff] }
 0x363   : > { %v7872_v50 = vpop.eup %7871  ;;  %v3519_v34 = vadd.bf16 1065369472, %v7870_v43  ;;  %7885 = vpow.bf16 %v3420_v32 }
 0x364   : > { %v3276_v10 = vsub.bf16 0, %v3212_v25  ;;  %v7874_v27 = vpop.eup %7873  ;;  %v3524_v44 = vadd.bf16 1065369472, %v7872_v50  ;;  %v10325_v25 = vld [vmem:[#allocation35_spill] sm:$0xff] }
 0x365   : > { %v7876_v54 = vpop.eup %7875  ;;  %v3602_v49 = vmul.bf16 1065369472, %v7874_v27  ;;  %v10327_v30 = vpack.c.bf16 %v10325_v25, %v10326_v4  ;;  %v10330_v27 = vpack.c.bf16 %v10328_v46, %v10329_v24 }
 0x366   : > { %v3435_v6 = vmul.bf16 1069105081, %v3276_v10  ;;  %v3612_v20 = vmul.bf16 1065369472, %v7876_v54  ;;  %v7878_v14 = vpop.eup %7877 }
 0x367   : > { %4701 = vmatmul.mubr.bf16.gmra.mrb[140].mxu0 %v3578_v28  ;;  %5087 = vmatmul.mubr.bf16.gmra.mrb[140].mxu1 %v3578_v28  ;;  %v10317_v28 = vld [vmem:[#allocation28_spill] sm:$0xff]  ;;  %v3523_v5 = vadd.bf16 1065369472, %v7878_v14  ;;  %v3224_v37 = vadd.bf16 %v9151_v60, %v10327_v30 }
 0x368   : > { %4710 = vmatprep.mubr.bf16.mxu0 %v3588_v12  ;;  %5096 = vmatprep.mubr.bf16.mxu1 %v3588_v12  ;;  %v10318_v56 = vpack.c.bf16 %v10316_v55, %v10317_v28  ;;  %7887 = vpow.bf16 %v3435_v6  ;;  %v3223_v6 = vadd.bf16 %v9170_v3, %v10330_v27 }
 0x369   : > { %7889 = vrcp.bf16 %v3519_v34  ;;  %v3288_v50 = vsub.bf16 0, %v3224_v37 }
 0x36a   : > { %v3216_v12 = vadd.bf16 %v9151_v60, %v10318_v56  ;;  %7891 = vrcp.bf16 %v3524_v44  ;;  %v3228_v56 = vadd.bf16 %v9151_v60, %v3111_v63  ;;  %v3287_v44 = vsub.bf16 0, %v3223_v6 }
 0x36b   : > { %v7880_v41 = vpop.eup %7879  ;;  %7893 = vpow.bf16 %v3432_v23  ;;  %v3471_v28 = vmul.bf16 1069105081, %v3288_v50 }
 0x36c   : > { %v3280_v8 = vsub.bf16 0, %v3216_v12  ;;  %v7882_v26 = vpop.eup %7881  ;;  %v3528_v51 = vadd.bf16 1065369472, %v7880_v41  ;;  %v3468_v7 = vmul.bf16 1069105081, %v3287_v44 }
 0x36d   : > { %v3610_v31 = vmul.bf16 1065369472, %v7882_v26 }
 0x36e   : > { %v3447_v11 = vmul.bf16 1069105081, %v3280_v8 }
 0x36f   : > { %4711 = vmatmul.mubr.bf16.gmra.mrb[144].mxu0 %v3586_v45  ;;  %5097 = vmatmul.mubr.bf16.gmra.mrb[144].mxu1 %v3586_v45  ;;  %v10322_v45 = vpack.c.bf16 %v9128_v16, %v9121_v1  ;;  %v3444_v1 = vmul.bf16 1069105081, %v3279_v2  ;;  %v10323_v16 = vld [vmem:[#allocation31_spill] sm:$0xff] }
 0x370   : > { %4720 = vmatprep.mubr.bf16.mxu0 %v3596_v13  ;;  %5106 = vmatprep.mubr.bf16.mxu1 %v3596_v13  ;;  %v7884_v13 = vpop.eup %7883  ;;  %7895 = vpow.bf16 %v3447_v11  ;;  %v10324_v47 = vpack.c.bf16 %v9123_v52, %v10323_v16 }
 0x371   : > { %v3220_v19 = vadd.bf16 %v9151_v60, %v10322_v45  ;;  %v3620_v0 = vmul.bf16 1065369472, %v7884_v13  ;;  %7897 = vrcp.bf16 %v3523_v5  ;;  %v7886_v53 = vpop.eup %7885 }
 0x372   : > { %7899 = vrcp.bf16 %v3528_v51  ;;  %v3219_v9 = vadd.bf16 %v9170_v3, %v10324_v47 }
 0x373   : > { %v3284_v62 = vsub.bf16 0, %v3220_v19  ;;  %v7888_v18 = vpop.eup %7887  ;;  %7901 = vpow.bf16 %v3444_v1 }
 0x374   : > { %v7890_v38 = vpop.eup %7889  ;;  %v3532_v10 = vadd.bf16 1065369472, %v7888_v18 }
 0x375   : > { %v3459_v59 = vmul.bf16 1069105081, %v3284_v62  ;;  %v7892_v15 = vpop.eup %7891  ;;  %v3618_v43 = vmul.bf16 1065369472, %v7890_v38 }
 0x376   : > { %v3628_v32 = vmul.bf16 1065369472, %v7892_v15  ;;  %v7894_v52 = vpop.eup %7893 }
 0x377   : > { %4721 = vmatmul.mubr.bf16.gmra.mrb[148].mxu0 %v3594_v33  ;;  %5107 = vmatmul.mubr.bf16.gmra.mrb[148].mxu1 %v3594_v33  ;;  %v3527_v33 = vadd.bf16 1065369472, %v7886_v53  ;;  %7903 = vpow.bf16 %v3459_v59  ;;  %v3531_v54 = vadd.bf16 1065369472, %v7894_v52 }
 0x378   : > { %4730 = vmatprep.mubr.bf16.mxu0 %v3604_v39  ;;  %5116 = vmatprep.mubr.bf16.mxu1 %v3604_v39  ;;  %v3283_v39 = vsub.bf16 0, %v3219_v9 }
 0x379   : > { %7905 = vrcp.bf16 %v3527_v33 }
 0x37a   : > { %7907 = vrcp.bf16 %v3532_v10  ;;  %v3456_v58 = vmul.bf16 1069105081, %v3283_v39  ;;  %v6742_v10 = vld.sshfl [vmem:[%s10133_s6] sm:$0x33 pattern:$0x75316420] }
 0x37b   : > { %v7896_v29 = vpop.eup %7895  ;;  %v5290_v39 = vcombine.high %v6742_v10, %v6742_v10 }
 0x37c   : > { %v7898_v55 = vpop.eup %7897  ;;  %v3536_v34 = vadd.bf16 1065369472, %v7896_v29  ;;  %7909 = vpow.bf16 %v3456_v58 }
 0x37d   : > { %v7900_v12 = vpop.eup %7899  ;;  %v3626_v57 = vmul.bf16 1065369472, %v7898_v55  ;;  %7911 = vpow.bf16 %v3471_v28 }
 0x37e   : > { %v3636_v8 = vmul.bf16 1065369472, %v7900_v12  ;;  %7913 = vrcp.bf16 %v3531_v54 }
 0x37f   : > { %4731 = vmatmul.mubr.bf16.gmra.mrb[152].mxu0 %v3602_v49  ;;  %5117 = vmatmul.mubr.bf16.gmra.mrb[152].mxu1 %v3602_v49  ;;  %v3292_v49 = vsub.bf16 0, %v3228_v56  ;;  %7915 = vrcp.bf16 %v3536_v34 }
 0x380   : > { %4740 = vmatprep.mubr.bf16.mxu0 %v3612_v20  ;;  %5126 = vmatprep.mubr.bf16.mxu1 %v3612_v20  ;;  %v7902_v20 = vpop.eup %7901  ;;  %7917 = vpow.bf16 %v3468_v7 }
 0x381   : > { %v3483_v63 = vmul.bf16 1069105081, %v3292_v49  ;;  %v3535_v23 = vadd.bf16 1065369472, %v7902_v20 }
 0x382   : > { %v7904_v14 = vpop.eup %7903 }
 0x383   : > { %v3540_v35 = vadd.bf16 1065369472, %v7904_v14  ;;  %7919 = vpow.bf16 %v3483_v63 }
 0x384   : > { %v7906_v60 = vpop.eup %7905  ;;  %7921 = vrcp.bf16 %v3535_v23 }
 0x385   : > { %v7908_v41 = vpop.eup %7907  ;;  %v3634_v22 = vmul.bf16 1065369472, %v7906_v60  ;;  %7923 = vrcp.bf16 %v3540_v35 }
 0x386   : > { %v3644_v48 = vmul.bf16 1065369472, %v7908_v41  ;;  %7925 = vpow.bf16 %v3480_v21 }
 0x387   : > { %4741 = vmatmul.mubr.bf16.gmra.mrb[156].mxu0 %v3610_v31  ;;  %5127 = vmatmul.mubr.bf16.gmra.mrb[156].mxu1 %v3610_v31  ;;  %v7910_v26 = vpop.eup %7909 }
 0x388   : > { %4750 = vmatprep.mubr.bf16.mxu0 %v3620_v0  ;;  %5136 = vmatprep.mubr.bf16.mxu1 %v3620_v0  ;;  %v7912_v61 = vpop.eup %7911  ;;  %v3539_v11 = vadd.bf16 1065369472, %v7910_v26 }
 0x389   : > { %v7914_v42 = vpop.eup %7913  ;;  %v3544_v45 = vadd.bf16 1065369472, %v7912_v61 }
 0x38a   : > { %v7916_v3 = vpop.eup %7915  ;;  %v3642_v19 = vmul.bf16 1065369472, %v7914_v42  ;;  %7927 = vrcp.bf16 %v3539_v11 }
 0x38b   : > { %v3652_v13 = vmul.bf16 1065369472, %v7916_v3  ;;  %v7918_v5 = vpop.eup %7917  ;;  %7929 = vrcp.bf16 %v3544_v45 }
 0x38c   : > { %v3543_v62 = vadd.bf16 1065369472, %v7918_v5 }
 0x38e   : > { %v7920_v51 = vpop.eup %7919  ;;  %7931 = vrcp.bf16 %v3543_v62 }
 0x38f   : > { %4751 = vmatmul.mubr.bf16.gmra.mrb[160].mxu0 %v3618_v43  ;;  %5137 = vmatmul.mubr.bf16.gmra.mrb[160].mxu1 %v3618_v43  ;;  %v7922_v2 = vpop.eup %7921  ;;  %v3548_v0 = vadd.bf16 1065369472, %v7920_v51  ;;  %v10331_v43 = vld [vmem:[#allocation10_spill] sm:$0xff] }
 0x390   : > { %4760 = vmatprep.mubr.bf16.mxu0 %v3628_v32  ;;  %5146 = vmatprep.mubr.bf16.mxu1 %v3628_v32  ;;  %v7924_v31 = vpop.eup %7923  ;;  %v3650_v53 = vmul.bf16 1065369472, %v7922_v2  ;;  %v5297_v50 = vrot.slane %v6742_v10, %v10331_v43  ;;  %v5304_v32 = vrot.slane %v5290_v39, %v10331_v43 }
 0x391   : > { %v3660_v18 = vmul.bf16 1065369472, %v7924_v31  ;;  %v7926_v1 = vpop.eup %7925  ;;  %7933 = vrcp.bf16 %v3548_v0 }
 0x392   : > { %v3547_v9 = vadd.bf16 1065369472, %v7926_v1  ;;  %v5305_v52 = vcombine.high %v5297_v50, %v5297_v50  ;;  %v5306_v29 = vcombine.high %v5304_v32, %v5304_v32  ;;  %v5308_v58 = vpack.i.b16 %v5297_v50, %v5297_v50 }
 0x393   : > { %v5315_v24 = vpack.i.b16 %v5304_v32, %v5304_v32 }
 0x394   : > { %7935 = vrcp.bf16 %v3547_v9  ;;  %v5322_v46 = vpack.i.b16 %v5305_v52, %v5305_v52  ;;  %v5329_v27 = vpack.i.b16 %v5306_v29, %v5306_v29  ;;  %v9305_v12 = vrot.slane %v5308_v58, %v10250_v17 }
 0x395   : > { %v7928_v16 = vpop.eup %7927 }
 0x396   : > { %v7930_v47 = vpop.eup %7929  ;;  %v3658_v38 = vmul.bf16 1065369472, %v7928_v16  ;;  %v9308_v54 = vrot.slane %v5322_v46, %v10250_v17  ;;  %v9314_v49 = vrot.slane %v5329_v27, %v10250_v17 }
 0x397   : > { %4761 = vmatmul.mubr.bf16.gmra.mrb[164].mxu0 %v3626_v57  ;;  %5147 = vmatmul.mubr.bf16.gmra.mrb[164].mxu1 %v3626_v57  ;;  %v3668_v59 = vmul.bf16 1065369472, %v7930_v47  ;;  %v9311_v57 = vrot.slane %v5315_v24, %v10250_v17 }
 0x398   : > { %4770 = vmatprep.mubr.bf16.mxu0 %v3636_v8  ;;  %5156 = vmatprep.mubr.bf16.mxu1 %v3636_v8 }
 0x399   : > { %v7932_v25 = vpop.eup %7931 }
 0x39a   : > { %v3666_v30 = vmul.bf16 1065369472, %v7932_v25 }
 0x39c   : > { %v7934_v4 = vpop.eup %7933 }
 0x39d   : > { %v3676_v37 = vmul.bf16 1065369472, %v7934_v4 }
 0x39f   : > { %4771 = vmatmul.mubr.bf16.gmra.mrb[168].mxu0 %v3634_v22  ;;  %5157 = vmatmul.mubr.bf16.gmra.mrb[168].mxu1 %v3634_v22  ;;  %v7936_v15 = vpop.eup %7935 }
 0x3a0   : > { %4780 = vmatprep.mubr.bf16.mxu0 %v3644_v48  ;;  %5166 = vmatprep.mubr.bf16.mxu1 %v3644_v48  ;;  %v3674_v33 = vmul.bf16 1065369472, %v7936_v15 }
 0x3a7   : > { %4781 = vmatmul.mubr.bf16.gmra.mrb[172].mxu0 %v3642_v19  ;;  %5167 = vmatmul.mubr.bf16.gmra.mrb[172].mxu1 %v3642_v19 }
 0x3a8   : > { %4790 = vmatprep.mubr.bf16.mxu0 %v3652_v13  ;;  %5176 = vmatprep.mubr.bf16.mxu1 %v3652_v13 }
 0x3af   : > { %4791 = vmatmul.mubr.bf16.gmra.mrb[176].mxu0 %v3650_v53  ;;  %5177 = vmatmul.mubr.bf16.gmra.mrb[176].mxu1 %v3650_v53 }
 0x3b0   : > { %4800 = vmatprep.mubr.bf16.mxu0 %v3660_v18  ;;  %5186 = vmatprep.mubr.bf16.mxu1 %v3660_v18 }
 0x3b7   : > { %4801 = vmatmul.mubr.bf16.gmra.mrb[180].mxu0 %v3658_v38  ;;  %5187 = vmatmul.mubr.bf16.gmra.mrb[180].mxu1 %v3658_v38 }
 0x3b8   : > { %4810 = vmatprep.mubr.bf16.mxu0 %v3668_v59  ;;  %5196 = vmatprep.mubr.bf16.mxu1 %v3668_v59 }
 0x3bf   : > { %4811 = vmatmul.mubr.bf16.gmra.mrb[184].mxu0 %v3666_v30  ;;  %5197 = vmatmul.mubr.bf16.gmra.mrb[184].mxu1 %v3666_v30 }
 0x3c0   : > { %4820 = vmatprep.mubr.bf16.mxu0 %v3676_v37  ;;  %5206 = vmatprep.mubr.bf16.mxu1 %v3676_v37 }
 0x3c7   : > { %4821 = vmatmul.mubr.bf16.gmra.mrb[188].mxu0 %v3674_v33  ;;  %5207 = vmatmul.mubr.bf16.gmra.mrb[188].mxu1 %v3674_v33 }
 0x422   : > { %v4672_v6 = vpop.f32.mrb[128].mxu0  ;;  %v5058_v55 = vpop.f32.mrb[128].mxu1 }
 0x423   : > { %v4674_v28 = vpop.f32.mrb[129].mxu0  ;;  %v5060_v56 = vpop.f32.mrb[129].mxu1 }
 0x424   : > { %v4676_v34 = vpop.f32.mrb[130].mxu0  ;;  %v5062_v44 = vpop.f32.mrb[130].mxu1 }
 0x425   : > { %v5218_v8 = vpack.c.bf16 %v4676_v34, %v4672_v6  ;;  %v5220_v20 = vpack.c.bf16 %v5062_v44, %v5058_v55  ;;  %v4678_v14 = vpop.f32.mrb[131].mxu0  ;;  %v5064_v7 = vpop.f32.mrb[131].mxu1 }
 0x426   : > { %v5219_v36 = vpack.c.bf16 %v4678_v14, %v4674_v28  ;;  %v5221_v60 = vpack.c.bf16 %v5064_v7, %v5060_v56  ;;  %v10332_v14 = vld [vmem:[#allocation9_spill] sm:$0xff] }
 0x427   : > { %v5335_v63 = vadd.bf16 %v9305_v12, %v5218_v8  ;;  %v5337_v41 = vadd.bf16 %v9308_v54, %v5220_v20  ;;  %v5847_v20 = vld [vmem:[%s10134_s7] sm:$0xf]  ;;  %v5983_v7 = vsub.s32 1, %v10332_v14 }
 0x428   : > { %v5336_v23 = vadd.bf16 %v9311_v57, %v5219_v36  ;;  %v5338_v35 = vadd.bf16 %v9314_v49, %v5221_v60 }
 0x429   : > { %v5399_v40 = vsub.bf16 0, %v5335_v63  ;;  %v5401_v22 = vsub.bf16 0, %v5337_v41 }
 0x42a   : > { %v5400_v48 = vsub.bf16 0, %v5336_v23  ;;  %v5402_v26 = vsub.bf16 0, %v5338_v35  ;;  %v4682_v61 = vpop.f32.mrb[132].mxu0  ;;  %v5068_v21 = vpop.f32.mrb[132].mxu1 }
 0x42b   : > { %v5464_v42 = vmul.bf16 1069105081, %v5399_v40  ;;  %v5470_v3 = vmul.bf16 1069105081, %v5401_v22  ;;  %v4684_v11 = vpop.f32.mrb[133].mxu0  ;;  %v5070_v45 = vpop.f32.mrb[133].mxu1 }
 0x42c   : > { %v5467_v19 = vmul.bf16 1069105081, %v5400_v48  ;;  %v5473_v13 = vmul.bf16 1069105081, %v5402_v26  ;;  %v4686_v5 = vpop.f32.mrb[134].mxu0  ;;  %v5072_v51 = vpop.f32.mrb[134].mxu1 }
 0x42d   : > { %7937 = vpow.bf16 %v5464_v42  ;;  %v5222_v2 = vpack.c.bf16 %v4686_v5, %v4682_v61  ;;  %v5224_v31 = vpack.c.bf16 %v5072_v51, %v5068_v21  ;;  %v4688_v62 = vpop.f32.mrb[135].mxu0  ;;  %v5074_v0 = vpop.f32.mrb[135].mxu1  ;;  %v5987_v61 = vsub.s32 2, %v10332_v14 }
 0x42e   : > { %7939 = vpow.bf16 %v5470_v3  ;;  %v5223_v53 = vpack.c.bf16 %v4688_v62, %v4684_v11  ;;  %v5225_v18 = vpack.c.bf16 %v5074_v0, %v5070_v45  ;;  %v5991_v3 = vsub.s32 3, %v10332_v14 }
 0x42f   : > { %7941 = vpow.bf16 %v5467_v19  ;;  %v5339_v1 = vadd.bf16 %v9305_v12, %v5222_v2  ;;  %v5341_v16 = vadd.bf16 %v9308_v54, %v5224_v31  ;;  %v9334_v51 = vrot.slane %v5847_v20, %v5983_v7 }
 0x430   : > { %7943 = vpow.bf16 %v5473_v13  ;;  %v5340_v47 = vadd.bf16 %v9311_v57, %v5223_v53  ;;  %v5342_v9 = vadd.bf16 %v9314_v49, %v5225_v18  ;;  %v9336_v0 = vrot.slane %v5847_v20, %v5987_v61 }
 0x431   : > { %v5403_v38 = vsub.bf16 0, %v5339_v1  ;;  %v5405_v59 = vsub.bf16 0, %v5341_v16 }
 0x432   : > { %v5404_v25 = vsub.bf16 0, %v5340_v47  ;;  %v5406_v4 = vsub.bf16 0, %v5342_v9  ;;  %v4692_v30 = vpop.f32.mrb[136].mxu0  ;;  %v5078_v37 = vpop.f32.mrb[136].mxu1  ;;  %v9338_v9 = vrot.slane %v5847_v20, %v5991_v3 }
 0x433   : > { %v5476_v15 = vmul.bf16 1069105081, %v5403_v38  ;;  %v5482_v33 = vmul.bf16 1069105081, %v5405_v59  ;;  %v4694_v10 = vpop.f32.mrb[137].mxu0  ;;  %v5080_v39 = vpop.f32.mrb[137].mxu1 }
 0x434   : > { %v5479_v43 = vmul.bf16 1069105081, %v5404_v25  ;;  %v5485_v50 = vmul.bf16 1069105081, %v5406_v4  ;;  %v4696_v32 = vpop.f32.mrb[138].mxu0  ;;  %v5082_v52 = vpop.f32.mrb[138].mxu1 }
 0x435   : > { %7945 = vpow.bf16 %v5476_v15  ;;  %v5226_v29 = vpack.c.bf16 %v4696_v32, %v4692_v30  ;;  %v5228_v58 = vpack.c.bf16 %v5082_v52, %v5078_v37  ;;  %v4698_v46 = vpop.f32.mrb[139].mxu0  ;;  %v5084_v24 = vpop.f32.mrb[139].mxu1 }
 0x436   : > { %7947 = vpow.bf16 %v5482_v33  ;;  %v5227_v27 = vpack.c.bf16 %v4698_v46, %v4694_v10  ;;  %v5229_v6 = vpack.c.bf16 %v5084_v24, %v5080_v39 }
 0x437   : > { %7949 = vpow.bf16 %v5479_v43  ;;  %v5343_v55 = vadd.bf16 %v9305_v12, %v5226_v29  ;;  %v5345_v28 = vadd.bf16 %v9308_v54, %v5228_v58 }
 0x438   : > { %v7938_v56 = vpop.eup %7937  ;;  %7951 = vpow.bf16 %v5485_v50  ;;  %v5344_v34 = vadd.bf16 %v9311_v57, %v5227_v27  ;;  %v5346_v44 = vadd.bf16 %v9314_v49, %v5229_v6  ;;  %v9345_v27 = vrot.slane %v5847_v20, %v10250_v17 }
 0x439   : > { %v7940_v8 = vpop.eup %7939  ;;  %v5655_v36 = vadd.bf16 1065369472, %v7938_v56  ;;  %v5407_v60 = vsub.bf16 0, %v5343_v55  ;;  %v5409_v63 = vsub.bf16 0, %v5345_v28 }
 0x43a   : > { %v7942_v41 = vpop.eup %7941  ;;  %v5657_v23 = vadd.bf16 1065369472, %v7940_v8  ;;  %v5408_v35 = vsub.bf16 0, %v5344_v34  ;;  %v5410_v40 = vsub.bf16 0, %v5346_v44  ;;  %v4702_v22 = vpop.f32.mrb[140].mxu0 }
 0x43b   : > { %v5088_v48 = vpop.f32.mrb[140].mxu1  ;;  %v7944_v26 = vpop.eup %7943  ;;  %7953 = vrcp.bf16 %v5655_v36  ;;  %v5656_v21 = vadd.bf16 1065369472, %v7942_v41  ;;  %v5488_v42 = vmul.bf16 1069105081, %v5407_v60 }
 0x43c   : > { %7955 = vrcp.bf16 %v5657_v23  ;;  %v5658_v11 = vadd.bf16 1065369472, %v7944_v26  ;;  %v5494_v45 = vmul.bf16 1069105081, %v5409_v63  ;;  %v5491_v19 = vmul.bf16 1069105081, %v5408_v35 }
 0x43d   : > { %7957 = vrcp.bf16 %v5656_v21  ;;  %v4704_v13 = vpop.f32.mrb[141].mxu0  ;;  %v5090_v5 = vpop.f32.mrb[141].mxu1  ;;  %v5497_v2 = vmul.bf16 1069105081, %v5410_v40 }
 0x43e   : > { %7959 = vrcp.bf16 %v5658_v11  ;;  %v4706_v31 = vpop.f32.mrb[142].mxu0  ;;  %v5092_v62 = vpop.f32.mrb[142].mxu1 }
 0x43f   : > { %7961 = vpow.bf16 %v5488_v42  ;;  %v5230_v53 = vpack.c.bf16 %v4706_v31, %v4702_v22  ;;  %v5232_v18 = vpack.c.bf16 %v5092_v62, %v5088_v48  ;;  %v4708_v1 = vpop.f32.mrb[143].mxu0  ;;  %v5094_v16 = vpop.f32.mrb[143].mxu1 }
 0x440   : > { %v7946_v47 = vpop.eup %7945  ;;  %7963 = vpow.bf16 %v5494_v45  ;;  %v5231_v38 = vpack.c.bf16 %v4708_v1, %v4704_v13  ;;  %v5233_v59 = vpack.c.bf16 %v5094_v16, %v5090_v5 }
 0x441   : > { %v7948_v25 = vpop.eup %7947  ;;  %v5659_v4 = vadd.bf16 1065369472, %v7946_v47  ;;  %7965 = vpow.bf16 %v5491_v19  ;;  %v5347_v30 = vadd.bf16 %v9305_v12, %v5230_v53  ;;  %v5349_v37 = vadd.bf16 %v9308_v54, %v5232_v18 }
 0x442   : > { %v7950_v15 = vpop.eup %7949  ;;  %v5661_v33 = vadd.bf16 1065369472, %v7948_v25  ;;  %7967 = vpow.bf16 %v5497_v2  ;;  %v5348_v10 = vadd.bf16 %v9311_v57, %v5231_v38  ;;  %v5350_v39 = vadd.bf16 %v9314_v49, %v5233_v59  ;;  %v4712_v43 = vpop.f32.mrb[144].mxu0 }
 0x443   : > { %v5098_v50 = vpop.f32.mrb[144].mxu1  ;;  %v7952_v32 = vpop.eup %7951  ;;  %v5660_v52 = vadd.bf16 1065369472, %v7950_v15  ;;  %v5411_v29 = vsub.bf16 0, %v5347_v30  ;;  %v5413_v58 = vsub.bf16 0, %v5349_v37  ;;  %7969 = vrcp.bf16 %v5659_v4 }
 0x444   : > { %v4714_v46 = vpop.f32.mrb[145].mxu0  ;;  %v5100_v24 = vpop.f32.mrb[145].mxu1  ;;  %v5662_v6 = vadd.bf16 1065369472, %v7952_v32  ;;  %v5412_v55 = vsub.bf16 0, %v5348_v10  ;;  %v5414_v28 = vsub.bf16 0, %v5350_v39  ;;  %7971 = vrcp.bf16 %v5661_v33 }
 0x445   : > { %v4716_v56 = vpop.f32.mrb[146].mxu0  ;;  %v5102_v34 = vpop.f32.mrb[146].mxu1  ;;  %v5500_v44 = vmul.bf16 1069105081, %v5411_v29  ;;  %v5506_v8 = vmul.bf16 1069105081, %v5413_v58  ;;  %7973 = vrcp.bf16 %v5660_v52 }
 0x446   : > { %v5234_v14 = vpack.c.bf16 %v4716_v56, %v4712_v43  ;;  %v4718_v7 = vpop.f32.mrb[147].mxu0  ;;  %v5104_v36 = vpop.f32.mrb[147].mxu1  ;;  %v5503_v63 = vmul.bf16 1069105081, %v5412_v55  ;;  %v5509_v41 = vmul.bf16 1069105081, %v5414_v28  ;;  %v5236_v23 = vpack.c.bf16 %v5102_v34, %v5098_v50 }
 0x447   : > { %v9347_v60 = vpop.eup %7953  ;;  %7975 = vpow.bf16 %v5500_v44  ;;  %v5235_v35 = vpack.c.bf16 %v4718_v7, %v4714_v46  ;;  %v5237_v40 = vpack.c.bf16 %v5104_v36, %v5100_v24 }
 0x448   : > { %v9349_v17 = vpop.eup %7955  ;;  %v5351_v20 = vadd.bf16 %v9305_v12, %v5234_v14  ;;  %7977 = vpow.bf16 %v5506_v8  ;;  %v5353_v48 = vadd.bf16 %v9308_v54, %v5236_v23  ;;  %v5720_v26 = vmul.bf16 1065369472, %v9347_v60 }
 0x449   : > { %v9352_v22 = vpop.eup %7957  ;;  %v5724_v61 = vmul.bf16 1065369472, %v9349_v17  ;;  %7979 = vpow.bf16 %v5503_v63  ;;  %v5352_v3 = vadd.bf16 %v9311_v57, %v5235_v35  ;;  %v5354_v11 = vadd.bf16 %v9314_v49, %v5237_v40 }
 0x44a   : > { %v9357_v21 = vpop.eup %7959  ;;  %v5415_v42 = vsub.bf16 0, %v5351_v20  ;;  %7981 = vpow.bf16 %v5509_v41  ;;  %v5417_v19 = vsub.bf16 0, %v5353_v48  ;;  %v4722_v13 = vpop.f32.mrb[148].mxu0  ;;  %v5722_v2 = vmul.bf16 1065369472, %v9352_v22 }
 0x44b   : > { %v7962_v45 = vpop.eup %7961  ;;  %v5108_v5 = vpop.f32.mrb[148].mxu1  ;;  %v5848_v31 = vunpack.c.l.bf16 %v5720_v26  ;;  %v5416_v1 = vsub.bf16 0, %v5352_v3  ;;  %v5418_v16 = vsub.bf16 0, %v5354_v11  ;;  %7983 = vrcp.bf16 %v5662_v6 }
 0x44c   : > { %v7964_v62 = vpop.eup %7963  ;;  %v5663_v53 = vadd.bf16 1065369472, %v7962_v45  ;;  %v5512_v18 = vmul.bf16 1069105081, %v5415_v42  ;;  %v5518_v59 = vmul.bf16 1069105081, %v5417_v19  ;;  %v5849_v30 = vunpack.c.l.bf16 %v5722_v2 }
 0x44d   : > { %v7966_v47 = vpop.eup %7965  ;;  %v5665_v38 = vadd.bf16 1065369472, %v7964_v62  ;;  %v4724_v25 = vpop.f32.mrb[149].mxu0  ;;  %v5515_v33 = vmul.bf16 1069105081, %v5416_v1  ;;  %v5850_v52 = vunpack.c.l.bf16 %v5724_v61  ;;  %v5997_v55 = vmul.f32 %v9345_v27, %v5848_v31 }
 0x44e   : > { %v5110_v4 = vpop.f32.mrb[149].mxu1  ;;  %v7968_v37 = vpop.eup %7967  ;;  %7985 = vrcp.bf16 %v5663_v53  ;;  %v5664_v15 = vadd.bf16 1065369472, %v7966_v47  ;;  %v5521_v10 = vmul.bf16 1069105081, %v5418_v16  ;;  %v5998_v44 = vmul.f32 %v9334_v51, %v5849_v30 }
 0x44f   : > { %7987 = vrcp.bf16 %v5665_v38  ;;  %v5666_v39 = vadd.bf16 1065369472, %v7968_v37  ;;  %v4726_v43 = vpop.f32.mrb[150].mxu0  ;;  %v5112_v50 = vpop.f32.mrb[150].mxu1  ;;  %v5726_v32 = vmul.bf16 1065369472, %v9357_v21  ;;  %v5999_v40 = vmul.f32 %v9336_v0, %v5850_v52 }
 0x450   : > { %v9369_v29 = vpop.eup %7969  ;;  %7989 = vrcp.bf16 %v5664_v15  ;;  %v5238_v58 = vpack.c.bf16 %v4726_v43, %v4722_v13  ;;  %v5240_v46 = vpack.c.bf16 %v5112_v50, %v5108_v5  ;;  %v4728_v24 = vpop.f32.mrb[151].mxu0 }
 0x451   : > { %v5114_v6 = vpop.f32.mrb[151].mxu1  ;;  %v9372_v28 = vpop.eup %7971  ;;  %7991 = vrcp.bf16 %v5666_v39  ;;  %v5239_v56 = vpack.c.bf16 %v4728_v24, %v4724_v25  ;;  %v5851_v36 = vunpack.c.l.bf16 %v5726_v32 }
 0x452   : > { %v5241_v34 = vpack.c.bf16 %v5114_v6, %v5110_v4  ;;  %v9375_v8 = vpop.eup %7973  ;;  %7993 = vpow.bf16 %v5512_v18  ;;  %v5355_v14 = vadd.bf16 %v9305_v12, %v5238_v58  ;;  %v5357_v7 = vadd.bf16 %v9308_v54, %v5240_v46  ;;  %v4732_v20 = vpop.f32.mrb[152].mxu0 }
 0x453   : > { %v7976_v63 = vpop.eup %7975  ;;  %7995 = vpow.bf16 %v5518_v59  ;;  %v5356_v41 = vadd.bf16 %v9311_v57, %v5239_v56  ;;  %v5118_v35 = vpop.f32.mrb[152].mxu1  ;;  %v6000_v38 = vmul.f32 %v9338_v9, %v5851_v36  ;;  %v5852_v46 = vunpack.c.h.bf16 %v5720_v26 }
 0x454   : > { %v5358_v23 = vadd.bf16 %v9314_v49, %v5241_v34  ;;  %v7978_v48 = vpop.eup %7977  ;;  %v5667_v42 = vadd.bf16 1065369472, %v7976_v63  ;;  %7997 = vpow.bf16 %v5515_v33  ;;  %v5419_v3 = vsub.bf16 0, %v5355_v14  ;;  %v4734_v45 = vpop.f32.mrb[153].mxu0 }
 0x455   : > { %v5421_v11 = vsub.bf16 0, %v5357_v7  ;;  %v5120_v19 = vpop.f32.mrb[153].mxu1  ;;  %v7980_v13 = vpop.eup %7979  ;;  %v5669_v5 = vadd.bf16 1065369472, %v7978_v48  ;;  %7999 = vpow.bf16 %v5521_v10  ;;  %v5420_v31 = vsub.bf16 0, %v5356_v41 }
 0x456   : > { %v5422_v62 = vsub.bf16 0, %v5358_v23  ;;  %v5122_v53 = vpop.f32.mrb[154].mxu1  ;;  %v4736_v18 = vpop.f32.mrb[154].mxu0  ;;  %8001 = vrcp.bf16 %v5667_v42  ;;  %v5668_v16 = vadd.bf16 1065369472, %v7980_v13  ;;  %v6125_v33 = vadd.f32 %v5998_v44, %v5997_v55 }
 0x457   : > { %v7982_v1 = vpop.eup %7981  ;;  %v5524_v47 = vmul.bf16 1069105081, %v5419_v3  ;;  %8003 = vrcp.bf16 %v5669_v5  ;;  %v5530_v25 = vmul.bf16 1069105081, %v5421_v11  ;;  %v5527_v4 = vmul.bf16 1069105081, %v5420_v31 }
 0x458   : > { %v5670_v59 = vadd.bf16 1065369472, %v7982_v1  ;;  %v9385_v30 = vpop.eup %7983  ;;  %v5533_v37 = vmul.bf16 1069105081, %v5422_v62  ;;  %v5244_v15 = vpack.c.bf16 %v5122_v53, %v5118_v35  ;;  %v5242_v10 = vpack.c.bf16 %v4736_v18, %v4732_v20  ;;  %v4738_v39 = vpop.f32.mrb[155].mxu0 }
 0x459   : > { %v5124_v43 = vpop.f32.mrb[155].mxu1  ;;  %v9387_v50 = vpop.eup %7985  ;;  %8005 = vrcp.bf16 %v5668_v16  ;;  %v5243_v52 = vpack.c.bf16 %v4738_v39, %v4734_v45  ;;  %v6126_v34 = vadd.f32 %v6125_v33, %v5999_v40  ;;  %v5853_v31 = vunpack.c.h.bf16 %v5722_v2 }
 0x45a   : > { %v5245_v58 = vpack.c.bf16 %v5124_v43, %v5120_v19  ;;  %v9391_v24 = vpop.eup %7987  ;;  %v5736_v6 = vmul.bf16 1065369472, %v9387_v50  ;;  %8007 = vpow.bf16 %v5524_v47  ;;  %v5361_v56 = vadd.bf16 %v9308_v54, %v5244_v15  ;;  %v9400_v36 = vpop.f32.mrb[156].mxu0 }
 0x45b   : > { %v9395_v55 = vpop.eup %7989  ;;  %8009 = vpow.bf16 %v5530_v25  ;;  %v5359_v44 = vadd.bf16 %v9305_v12, %v5242_v10  ;;  %v5360_v14 = vadd.bf16 %v9311_v57, %v5243_v52  ;;  %v5128_v60 = vpop.f32.mrb[156].mxu1  ;;  %v6127_v23 = vadd.f32 %v6126_v34, %v6000_v38 }
 0x45c   : > { %v5362_v7 = vadd.bf16 %v9314_v49, %v5245_v58  ;;  %v9402_v26 = vpop.eup %7991  ;;  %v5738_v63 = vmul.bf16 1065369472, %v9395_v55  ;;  %8011 = vpow.bf16 %v5527_v4  ;;  %v5425_v41 = vsub.bf16 0, %v5361_v56  ;;  %v9405_v20 = vpop.f32.mrb[157].mxu0 }
 0x45d   : > { %v9407_v35 = vpop.f32.mrb[157].mxu1  ;;  %v7994_v40 = vpop.eup %7993  ;;  %8013 = vpow.bf16 %v5533_v37  ;;  %v5423_v48 = vsub.bf16 0, %v5359_v44  ;;  %v5424_v42 = vsub.bf16 0, %v5360_v14  ;;  %6128 = vadd.xlane.f32.xlu0 %v6127_v23  ;;  %v5854_v62 = vunpack.c.h.bf16 %v5724_v61 }
 0x45e   : > { %v5426_v3 = vsub.bf16 0, %v5362_v7  ;;  %v5132_v11 = vpop.f32.mrb[158].mxu1  ;;  %v9409_v45 = vpop.f32.mrb[158].mxu0  ;;  %v5671_v13 = vadd.bf16 1065369472, %v7994_v40  ;;  %8015 = vrcp.bf16 %v5670_v59  ;;  %v5855_v37 = vunpack.c.h.bf16 %v5726_v32 }
 0x45f   : > { %v7996_v19 = vpop.eup %7995  ;;  %v5542_v5 = vmul.bf16 1069105081, %v5425_v41  ;;  %v9415_v53 = vpop.f32.mrb[159].mxu0  ;;  %v5536_v47 = vmul.bf16 1069105081, %v5423_v48  ;;  %v6001_v22 = vmul.f32 %v9345_v27, %v5852_v46  ;;  %v6002_v15 = vmul.f32 %v9334_v51, %v5853_v31 }
 0x460   : > { %v9417_v18 = vpop.f32.mrb[159].mxu1  ;;  %v7998_v1 = vpop.eup %7997  ;;  %v5673_v16 = vadd.bf16 1065369472, %v7996_v19  ;;  %v5539_v38 = vmul.bf16 1069105081, %v5424_v42  ;;  %8017 = vrcp.bf16 %v5671_v13  ;;  %v6003_v10 = vmul.f32 %v9336_v0, %v5854_v62 }
 0x461   : > { %v8000_v25 = vpop.eup %7999  ;;  %v5672_v4 = vadd.bf16 1065369472, %v7998_v1  ;;  %v5545_v61 = vmul.bf16 1069105081, %v5426_v3  ;;  %v5248_v39 = vpack.c.bf16 %v5132_v11, %v5128_v60  ;;  %v6130_v21 = vadd.f32 %v6002_v15, %v6001_v22 }
 0x462   : > { %v9422_v2 = vpop.eup %8001  ;;  %8019 = vrcp.bf16 %v5673_v16  ;;  %v5674_v17 = vadd.bf16 1065369472, %v8000_v25  ;;  %v5728_v32 = vmul.bf16 1065369472, %v9369_v29  ;;  %v5730_v43 = vmul.bf16 1065369472, %v9375_v8 }
 0x463   : > { %v9425_v33 = vpop.eup %8003  ;;  %8021 = vrcp.bf16 %v5672_v4  ;;  %v9431_v52 = vpop.f32.mrb[160].mxu0  ;;  %v6004_v56 = vmul.f32 %v9338_v9, %v5855_v37  ;;  %v5365_v34 = vadd.bf16 %v9308_v54, %v5248_v39  ;;  %v5732_v44 = vmul.bf16 1065369472, %v9372_v28 }
 0x464   : > { %8023 = vrcp.bf16 %v5674_v17  ;;  %v9433_v58 = vpop.f32.mrb[160].mxu1  ;;  %v9435_v46 = vpop.eup %8005  ;;  %v6131_v8 = vadd.f32 %v6130_v21, %v6003_v10  ;;  %v5734_v60 = vmul.bf16 1065369472, %v9385_v30  ;;  %v5856_v41 = vunpack.c.l.bf16 %v5728_v32 }
 0x465   : > { %8025 = vpow.bf16 %v5542_v5  ;;  %v9440_v14 = vpop.f32.mrb[161].mxu0  ;;  %v9442_v7 = vpop.f32.mrb[161].mxu1  ;;  %v5429_v3 = vsub.bf16 0, %v5365_v34  ;;  %v5857_v11 = vunpack.c.l.bf16 %v5730_v43  ;;  %v5858_v62 = vunpack.c.l.bf16 %v5732_v44 }
 0x466   : > { %v8008_v29 = vpop.eup %8007  ;;  %8027 = vpow.bf16 %v5536_v47  ;;  %v9445_v23 = vpop.f32.mrb[162].mxu1  ;;  %v6132_v31 = vadd.f32 %v6131_v8, %v6004_v56  ;;  %v5859_v25 = vunpack.c.l.bf16 %v5734_v60  ;;  %v6005_v4 = vmul.f32 %v9345_v27, %v5856_v41 }
 0x467   : > { %v9447_v40 = vpop.f32.mrb[162].mxu0  ;;  %v8010_v48 = vpop.eup %8009  ;;  %v5675_v42 = vadd.bf16 1065369472, %v8008_v29  ;;  %8029 = vpow.bf16 %v5539_v38  ;;  %v5554_v47 = vmul.bf16 1069105081, %v5429_v3  ;;  %v6006_v37 = vmul.f32 %v9334_v51, %v5857_v11 }
 0x468   : > { %v9449_v28 = vpop.f32.mrb[163].mxu0  ;;  %v9451_v19 = vpop.f32.mrb[163].mxu1  ;;  %v5677_v5 = vadd.bf16 1065369472, %v8010_v48  ;;  %8031 = vpow.bf16 %v5545_v61  ;;  %6133 = vadd.xlane.f32.xlu0 %v6132_v31  ;;  %v6007_v61 = vmul.f32 %v9336_v0, %v5858_v62  ;;  %v5246_v15 = vpack.c.bf16 %v9409_v45, %v9400_v36 }
 0x469   : > { %v8012_v13 = vpop.eup %8011  ;;  %8033 = vrcp.bf16 %v5675_v42  ;;  %v6008_v39 = vmul.f32 %v9338_v9, %v5859_v25  ;;  %v6135_v21 = vadd.f32 %v6006_v37, %v6005_v4  ;;  %v5247_v56 = vpack.c.bf16 %v9415_v53, %v9405_v20 }
 0x46a   : > { %v8014_v1 = vpop.eup %8013  ;;  %v5676_v16 = vadd.bf16 1065369472, %v8012_v13  ;;  %8035 = vrcp.bf16 %v5677_v5  ;;  %v5249_v34 = vpack.c.bf16 %v9417_v18, %v9407_v35  ;;  %v9470_v29 = vpop.f32.mrb[164].mxu0  ;;  %v5363_v36 = vadd.bf16 %v9305_v12, %v5246_v15 }
 0x46b   : > { %v9458_v22 = vpop.eup %8015  ;;  %v5678_v17 = vadd.bf16 1065369472, %v8014_v1  ;;  %v9472_v8 = vpop.f32.mrb[164].mxu1  ;;  %v5860_v45 = vunpack.c.h.bf16 %v5728_v32  ;;  %v6136_v53 = vadd.f32 %v6135_v21, %v6007_v61  ;;  %v5364_v35 = vadd.bf16 %v9311_v57, %v5247_v56 }
 0x46c   : > { %8037 = vrcp.bf16 %v5676_v16  ;;  %v9463_v10 = vpop.eup %8017  ;;  %v9478_v42 = vpop.f32.mrb[165].mxu0  ;;  %v5366_v18 = vadd.bf16 %v9314_v49, %v5249_v34  ;;  %v5861_v11 = vunpack.c.h.bf16 %v5730_v43  ;;  %v5427_v62 = vsub.bf16 0, %v5363_v36 }
 0x46d   : > { %v9474_v41 = vpop.eup %8019  ;;  %8039 = vpow.bf16 %v5554_v47  ;;  %v9480_v3 = vpop.f32.mrb[165].mxu1  ;;  %v5862_v1 = vunpack.c.h.bf16 %v5732_v44  ;;  %v6137_v4 = vadd.f32 %v6136_v53, %v6008_v39  ;;  %v5428_v37 = vsub.bf16 0, %v5364_v35 }
 0x46e   : > { %v9482_v20 = vpop.eup %8021  ;;  %v9486_v13 = vpop.f32.mrb[166].mxu1  ;;  %8041 = vrcp.bf16 %v5678_v17  ;;  %v5430_v61 = vsub.bf16 0, %v5366_v18  ;;  %v6009_v43 = vmul.f32 %v9345_v27, %v5860_v45  ;;  %v5548_v56 = vmul.bf16 1069105081, %v5427_v62 }
 0x46f   : > { %v9488_v5 = vpop.f32.mrb[166].mxu0  ;;  %v9490_v31 = vpop.eup %8023  ;;  %v5863_v34 = vunpack.c.h.bf16 %v5734_v60  ;;  %v6010_v17 = vmul.f32 %v9334_v51, %v5861_v11  ;;  %6138 = vadd.xlane.f32.xlu1 %v6137_v4  ;;  %v5551_v32 = vmul.bf16 1069105081, %v5428_v37  ;;  %v6011_v38 = vmul.f32 %v9336_v0, %v5862_v1 }
 0x470   : > { %v9493_v16 = vpop.f32.mrb[167].mxu0  ;;  %v9495_v47 = vpop.f32.mrb[167].mxu1  ;;  %v5557_v48 = vmul.bf16 1069105081, %v5430_v61  ;;  %v5252_v45 = vpack.c.bf16 %v9445_v23, %v9433_v58  ;;  %v5740_v60 = vmul.bf16 1065369472, %v9391_v24  ;;  %v5868_v24 = vunpack.c.h.bf16 %v5736_v6 }
 0x471   : > { %v8026_v25 = vpop.eup %8025  ;;  %v6140_v35 = vadd.f32 %v6010_v17, %v6009_v43  ;;  %v5742_v11 = vmul.bf16 1065369472, %v9402_v26  ;;  %v6012_v1 = vmul.f32 %v9338_v9, %v5863_v34  ;;  %v5869_v26 = vunpack.c.h.bf16 %v5738_v63 }
 0x472   : > { %v8028_v15 = vpop.eup %8027  ;;  %v5681_v21 = vadd.bf16 1065369472, %v8026_v25  ;;  %v5369_v4 = vadd.bf16 %v9308_v54, %v5252_v45  ;;  %v9512_v37 = vpop.f32.mrb[168].mxu0  ;;  %v5870_v23 = vunpack.c.h.bf16 %v5740_v60 }
 0x473   : > { %v8030_v36 = vpop.eup %8029  ;;  %v5679_v44 = vadd.bf16 1065369472, %v8028_v15  ;;  %v6141_v25 = vadd.f32 %v6140_v35, %v6011_v38  ;;  %v9514_v61 = vpop.f32.mrb[168].mxu1  ;;  %v6018_v35 = vmul.f32 %v9334_v51, %v5869_v26  ;;  %v5865_v26 = vunpack.c.l.bf16 %v5738_v63 }
 0x474   : > { %v8032_v39 = vpop.eup %8031  ;;  %8043 = vrcp.bf16 %v5681_v21  ;;  %v5680_v53 = vadd.bf16 1065369472, %v8030_v36  ;;  %v9522_v43 = vpop.f32.mrb[169].mxu0  ;;  %v5433_v34 = vsub.bf16 0, %v5369_v4  ;;  %v6019_v4 = vmul.f32 %v9336_v0, %v5870_v23 }
 0x475   : > { %v9504_v18 = vpop.eup %8033  ;;  %8045 = vrcp.bf16 %v5679_v44  ;;  %v5682_v30 = vadd.bf16 1065369472, %v8032_v39  ;;  %v9524_v15 = vpop.f32.mrb[169].mxu1  ;;  %v6142_v21 = vadd.f32 %v6141_v25, %v6012_v1  ;;  %v5871_v39 = vunpack.c.h.bf16 %v5742_v11 }
 0x476   : > { %10333 = vst [vmem:[#allocation12_spill] sm:$0xff] %v9504_v18  ;;  %v9508_v62 = vpop.eup %8035  ;;  %8047 = vrcp.bf16 %v5680_v53  ;;  %v9527_v17 = vpop.f32.mrb[170].mxu1  ;;  %v6017_v53 = vmul.f32 %v9345_v27, %v5868_v24  ;;  %v5566_v1 = vmul.bf16 1069105081, %v5433_v34  ;;  %v5864_v24 = vunpack.c.l.bf16 %v5736_v6 }
 0x477   : > { %10334 = vst [vmem:[#allocation13_spill] sm:$0xff] %v9508_v62  ;;  %v9516_v58 = vpop.eup %8037  ;;  %8049 = vrcp.bf16 %v5682_v30  ;;  %v9529_v36 = vpop.f32.mrb[170].mxu0  ;;  %6143 = vadd.xlane.f32.xlu1 %v6142_v21  ;;  %v6020_v59 = vmul.f32 %v9338_v9, %v5871_v39  ;;  %v5866_v18 = vunpack.c.l.bf16 %v5740_v60  ;;  %v5867_v62 = vunpack.c.l.bf16 %v5742_v11 }
 0x478   : > { %8051 = vpow.bf16 %v5548_v56  ;;  %v8040_v44 = vpop.eup %8039  ;;  %v9533_v45 = vpop.f32.mrb[171].mxu0  ;;  %v6013_v34 = vmul.f32 %v9345_v27, %v5864_v24  ;;  %v6014_v23 = vmul.f32 %v9334_v51, %v5865_v26  ;;  %v5251_v63 = vpack.c.bf16 %v9449_v28, %v9440_v14 }
 0x479   : > { %8053 = vpow.bf16 %v5551_v32  ;;  %v9535_v30 = vpop.f32.mrb[171].mxu1  ;;  %v5685_v56 = vadd.bf16 1065369472, %v8040_v44  ;;  %v9538_v25 = vpop.eup %8041  ;;  %v6150_v32 = vadd.f32 %v6018_v35, %v6017_v53  ;;  %v6015_v6 = vmul.f32 %v9336_v0, %v5866_v18 }
 0x47a   : > { %8055 = vpow.bf16 %v5557_v48  ;;  %v5250_v48 = vpack.c.bf16 %v9447_v40, %v9431_v52  ;;  %v9550_v44 = vpop.f32.mrb[172].mxu0  ;;  %v9552_v50 = vpop.f32.mrb[172].mxu1  ;;  %v6145_v39 = vadd.f32 %v6014_v23, %v6013_v34  ;;  %v5253_v53 = vpack.c.bf16 %v9451_v19, %v9442_v7 }
 0x47b   : > { %8057 = vpow.bf16 %v5566_v1  ;;  %v6151_v21 = vadd.f32 %v6150_v32, %v6019_v4  ;;  %v9558_v60 = vpop.f32.mrb[173].mxu0  ;;  %v9560_v52 = vpop.f32.mrb[173].mxu1  ;;  %v5256_v35 = vpack.c.bf16 %v9486_v13, %v9472_v8  ;;  %v6016_v14 = vmul.f32 %v9338_v9, %v5867_v62 }
 0x47c   : > { %8059 = vrcp.bf16 %v5685_v56  ;;  %v5367_v55 = vadd.bf16 %v9305_v12, %v5250_v48  ;;  %v9568_v18 = vpop.f32.mrb[174].mxu1  ;;  %v9570_v56 = vpop.f32.mrb[174].mxu0  ;;  %v5368_v4 = vadd.bf16 %v9311_v57, %v5251_v63  ;;  %v6146_v7 = vadd.f32 %v6145_v39, %v6015_v6 }
 0x47d   : > { %v6152_v11 = vadd.f32 %v6151_v21, %v6020_v59  ;;  %v5748_v59 = vmul.bf16 1065369472, %v9425_v33  ;;  %v9577_v32 = vpop.f32.mrb[175].mxu0  ;;  %v5370_v19 = vadd.bf16 %v9314_v49, %v5253_v53  ;;  %v5373_v8 = vadd.bf16 %v9308_v54, %v5256_v35  ;;  %v9584_v26 = vpop.f32.mrb[175].mxu1 }
 0x47e   : > { %v5431_v28 = vsub.bf16 0, %v5367_v55  ;;  %v5750_v13 = vmul.bf16 1065369472, %v9458_v22  ;;  %10336 = vst [vmem:[#allocation14_spill] sm:$0xff] %v9584_v26  ;;  %v5432_v33 = vsub.bf16 0, %v5368_v4  ;;  %v6147_v63 = vadd.f32 %v6146_v7, %v6016_v14 }
 0x47f   : > { %v9562_v40 = vpop.eup %8043  ;;  %6153 = vadd.xlane.f32.xlu1 %v6152_v11  ;;  %v10338_v34 = vmul.bf16 1065369472, %v9422_v2  ;;  %v5434_v6 = vsub.bf16 0, %v5370_v19  ;;  %v5437_v11 = vsub.bf16 0, %v5373_v8  ;;  %v10339_v39 = vmul.bf16 1065369472, %v9435_v46 }
 0x480   : > { %10335 = vst [vmem:[#allocation16_spill] sm:$0xff] %v9562_v40  ;;  %v9572_v1 = vpop.eup %8045  ;;  %v5560_v21 = vmul.bf16 1069105081, %v5431_v28  ;;  %v5563_v38 = vmul.bf16 1069105081, %v5432_v33  ;;  %v5878_v40 = vunpack.c.h.bf16 %v5748_v59  ;;  %6148 = vadd.xlane.f32.xlu0 %v6147_v63  ;;  %v5879_v48 = vunpack.c.h.bf16 %v5750_v13 }
 0x481   : > { %v9579_v24 = vpop.eup %8047  ;;  %v5876_v23 = vunpack.c.h.bf16 %v10338_v34  ;;  %v5877_v53 = vunpack.c.h.bf16 %v10339_v39  ;;  %v5569_v28 = vmul.bf16 1069105081, %v5434_v6  ;;  %v5578_v4 = vmul.bf16 1069105081, %v5437_v11 }
 0x482   : > { %v9586_v62 = vpop.eup %8049  ;;  %8061 = vpow.bf16 %v5560_v21  ;;  %v9595_v19 = vpop.f32.mrb[176].mxu0  ;;  %v6027_v21 = vmul.f32 %v9336_v0, %v5878_v40  ;;  %v6028_v33 = vmul.f32 %v9338_v9, %v5879_v48 }
 0x483   : > { %10337 = vst [vmem:[#allocation18_spill] sm:$0xff] %v9586_v62  ;;  %v8052_v55 = vpop.eup %8051  ;;  %v6025_v14 = vmul.f32 %v9345_v27, %v5876_v23  ;;  %v6026_v7 = vmul.f32 %v9334_v51, %v5877_v53  ;;  %v9597_v8 = vpop.f32.mrb[176].mxu1  ;;  %v5873_v53 = vunpack.c.l.bf16 %v10339_v39  ;;  %v5756_v39 = vmul.bf16 1065369472, %v9474_v41 }
 0x484   : > { %v8054_v35 = vpop.eup %8053  ;;  %v5683_v22 = vadd.bf16 1065369472, %v8052_v55  ;;  %v10340_v55 = vmul.bf16 1065369472, %v9422_v2  ;;  %v9603_v6 = vpop.f32.mrb[177].mxu0  ;;  %v5875_v2 = vunpack.c.l.bf16 %v5750_v13 }
 0x485   : > { %v8056_v62 = vpop.eup %8055  ;;  %v5684_v26 = vadd.bf16 1065369472, %v8054_v35  ;;  %10341 = vst [vmem:[#allocation19_spill] sm:$0xff] %v9603_v6  ;;  %v9605_v11 = vpop.f32.mrb[177].mxu1  ;;  %v6160_v23 = vadd.f32 %v6026_v7, %v6025_v14  ;;  %v5874_v35 = vunpack.c.l.bf16 %v5748_v59  ;;  %v6022_v46 = vmul.f32 %v9334_v51, %v5873_v53 }
 0x486   : > { %8063 = vrcp.bf16 %v5683_v22  ;;  %v5686_v34 = vadd.bf16 1065369472, %v8056_v62  ;;  %v5872_v63 = vunpack.c.l.bf16 %v10340_v55  ;;  %10342 = vst [vmem:[#allocation15_spill] sm:$0xff] %v9605_v11  ;;  %v8058_v62 = vpop.eup %8057  ;;  %v9609_v22 = vpop.f32.mrb[178].mxu1  ;;  %v6024_v14 = vmul.f32 %v9338_v9, %v5875_v2 }
 0x487   : > { %8065 = vrcp.bf16 %v5684_v26  ;;  %v9611_v26 = vpop.f32.mrb[178].mxu0  ;;  %v9613_v40 = vpop.eup %8059  ;;  %v5689_v48 = vadd.bf16 1065369472, %v8058_v62  ;;  %v6023_v59 = vmul.f32 %v9336_v0, %v5874_v35  ;;  %v5254_v7 = vpack.c.bf16 %v9488_v5, %v9470_v29 }
 0x488   : > { %8067 = vrcp.bf16 %v5686_v34  ;;  %v6021_v55 = vmul.f32 %v9345_v27, %v5872_v63  ;;  %v9616_v6 = vpop.f32.mrb[179].mxu0  ;;  %v9618_v11 = vpop.f32.mrb[179].mxu1  ;;  %v6161_v34 = vadd.f32 %v6160_v23, %v6027_v21  ;;  %v5260_v23 = vpack.c.bf16 %v9527_v17, %v9514_v61 }
 0x489   : > { %8069 = vpow.bf16 %v5563_v38  ;;  %v5255_v38 = vpack.c.bf16 %v9493_v16, %v9478_v42  ;;  %v5371_v21 = vadd.bf16 %v9305_v12, %v5254_v7  ;;  %v5758_v16 = vmul.bf16 1065369472, %v9490_v31 }
 0x48a   : > { %8071 = vpow.bf16 %v5569_v28  ;;  %v6162_v13 = vadd.f32 %v6161_v34, %v6028_v33  ;;  %v6155_v63 = vadd.f32 %v6022_v46, %v6021_v55  ;;  %v5257_v28 = vpack.c.bf16 %v9495_v47, %v9480_v3  ;;  %v9634_v53 = vpop.f32.mrb[180].mxu0  ;;  %v9636_v29 = vpop.f32.mrb[180].mxu1 }
 0x48b   : > { %8073 = vrcp.bf16 %v5689_v48  ;;  %v5372_v62 = vadd.bf16 %v9311_v57, %v5255_v38  ;;  %v10343_v3 = vmul.bf16 1065369472, %v9463_v10  ;;  %v9644_v33 = vpop.f32.mrb[181].mxu1  ;;  %v5435_v17 = vsub.bf16 0, %v5371_v21 }
 0x48c   : > { %8075 = vpow.bf16 %v5578_v4  ;;  %6163 = vadd.xlane.f32.xlu1 %v6162_v13  ;;  %v6156_v42 = vadd.f32 %v6155_v63, %v6023_v59  ;;  %v5374_v5 = vadd.bf16 %v9314_v49, %v5257_v28  ;;  %v9642_v4 = vpop.f32.mrb[181].mxu0  ;;  %10345 = vst [vmem:[#allocation17_spill] sm:$0xff] %v9644_v33  ;;  %v5377_v35 = vadd.bf16 %v9308_v54, %v5260_v23  ;;  %v9649_v55 = vpop.f32.mrb[182].mxu1 }
 0x48d   : > { %v5884_v47 = vunpack.c.h.bf16 %v10343_v3  ;;  %10344 = vst [vmem:[#allocation20_spill] sm:$0xff] %v9642_v4  ;;  %v8062_v61 = vpop.eup %8061  ;;  %v5436_v41 = vsub.bf16 0, %v5372_v62  ;;  %v10346_v48 = vmul.bf16 1065369472, %v9482_v20  ;;  %v9651_v34 = vpop.f32.mrb[182].mxu0  ;;  %v5886_v7 = vunpack.c.h.bf16 %v5756_v39 }
 0x48e   : > { %v5687_v31 = vadd.bf16 1065369472, %v8062_v61  ;;  %v6157_v46 = vadd.f32 %v6156_v42, %v6024_v14  ;;  %v5438_v59 = vsub.bf16 0, %v5374_v5  ;;  %v9653_v38 = vpop.f32.mrb[183].mxu0  ;;  %v9655_v13 = vpop.f32.mrb[183].mxu1  ;;  %v5441_v62 = vsub.bf16 0, %v5377_v35 }
 0x48f   : > { %v5885_v2 = vunpack.c.h.bf16 %v10346_v48  ;;  %10347 = vst [vmem:[#allocation21_spill] sm:$0xff] %v9653_v38  ;;  %10348 = vst [vmem:[#allocation24_spill] sm:$0xff] %v9655_v13  ;;  %v5572_v28 = vmul.bf16 1069105081, %v5435_v17  ;;  %v5575_v21 = vmul.bf16 1069105081, %v5436_v41  ;;  %v5887_v23 = vunpack.c.h.bf16 %v5758_v16 }
 0x490   : > { %8077 = vrcp.bf16 %v5687_v31  ;;  %6158 = vadd.xlane.f32.xlu0 %v6157_v46  ;;  %v5581_v61 = vmul.bf16 1069105081, %v5438_v59  ;;  %v6033_v14 = vmul.f32 %v9345_v27, %v5884_v47  ;;  %v5590_v13 = vmul.bf16 1069105081, %v5441_v62 }
 0x491   : > { %v9657_v63 = vpop.eup %8063  ;;  %8079 = vpow.bf16 %v5572_v28  ;;  %v6034_v17 = vmul.f32 %v9334_v51, %v5885_v2  ;;  %v6035_v35 = vmul.f32 %v9336_v0, %v5886_v7  ;;  %v6036_v33 = vmul.f32 %v9338_v9, %v5887_v23 }
 0x492   : > { %v9659_v3 = vpop.eup %8065  ;;  %8081 = vpow.bf16 %v5575_v21  ;;  %v10349_v31 = vmul.bf16 1065369472, %v9463_v10  ;;  %v10350_v38 = vmul.bf16 1065369472, %v9482_v20  ;;  %v9673_v28 = vpop.f32.mrb[184].mxu0  ;;  %v5882_v7 = vunpack.c.l.bf16 %v5756_v39 }
 0x493   : > { %v9663_v42 = vpop.eup %8067  ;;  %8083 = vpow.bf16 %v5581_v61  ;;  %v6170_v47 = vadd.f32 %v6034_v17, %v6033_v14  ;;  %v9675_v62 = vpop.f32.mrb[184].mxu1  ;;  %v5883_v23 = vunpack.c.l.bf16 %v5758_v16 }
 0x494   : > { %v8070_v41 = vpop.eup %8069  ;;  %v5880_v46 = vunpack.c.l.bf16 %v10349_v31  ;;  %v5881_v5 = vunpack.c.l.bf16 %v10350_v38  ;;  %8085 = vpow.bf16 %v5590_v13  ;;  %v9679_v4 = vpop.f32.mrb[185].mxu0  ;;  %v6031_v16 = vmul.f32 %v9336_v0, %v5882_v7 }
 0x495   : > { %v8072_v59 = vpop.eup %8071  ;;  %v5688_v48 = vadd.bf16 1065369472, %v8070_v41  ;;  %v9681_v10 = vpop.f32.mrb[185].mxu1  ;;  %v6171_v61 = vadd.f32 %v6170_v47, %v6035_v35  ;;  %v6032_v47 = vmul.f32 %v9338_v9, %v5883_v23  ;;  %v5264_v7 = vpack.c.bf16 %v9568_v18, %v9552_v50 }
 0x496   : > { %v9677_v2 = vpop.eup %8073  ;;  %v5690_v21 = vadd.bf16 1065369472, %v8072_v59  ;;  %10351 = vst [vmem:[#allocation22_spill] sm:$0xff] %v9681_v10  ;;  %v6029_v20 = vmul.f32 %v9345_v27, %v5880_v46  ;;  %v6030_v38 = vmul.f32 %v9334_v51, %v5881_v5  ;;  %v9685_v14 = vpop.f32.mrb[186].mxu1  ;;  %v5258_v46 = vpack.c.bf16 %v9529_v36, %v9512_v37 }
 0x497   : > { %v8076_v41 = vpop.eup %8075  ;;  %8087 = vrcp.bf16 %v5688_v48  ;;  %v9687_v17 = vpop.f32.mrb[186].mxu0  ;;  %v6172_v48 = vadd.f32 %v6171_v61, %v6036_v33  ;;  %v5259_v5 = vpack.c.bf16 %v9533_v45, %v9522_v43  ;;  %v5766_v37 = vmul.bf16 1065369472, %v9538_v25  ;;  %v10355_v45 = vld [vmem:[#allocation12_spill] sm:$0xff] }
 0x498   : > { %8089 = vrcp.bf16 %v5690_v21  ;;  %v5693_v39 = vadd.bf16 1065369472, %v8076_v41  ;;  %v9691_v13 = vpop.f32.mrb[187].mxu0  ;;  %v9693_v59 = vpop.f32.mrb[187].mxu1  ;;  %v6165_v35 = vadd.f32 %v6030_v38, %v6029_v20  ;;  %v5261_v21 = vpack.c.bf16 %v9535_v30, %v9524_v15  ;;  %v10354_v41 = vld [vmem:[#allocation13_spill] sm:$0xff] }
 0x499   : > { %10352 = vst [vmem:[#allocation26_spill] sm:$0xff] %v9691_v13  ;;  %10353 = vst [vmem:[#allocation11_spill] sm:$0xff] %v9693_v59  ;;  %v5764_v31 = vmul.bf16 1065369472, %v10354_v41  ;;  %6173 = vadd.xlane.f32.xlu1 %v6172_v48  ;;  %v5375_v33 = vadd.bf16 %v9305_v12, %v5258_v46  ;;  %v5376_v61 = vadd.bf16 %v9311_v57, %v5259_v5  ;;  %v10356_v23 = vmul.bf16 1065369472, %v10355_v45 }
 0x49a   : > { %v6166_v59 = vadd.f32 %v6165_v35, %v6031_v16  ;;  %v5378_v43 = vadd.bf16 %v9314_v49, %v5261_v21  ;;  %v5381_v36 = vadd.bf16 %v9308_v54, %v5264_v7  ;;  %v10357_v30 = vmul.bf16 1065369472, %v9516_v58  ;;  %v9716_v35 = vpop.f32.mrb[188].mxu0  ;;  %v9718_v46 = vpop.f32.mrb[188].mxu1 }
 0x49b   : > { %v5892_v15 = vunpack.c.h.bf16 %v10356_v23  ;;  %v9714_v18 = vpop.eup %8077  ;;  %v5439_v38 = vsub.bf16 0, %v5375_v33  ;;  %v5440_v16 = vsub.bf16 0, %v5376_v61  ;;  %v5894_v48 = vunpack.c.h.bf16 %v5764_v31  ;;  %10358 = vst [vmem:[#allocation25_spill] sm:$0xff] %v9716_v35  ;;  %10359 = vst [vmem:[#allocation23_spill] sm:$0xff] %v9718_v46  ;;  %v9721_v41 = vpop.f32.mrb[189].mxu0 }
 0x49c   : > { %v5893_v50 = vunpack.c.h.bf16 %v10357_v30  ;;  %v6167_v20 = vadd.f32 %v6166_v59, %v6032_v47  ;;  %v8080_v25 = vpop.eup %8079  ;;  %8091 = vrcp.bf16 %v5693_v39  ;;  %v5442_v21 = vsub.bf16 0, %v5378_v43  ;;  %10360 = vst [vmem:[#allocation30_spill] sm:$0xff] %v9721_v41  ;;  %v9723_v23 = vpop.f32.mrb[189].mxu1 }
 0x49d   : > { %v5445_v7 = vsub.bf16 0, %v5381_v36  ;;  %10361 = vst [vmem:[#allocation28_spill] sm:$0xff] %v9723_v23  ;;  %v8082_v30 = vpop.eup %8081  ;;  %v5691_v10 = vadd.bf16 1065369472, %v8080_v25  ;;  %v5584_v59 = vmul.bf16 1069105081, %v5439_v38  ;;  %v5895_v47 = vunpack.c.h.bf16 %v5766_v37 }
 0x49e   : > { %6168 = vadd.xlane.f32.xlu0 %v6167_v20  ;;  %v6041_v33 = vmul.f32 %v9345_v27, %v5892_v15  ;;  %v8084_v61 = vpop.eup %8083  ;;  %v5692_v35 = vadd.bf16 1065369472, %v8082_v30  ;;  %v5587_v46 = vmul.bf16 1069105081, %v5440_v16  ;;  %v5593_v13 = vmul.bf16 1069105081, %v5442_v21 }
 0x49f   : > { %v6042_v5 = vmul.f32 %v9334_v51, %v5893_v50  ;;  %v8086_v39 = vpop.eup %8085  ;;  %8093 = vrcp.bf16 %v5691_v10  ;;  %v5694_v43 = vadd.bf16 1065369472, %v8084_v61  ;;  %v5602_v36 = vmul.bf16 1069105081, %v5445_v7  ;;  %v9728_v23 = vpop.f32.mrb[190].mxu1 }
 0x4a0   : > { %v6043_v41 = vmul.f32 %v9336_v0, %v5894_v48  ;;  %v9730_v25 = vpop.f32.mrb[190].mxu0  ;;  %8095 = vrcp.bf16 %v5692_v35  ;;  %v5697_v15 = vadd.bf16 1065369472, %v8086_v39  ;;  %v10363_v16 = vmul.bf16 1065369472, %v10355_v45  ;;  %v9738_v50 = vpop.f32.mrb[191].mxu1 }
 0x4a1   : > { %10362 = vst [vmem:[#allocation29_spill] sm:$0xff] %v9730_v25  ;;  %v6180_v38 = vadd.f32 %v6042_v5, %v6041_v33  ;;  %v9736_v30 = vpop.f32.mrb[191].mxu0  ;;  %8097 = vrcp.bf16 %v5694_v43  ;;  %v6044_v48 = vmul.f32 %v9338_v9, %v5895_v47  ;;  %v10364_v7 = vmul.bf16 1065369472, %v9516_v58 }
 0x4a2   : > { %v9732_v20 = vpop.eup %8087  ;;  %v5888_v21 = vunpack.c.l.bf16 %v10363_v16  ;;  %v5890_v25 = vunpack.c.l.bf16 %v5764_v31  ;;  %8099 = vrcp.bf16 %v5697_v15  ;;  %v5891_v39 = vunpack.c.l.bf16 %v5766_v37 }
 0x4a3   : > { %v9740_v10 = vpop.eup %8089  ;;  %v5889_v61 = vunpack.c.l.bf16 %v10364_v7  ;;  %v6181_v35 = vadd.f32 %v6180_v38, %v6043_v41  ;;  %8101 = vpow.bf16 %v5584_v59  ;;  %v5262_v16 = vpack.c.bf16 %v9570_v56, %v9550_v44  ;;  %v10365_v41 = vld [vmem:[#allocation14_spill] sm:$0xff]  ;;  %v10366_v56 = vld [vmem:[#allocation16_spill] sm:$0xff] }
 0x4a4   : > { %v6037_v5 = vmul.f32 %v9345_v27, %v5888_v21  ;;  %v6039_v33 = vmul.f32 %v9336_v0, %v5890_v25  ;;  %8103 = vpow.bf16 %v5587_v46  ;;  %v6040_v47 = vmul.f32 %v9338_v9, %v5891_v39 }
 0x4a5   : > { %v6038_v45 = vmul.f32 %v9334_v51, %v5889_v61  ;;  %v6182_v43 = vadd.f32 %v6181_v35, %v6044_v48  ;;  %v5263_v58 = vpack.c.bf16 %v9577_v32, %v9558_v60  ;;  %8105 = vpow.bf16 %v5593_v13  ;;  %v10367_v13 = vld [vmem:[#allocation18_spill] sm:$0xff] }
 0x4a6   : > { %v5379_v37 = vadd.bf16 %v9305_v12, %v5262_v16  ;;  %v5265_v59 = vpack.c.bf16 %v10365_v41, %v9560_v52  ;;  %8107 = vpow.bf16 %v5602_v36  ;;  %v5268_v44 = vpack.c.bf16 %v9609_v22, %v9597_v8 }
 0x4a7   : > { %v6175_v31 = vadd.f32 %v6038_v45, %v6037_v5  ;;  %6183 = vadd.xlane.f32.xlu1 %v6182_v43  ;;  %v5380_v25 = vadd.bf16 %v9311_v57, %v5263_v58  ;;  %v5772_v46 = vmul.bf16 1065369472, %v10366_v56  ;;  %v9760_v15 = vpop.eup %8091  ;;  %v5774_v21 = vmul.bf16 1065369472, %v10367_v13 }
 0x4a8   : > { %v5443_v60 = vsub.bf16 0, %v5379_v37  ;;  %v5382_v32 = vadd.bf16 %v9314_v49, %v5265_v59  ;;  %v5385_v52 = vadd.bf16 %v9308_v54, %v5268_v44  ;;  %v10368_v36 = vmul.bf16 1065369472, %v9572_v1 }
 0x4a9   : > { %v6176_v38 = vadd.f32 %v6175_v31, %v6039_v33  ;;  %v5444_v48 = vsub.bf16 0, %v5380_v25  ;;  %v10369_v61 = vmul.bf16 1065369472, %v9579_v24  ;;  %v5902_v5 = vunpack.c.h.bf16 %v5772_v46 }
 0x4aa   : > { %v5900_v7 = vunpack.c.h.bf16 %v10368_v36  ;;  %v5596_v22 = vmul.bf16 1069105081, %v5443_v60  ;;  %v5446_v39 = vsub.bf16 0, %v5382_v32  ;;  %v9769_v45 = vpop.eup %8093  ;;  %v5449_v16 = vsub.bf16 0, %v5385_v52 }
 0x4ab   : > { %v5901_v35 = vunpack.c.h.bf16 %v10369_v61  ;;  %v6177_v8 = vadd.f32 %v6176_v38, %v6040_v47  ;;  %v5599_v33 = vmul.bf16 1069105081, %v5444_v48  ;;  %v5903_v43 = vunpack.c.h.bf16 %v5774_v21  ;;  %v9772_v31 = vpop.eup %8095 }
 0x4ac   : > { %v6049_v58 = vmul.f32 %v9345_v27, %v5900_v7  ;;  %v5786_v37 = vmul.bf16 1065369472, %v9732_v20  ;;  %8109 = vpow.bf16 %v5596_v22  ;;  %v5605_v41 = vmul.bf16 1069105081, %v5446_v39  ;;  %v9776_v47 = vpop.eup %8097 }
 0x4ad   : > { %6178 = vadd.xlane.f32.xlu0 %v6177_v8  ;;  %v6050_v59 = vmul.f32 %v9334_v51, %v5901_v35  ;;  %v5792_v25 = vmul.bf16 1065369472, %v9769_v45  ;;  %8111 = vpow.bf16 %v5599_v33  ;;  %v5614_v44 = vmul.bf16 1069105081, %v5449_v16  ;;  %v9780_v38 = vpop.eup %8099 }
 0x4ae   : > { %v6051_v56 = vmul.f32 %v9336_v0, %v5902_v5  ;;  %8113 = vpow.bf16 %v5605_v41  ;;  %v6052_v60 = vmul.f32 %v9338_v9, %v5903_v43  ;;  %v10370_v13 = vmov %v10368_v36  ;;  %v8102_v52 = vpop.eup %8101 }
 0x4af   : > { %v6190_v32 = vadd.f32 %v6050_v59, %v6049_v58  ;;  %v5896_v48 = vunpack.c.l.bf16 %v10370_v13  ;;  %8115 = vpow.bf16 %v5614_v44  ;;  %v10371_v36 = vmov %v10369_v61  ;;  %v8104_v8 = vpop.eup %8103 }
 0x4b0   : > { %v5897_v7 = vunpack.c.l.bf16 %v10371_v36  ;;  %v5898_v61 = vunpack.c.l.bf16 %v5772_v46  ;;  %v5899_v35 = vunpack.c.l.bf16 %v5774_v21  ;;  %v5695_v22 = vadd.bf16 1065369472, %v8102_v52  ;;  %v8106_v16 = vpop.eup %8105 }
 0x4b1   : > { %v6191_v39 = vadd.f32 %v6190_v32, %v6051_v56  ;;  %v6045_v5 = vmul.f32 %v9345_v27, %v5896_v48  ;;  %v5266_v33 = vpack.c.bf16 %v9611_v26, %v9595_v19  ;;  %v5794_v43 = vmul.bf16 1065369472, %v9772_v31  ;;  %v8108_v24 = vpop.eup %8107  ;;  %v10372_v32 = vld [vmem:[#allocation19_spill] sm:$0xff]  ;;  %v10390_v31 = vld [vmem:[#allocation30_spill] sm:$0xff] }
 0x4b2   : > { %v5696_v1 = vadd.bf16 1065369472, %v8104_v8  ;;  %v6046_v58 = vmul.f32 %v9334_v51, %v5897_v7  ;;  %v6047_v41 = vmul.f32 %v9336_v0, %v5898_v61  ;;  %8117 = vrcp.bf16 %v5695_v22  ;;  %v10373_v48 = vld [vmem:[#allocation15_spill] sm:$0xff] }
 0x4b3   : > { %v5698_v46 = vadd.bf16 1065369472, %v8106_v16  ;;  %v6192_v21 = vadd.f32 %v6191_v39, %v6052_v60  ;;  %v5383_v59 = vadd.bf16 %v9305_v12, %v5266_v33  ;;  %v6048_v44 = vmul.f32 %v9338_v9, %v5899_v35 }
 0x4b4   : > { %8119 = vrcp.bf16 %v5696_v1  ;;  %v6185_v56 = vadd.f32 %v6046_v58, %v6045_v5  ;;  %v5267_v19 = vpack.c.bf16 %v9616_v6, %v10372_v32  ;;  %v5701_v26 = vadd.bf16 1065369472, %v8108_v24 }
 0x4b5   : > { %6193 = vadd.xlane.f32.xlu1 %v6192_v21  ;;  %v5447_v13 = vsub.bf16 0, %v5383_v59  ;;  %v5269_v52 = vpack.c.bf16 %v9618_v11, %v10373_v48  ;;  %v5272_v36 = vpack.c.bf16 %v9649_v55, %v9636_v29  ;;  %8121 = vrcp.bf16 %v5698_v46 }
 0x4b6   : > { %v6186_v60 = vadd.f32 %v6185_v56, %v6047_v41  ;;  %v5384_v7 = vadd.bf16 %v9311_v57, %v5267_v19  ;;  %v5780_v61 = vmul.bf16 1065369472, %v9613_v40  ;;  %v5782_v22 = vmul.bf16 1065369472, %v9663_v42 }
 0x4b7   : > { %v5608_v35 = vmul.bf16 1069105081, %v5447_v13  ;;  %v5386_v8 = vadd.bf16 %v9314_v49, %v5269_v52  ;;  %v5389_v6 = vadd.bf16 %v9308_v54, %v5272_v36  ;;  %v8110_v39 = vpop.eup %8109  ;;  %v10374_v11 = vmul.bf16 1065369472, %v9657_v63 }
 0x4b8   : > { %v6187_v5 = vadd.f32 %v6186_v60, %v6048_v44  ;;  %v5448_v33 = vsub.bf16 0, %v5384_v7  ;;  %v10375_v29 = vmul.bf16 1065369472, %v9659_v3  ;;  %v8112_v1 = vpop.eup %8111  ;;  %v5699_v58 = vadd.bf16 1065369472, %v8110_v39 }
 0x4b9   : > { %v5908_v16 = vunpack.c.h.bf16 %v10374_v11  ;;  %8123 = vpow.bf16 %v5608_v35  ;;  %v5450_v40 = vsub.bf16 0, %v5386_v8  ;;  %v5453_v41 = vsub.bf16 0, %v5389_v6  ;;  %v8114_v24 = vpop.eup %8113 }
 0x4ba   : > { %v5909_v55 = vunpack.c.h.bf16 %v10375_v29  ;;  %8125 = vrcp.bf16 %v5701_v26  ;;  %v5700_v46 = vadd.bf16 1065369472, %v8112_v1  ;;  %6188 = vadd.xlane.f32.xlu0 %v6187_v5  ;;  %v5611_v21 = vmul.bf16 1069105081, %v5448_v33  ;;  %v8116_v59 = vpop.eup %8115 }
 0x4bb   : > { %v5910_v42 = vunpack.c.h.bf16 %v5780_v61  ;;  %8127 = vrcp.bf16 %v5699_v58  ;;  %v5702_v44 = vadd.bf16 1065369472, %v8114_v24  ;;  %v5617_v56 = vmul.bf16 1069105081, %v5450_v40  ;;  %v10379_v24 = vld [vmem:[#allocation21_spill] sm:$0xff] }
 0x4bc   : > { %v5911_v32 = vunpack.c.h.bf16 %v5782_v22  ;;  %8129 = vrcp.bf16 %v5700_v46  ;;  %v5705_v19 = vadd.bf16 1065369472, %v8116_v59  ;;  %v6057_v13 = vmul.f32 %v9345_v27, %v5908_v16 }
 0x4bd   : > { %v6058_v48 = vmul.f32 %v9334_v51, %v5909_v55  ;;  %8131 = vrcp.bf16 %v5702_v44  ;;  %v5626_v52 = vmul.bf16 1069105081, %v5453_v41  ;;  %v6059_v36 = vmul.f32 %v9336_v0, %v5910_v42  ;;  %v9815_v7 = vpop.eup %8117  ;;  %v10378_v41 = vld [vmem:[#allocation20_spill] sm:$0xff] }
 0x4be   : > { %v10376_v26 = vmov %v10374_v11  ;;  %8133 = vrcp.bf16 %v5705_v19  ;;  %v10377_v8 = vmov %v10375_v29  ;;  %v5906_v39 = vunpack.c.l.bf16 %v5780_v61  ;;  %v10381_v42 = vld [vmem:[#allocation24_spill] sm:$0xff] }
 0x4bf   : > { %v5904_v60 = vunpack.c.l.bf16 %v10376_v26  ;;  %v6200_v35 = vadd.f32 %v6058_v48, %v6057_v13  ;;  %v5905_v6 = vunpack.c.l.bf16 %v10377_v8  ;;  %v9819_v5 = vpop.eup %8119  ;;  %8135 = vpow.bf16 %v5611_v21  ;;  %v10380_v21 = vld [vmem:[#allocation17_spill] sm:$0xff] }
 0x4c0   : > { %v6060_v33 = vmul.f32 %v9338_v9, %v5911_v32  ;;  %v5907_v11 = vunpack.c.l.bf16 %v5782_v22  ;;  %v5800_v29 = vmul.bf16 1065369472, %v9815_v7  ;;  %8137 = vpow.bf16 %v5617_v56  ;;  %v9825_v1 = vpop.eup %8121 }
 0x4c1   : > { %v6053_v16 = vmul.f32 %v9345_v27, %v5904_v60  ;;  %v6201_v63 = vadd.f32 %v6200_v35, %v6059_v36  ;;  %v6054_v55 = vmul.f32 %v9334_v51, %v5905_v6  ;;  %8139 = vpow.bf16 %v5626_v52 }
 0x4c2   : > { %v6055_v3 = vmul.f32 %v9336_v0, %v5906_v39  ;;  %v6056_v61 = vmul.f32 %v9338_v9, %v5907_v11  ;;  %v5270_v58 = vpack.c.bf16 %v9651_v34, %v9634_v53  ;;  %v5271_v46 = vpack.c.bf16 %v10379_v24, %v10378_v41 }
 0x4c3   : > { %v6202_v40 = vadd.f32 %v6201_v63, %v6060_v33  ;;  %v6195_v22 = vadd.f32 %v6054_v55, %v6053_v16  ;;  %v5273_v59 = vpack.c.bf16 %v10381_v42, %v10380_v21  ;;  %v5276_v56 = vpack.c.bf16 %v9685_v14, %v9675_v62 }
 0x4c4   : > { %v5387_v44 = vadd.bf16 %v9305_v12, %v5270_v58  ;;  %v5788_v32 = vmul.bf16 1065369472, %v9677_v2  ;;  %v5790_v19 = vmul.bf16 1065369472, %v9740_v10  ;;  %v8124_v13 = vpop.eup %8123  ;;  %v5388_v34 = vadd.bf16 %v9311_v57, %v5271_v46 }
 0x4c5   : > { %6203 = vadd.xlane.f32.xlu1 %v6202_v40  ;;  %v6196_v53 = vadd.f32 %v6195_v22, %v6055_v3  ;;  %v5390_v48 = vadd.bf16 %v9314_v49, %v5273_v59  ;;  %v10382_v52 = vmul.bf16 1065369472, %v9714_v18  ;;  %v9844_v26 = vpop.eup %8125  ;;  %v5703_v60 = vadd.bf16 1065369472, %v8124_v13 }
 0x4c6   : > { %v5451_v35 = vsub.bf16 0, %v5387_v44  ;;  %v5393_v62 = vadd.bf16 %v9308_v54, %v5276_v56  ;;  %v5917_v2 = vunpack.c.h.bf16 %v5786_v37  ;;  %v9849_v14 = vpop.eup %8127  ;;  %v5452_v8 = vsub.bf16 0, %v5388_v34 }
 0x4c7   : > { %v5916_v36 = vunpack.c.h.bf16 %v10382_v52  ;;  %v6197_v10 = vadd.f32 %v6196_v53, %v6056_v61  ;;  %v5454_v6 = vsub.bf16 0, %v5390_v48  ;;  %v5918_v39 = vunpack.c.h.bf16 %v5788_v32  ;;  %v9851_v33 = vpop.eup %8129 }
 0x4c8   : > { %v5802_v11 = vmul.bf16 1065369472, %v9819_v5  ;;  %8141 = vrcp.bf16 %v5703_v60  ;;  %v5620_v16 = vmul.bf16 1069105081, %v5451_v35  ;;  %v5457_v63 = vsub.bf16 0, %v5393_v62  ;;  %v9854_v55 = vpop.eup %8131 }
 0x4c9   : > { %v5808_v3 = vmul.bf16 1065369472, %v9849_v14  ;;  %6198 = vadd.xlane.f32.xlu0 %v6197_v10  ;;  %v5623_v58 = vmul.bf16 1069105081, %v5452_v8  ;;  %v5629_v40 = vmul.bf16 1069105081, %v5454_v6  ;;  %v5919_v22 = vunpack.c.h.bf16 %v5790_v19  ;;  %v9857_v41 = vpop.eup %8133 }
 0x4ca   : > { %8143 = vpow.bf16 %v5620_v16  ;;  %v5638_v61 = vmul.bf16 1069105081, %v5457_v63  ;;  %v6065_v24 = vmul.f32 %v9345_v27, %v5916_v36  ;;  %v6066_v46 = vmul.f32 %v9334_v51, %v5917_v2  ;;  %v8136_v21 = vpop.eup %8135  ;;  %v10385_v63 = vld [vmem:[#allocation22_spill] sm:$0xff] }
 0x4cb   : > { %v5810_v42 = vmul.bf16 1065369472, %v9851_v33  ;;  %8145 = vpow.bf16 %v5623_v58  ;;  %v6067_v59 = vmul.f32 %v9336_v0, %v5918_v39  ;;  %v10383_v44 = vmov %v10382_v52  ;;  %v8138_v13 = vpop.eup %8137  ;;  %v10386_v58 = vld [vmem:[#allocation11_spill] sm:$0xff] }
 0x4cc   : > { %v5912_v56 = vunpack.c.l.bf16 %v10383_v44  ;;  %v5704_v53 = vadd.bf16 1065369472, %v8136_v21  ;;  %8147 = vpow.bf16 %v5629_v40  ;;  %v6210_v34 = vadd.f32 %v6066_v46, %v6065_v24  ;;  %v8140_v52 = vpop.eup %8139 }
 0x4cd   : > { %v5913_v48 = vunpack.c.l.bf16 %v5786_v37  ;;  %v5706_v36 = vadd.bf16 1065369472, %v8138_v13  ;;  %8149 = vpow.bf16 %v5638_v61  ;;  %v5914_v60 = vunpack.c.l.bf16 %v5788_v32  ;;  %v10384_v32 = vld [vmem:[#allocation26_spill] sm:$0xff] }
 0x4ce   : > { %v5915_v35 = vunpack.c.l.bf16 %v5790_v19  ;;  %8151 = vrcp.bf16 %v5704_v53  ;;  %v6068_v62 = vmul.f32 %v9338_v9, %v5919_v22  ;;  %v6211_v2 = vadd.f32 %v6210_v34, %v6067_v59  ;;  %v10387_v22 = vld [vmem:[#allocation23_spill] sm:$0xff] }
 0x4cf   : > { %v6061_v10 = vmul.f32 %v9345_v27, %v5912_v56  ;;  %8153 = vrcp.bf16 %v5706_v36  ;;  %v5709_v18 = vadd.bf16 1065369472, %v8140_v52  ;;  %v6062_v8 = vmul.f32 %v9334_v51, %v5913_v48 }
 0x4d0   : > { %v6063_v6 = vmul.f32 %v9336_v0, %v5914_v60  ;;  %v6212_v39 = vadd.f32 %v6211_v2, %v6068_v62  ;;  %v6064_v20 = vmul.f32 %v9338_v9, %v5915_v35  ;;  %v5274_v37 = vpack.c.bf16 %v9687_v17, %v9673_v28 }
 0x4d1   : > { %v5275_v19 = vpack.c.bf16 %v10384_v32, %v9679_v4  ;;  %v6205_v16 = vadd.f32 %v6062_v8, %v6061_v10  ;;  %v5277_v40 = vpack.c.bf16 %v10386_v58, %v10385_v63  ;;  %v5280_v61 = vpack.c.bf16 %v9728_v23, %v10387_v22 }
 0x4d2   : > { %v5796_v24 = vmul.bf16 1065369472, %v9760_v15  ;;  %6213 = vadd.xlane.f32.xlu1 %v6212_v39  ;;  %v5391_v46 = vadd.bf16 %v9305_v12, %v5274_v37  ;;  %v5798_v59 = vmul.bf16 1065369472, %v9776_v47  ;;  %v5924_v28 = vunpack.c.h.bf16 %v5792_v25 }
 0x4d3   : > { %v5392_v21 = vadd.bf16 %v9311_v57, %v5275_v19  ;;  %v9886_v4 = vpop.eup %8141  ;;  %v6206_v17 = vadd.f32 %v6205_v16, %v6063_v6  ;;  %v5394_v44 = vadd.bf16 %v9314_v49, %v5277_v40  ;;  %v5397_v56 = vadd.bf16 %v9308_v54, %v5280_v61 }
 0x4d4   : > { %v5925_v23 = vunpack.c.h.bf16 %v5794_v43  ;;  %8155 = vrcp.bf16 %v5709_v18  ;;  %v5455_v15 = vsub.bf16 0, %v5391_v46  ;;  %v5926_v53 = vunpack.c.h.bf16 %v5796_v24 }
 0x4d5   : > { %v5456_v13 = vsub.bf16 0, %v5392_v21  ;;  %v8144_v34 = vpop.eup %8143  ;;  %v6207_v48 = vadd.f32 %v6206_v17, %v6064_v20  ;;  %v5458_v47 = vsub.bf16 0, %v5394_v44  ;;  %v5461_v52 = vsub.bf16 0, %v5397_v56 }
 0x4d6   : > { %v5927_v36 = vunpack.c.h.bf16 %v5798_v59  ;;  %v8146_v60 = vpop.eup %8145  ;;  %v5816_v35 = vmul.bf16 1065369472, %v9886_v4  ;;  %v5707_v62 = vadd.bf16 1065369472, %v8144_v34  ;;  %v5632_v2 = vmul.bf16 1069105081, %v5455_v15 }
 0x4d7   : > { %v6073_v10 = vmul.f32 %v9345_v27, %v5924_v28  ;;  %v8148_v54 = vpop.eup %8147  ;;  %v5708_v8 = vadd.bf16 1065369472, %v8146_v60  ;;  %6208 = vadd.xlane.f32.xlu0 %v6207_v48  ;;  %v5635_v6 = vmul.bf16 1069105081, %v5456_v13  ;;  %v5641_v18 = vmul.bf16 1069105081, %v5458_v47 }
 0x4d8   : > { %v6074_v39 = vmul.f32 %v9334_v51, %v5925_v23  ;;  %v8150_v37 = vpop.eup %8149  ;;  %8157 = vrcp.bf16 %v5707_v62  ;;  %v5710_v20 = vadd.bf16 1065369472, %v8148_v54  ;;  %v5650_v32 = vmul.bf16 1069105081, %v5461_v52  ;;  %v10389_v15 = vld [vmem:[#allocation29_spill] sm:$0xff]  ;;  %v10391_v48 = vld [vmem:[#allocation28_spill] sm:$0xff] }
 0x4d9   : > { %v6075_v19 = vmul.f32 %v9336_v0, %v5926_v53  ;;  %v9896_v16 = vpop.eup %8151  ;;  %8159 = vrcp.bf16 %v5708_v8  ;;  %v6076_v63 = vmul.f32 %v9338_v9, %v5927_v36  ;;  %v5920_v40 = vunpack.c.l.bf16 %v5792_v25  ;;  %v10388_v25 = vld [vmem:[#allocation25_spill] sm:$0xff] }
 0x4da   : > { %v6220_v58 = vadd.f32 %v6074_v39, %v6073_v10  ;;  %v9901_v22 = vpop.eup %8153  ;;  %v5818_v61 = vmul.bf16 1065369472, %v9896_v16  ;;  %v5713_v46 = vadd.bf16 1065369472, %v8150_v37  ;;  %v5921_v21 = vunpack.c.l.bf16 %v5794_v43 }
 0x4db   : > { %v5922_v28 = vunpack.c.l.bf16 %v5796_v24  ;;  %8161 = vrcp.bf16 %v5710_v20  ;;  %v5923_v44 = vunpack.c.l.bf16 %v5798_v59  ;;  %v6069_v56 = vmul.f32 %v9345_v27, %v5920_v40 }
 0x4dc   : > { %v6221_v17 = vadd.f32 %v6220_v58, %v6075_v19  ;;  %8163 = vpow.bf16 %v5632_v2  ;;  %v6070_v23 = vmul.f32 %v9334_v51, %v5921_v21  ;;  %v5278_v13 = vpack.c.bf16 %v10389_v15, %v10388_v25 }
 0x4dd   : > { %v6071_v45 = vmul.f32 %v9336_v0, %v5922_v28  ;;  %8165 = vpow.bf16 %v5635_v6  ;;  %v6072_v34 = vmul.f32 %v9338_v9, %v5923_v44  ;;  %v5279_v43 = vpack.c.bf16 %v9736_v30, %v10390_v31 }
 0x4de   : > { %v6222_v53 = vadd.f32 %v6221_v17, %v6076_v63  ;;  %8167 = vpow.bf16 %v5641_v18  ;;  %v6215_v24 = vadd.f32 %v6070_v23, %v6069_v56  ;;  %v5395_v59 = vadd.bf16 %v9305_v12, %v5278_v13 }
 0x4df   : > { %v5281_v47 = vpack.c.bf16 %v9738_v50, %v10391_v48  ;;  %v9917_v52 = vpop.eup %8155  ;;  %8169 = vpow.bf16 %v5650_v32  ;;  %v5396_v36 = vadd.bf16 %v9311_v57, %v5279_v43  ;;  %v5804_v60 = vmul.bf16 1065369472, %v9780_v38 }
 0x4e0   : > { %6223 = vadd.xlane.f32.xlu1 %v6222_v53  ;;  %v5806_v62 = vmul.bf16 1065369472, %v9825_v1  ;;  %v6216_v2 = vadd.f32 %v6215_v24, %v6071_v45  ;;  %v5459_v10 = vsub.bf16 0, %v5395_v59  ;;  %v5932_v12 = vunpack.c.h.bf16 %v5800_v29 }
 0x4e1   : > { %v5398_v30 = vadd.bf16 %v9314_v49, %v5281_v47  ;;  %v5460_v54 = vsub.bf16 0, %v5396_v36  ;;  %v5933_v50 = vunpack.c.h.bf16 %v5802_v11  ;;  %v5934_v8 = vunpack.c.h.bf16 %v5804_v60 }
 0x4e2   : > { %v5935_v6 = vunpack.c.h.bf16 %v5806_v62  ;;  %v6217_v18 = vadd.f32 %v6216_v2, %v6072_v34  ;;  %v5644_v39 = vmul.bf16 1069105081, %v5459_v10  ;;  %v6081_v38 = vmul.f32 %v9345_v27, %v5932_v12 }
 0x4e3   : > { %v5462_v57 = vsub.bf16 0, %v5398_v30  ;;  %v9928_v37 = vpop.eup %8157  ;;  %8171 = vrcp.bf16 %v5713_v46  ;;  %v5647_v1 = vmul.bf16 1069105081, %v5460_v54  ;;  %v6082_v49 = vmul.f32 %v9334_v51, %v5933_v50 }
 0x4e4   : > { %v6083_v20 = vmul.f32 %v9336_v0, %v5934_v8  ;;  %v9932_v32 = vpop.eup %8159  ;;  %6218 = vadd.xlane.f32.xlu0 %v6217_v18  ;;  %8173 = vpow.bf16 %v5644_v39  ;;  %v6084_v63 = vmul.f32 %v9338_v9, %v5935_v6  ;;  %v5928_v58 = vunpack.c.l.bf16 %v5800_v29 }
 0x4e5   : > { %v5653_v19 = vmul.bf16 1069105081, %v5462_v57  ;;  %v5824_v40 = vmul.bf16 1065369472, %v9928_v37  ;;  %8175 = vpow.bf16 %v5647_v1  ;;  %v6230_v21 = vadd.f32 %v6082_v49, %v6081_v38 }
 0x4e6   : > { %v5929_v46 = vunpack.c.l.bf16 %v5802_v11  ;;  %v9940_v28 = vpop.eup %8161  ;;  %v5930_v17 = vunpack.c.l.bf16 %v5804_v60  ;;  %v5931_v44 = vunpack.c.l.bf16 %v5806_v62  ;;  %v6077_v56 = vmul.f32 %v9345_v27, %v5928_v58 }
 0x4e7   : > { %8177 = vpow.bf16 %v5653_v19  ;;  %v8164_v23 = vpop.eup %8163  ;;  %v6231_v45 = vadd.f32 %v6230_v21, %v6083_v20  ;;  %v5812_v7 = vmul.bf16 1065369472, %v9844_v26  ;;  %v5814_v29 = vmul.bf16 1065369472, %v9854_v55 }
 0x4e8   : > { %v6078_v25 = vmul.f32 %v9334_v51, %v5929_v46  ;;  %v8166_v15 = vpop.eup %8165  ;;  %v5711_v13 = vadd.bf16 1065369472, %v8164_v23  ;;  %v6079_v5 = vmul.f32 %v9336_v0, %v5930_v17  ;;  %v6080_v11 = vmul.f32 %v9338_v9, %v5931_v44 }
 0x4e9   : > { %v5940_v53 = vunpack.c.h.bf16 %v5808_v3  ;;  %v8168_v34 = vpop.eup %8167  ;;  %v5712_v31 = vadd.bf16 1065369472, %v8166_v15  ;;  %v6232_v43 = vadd.f32 %v6231_v45, %v6084_v63  ;;  %v5941_v59 = vunpack.c.h.bf16 %v5810_v42 }
 0x4ea   : > { %v6225_v24 = vadd.f32 %v6078_v25, %v6077_v56  ;;  %v8170_v48 = vpop.eup %8169  ;;  %8179 = vrcp.bf16 %v5711_v13  ;;  %v5714_v26 = vadd.bf16 1065369472, %v8168_v34  ;;  %v5942_v55 = vunpack.c.h.bf16 %v5812_v7 }
 0x4eb   : > { %v5943_v47 = vunpack.c.h.bf16 %v5814_v29  ;;  %8181 = vrcp.bf16 %v5712_v31  ;;  %v5717_v36 = vadd.bf16 1065369472, %v8170_v48  ;;  %6233 = vadd.xlane.f32.xlu1 %v6232_v43  ;;  %v6089_v62 = vmul.f32 %v9345_v27, %v5940_v53 }
 0x4ec   : > { %v6226_v60 = vadd.f32 %v6225_v24, %v6079_v5  ;;  %8183 = vrcp.bf16 %v5714_v26  ;;  %v6090_v2 = vmul.f32 %v9334_v51, %v5941_v59  ;;  %v6091_v10 = vmul.f32 %v9336_v0, %v5942_v55 }
 0x4ed   : > { %v6092_v30 = vmul.f32 %v9338_v9, %v5943_v47  ;;  %8185 = vrcp.bf16 %v5717_v36  ;;  %v5936_v54 = vunpack.c.l.bf16 %v5808_v3  ;;  %v5937_v50 = vunpack.c.l.bf16 %v5810_v42 }
 0x4ee   : > { %v6227_v12 = vadd.f32 %v6226_v60, %v6080_v11  ;;  %v9960_v8 = vpop.eup %8171  ;;  %v6240_v6 = vadd.f32 %v6090_v2, %v6089_v62  ;;  %v5938_v18 = vunpack.c.l.bf16 %v5812_v7  ;;  %v5939_v39 = vunpack.c.l.bf16 %v5814_v29 }
 0x4ef   : > { %v5820_v57 = vmul.bf16 1065369472, %v9857_v41  ;;  %v8174_v38 = vpop.eup %8173  ;;  %v6085_v1 = vmul.f32 %v9345_v27, %v5936_v54  ;;  %v6086_v49 = vmul.f32 %v9334_v51, %v5937_v50  ;;  %v5822_v20 = vmul.bf16 1065369472, %v9901_v22 }
 0x4f0   : > { %6228 = vadd.xlane.f32.xlu0 %v6227_v12  ;;  %v5948_v14 = vunpack.c.h.bf16 %v5816_v35  ;;  %v8176_v33 = vpop.eup %8175  ;;  %v5715_v3 = vadd.bf16 1065369472, %v8174_v38  ;;  %v6241_v42 = vadd.f32 %v6240_v6, %v6091_v10  ;;  %v6087_v19 = vmul.f32 %v9336_v0, %v5938_v18 }
 0x4f1   : > { %v6088_v63 = vmul.f32 %v9338_v9, %v5939_v39  ;;  %v5716_v41 = vadd.bf16 1065369472, %v8176_v33  ;;  %v6235_v21 = vadd.f32 %v6086_v49, %v6085_v1  ;;  %v5949_v46 = vunpack.c.h.bf16 %v5818_v61 }
 0x4f2   : > { %v8178_v58 = vpop.eup %8177  ;;  %v5950_v17 = vunpack.c.h.bf16 %v5820_v57  ;;  %8187 = vrcp.bf16 %v5715_v3  ;;  %v6242_v22 = vadd.f32 %v6241_v42, %v6092_v30  ;;  %v5951_v56 = vunpack.c.h.bf16 %v5822_v20 }
 0x4f3   : > { %v5718_v44 = vadd.bf16 1065369472, %v8178_v58  ;;  %8189 = vrcp.bf16 %v5716_v41  ;;  %v6236_v23 = vadd.f32 %v6235_v21, %v6087_v19  ;;  %v6097_v45 = vmul.f32 %v9345_v27, %v5948_v14 }
 0x4f4   : > { %v6098_v25 = vmul.f32 %v9334_v51, %v5949_v46  ;;  %v5826_v7 = vmul.bf16 1065369472, %v9932_v32  ;;  %6243 = vadd.xlane.f32.xlu1 %v6242_v22  ;;  %v6099_v29 = vmul.f32 %v9336_v0, %v5950_v17  ;;  %v5944_v15 = vunpack.c.l.bf16 %v5816_v35 }
 0x4f5   : > { %8191 = vrcp.bf16 %v5718_v44  ;;  %v8180_v13 = vpop.eup %8179  ;;  %v6237_v5 = vadd.f32 %v6236_v23, %v6088_v63  ;;  %v5945_v53 = vunpack.c.l.bf16 %v5818_v61  ;;  %v5946_v34 = vunpack.c.l.bf16 %v5820_v57 }
 0x4f6   : > { %v6250_v11 = vadd.f32 %v6098_v25, %v6097_v45  ;;  %v8182_v31 = vpop.eup %8181  ;;  %v5832_v43 = vmul.bf16 1065369472, %v8180_v13  ;;  %v6100_v24 = vmul.f32 %v9338_v9, %v5951_v56  ;;  %v6093_v32 = vmul.f32 %v9345_v27, %v5944_v15  ;;  %v6129_v15 = vpop.xlane.xlu0 %6128 }
 0x4f7   : > { %v5828_v59 = vmul.bf16 1065369472, %v9917_v52  ;;  %v8184_v48 = vpop.eup %8183  ;;  %v5834_v26 = vmul.bf16 1065369472, %v8182_v31  ;;  %6238 = vadd.xlane.f32.xlu0 %v6237_v5  ;;  %v5947_v35 = vunpack.c.l.bf16 %v5822_v20  ;;  %v6094_v55 = vmul.f32 %v9334_v51, %v5945_v53 }
 0x4f8   : > { %v6251_v4 = vadd.f32 %v6250_v11, %v6099_v29  ;;  %v9984_v47 = vpop.eup %8185  ;;  %v6095_v16 = vmul.f32 %v9336_v0, %v5946_v34  ;;  %v5830_v61 = vmul.bf16 1065369472, %v9940_v28  ;;  %v5956_v36 = vunpack.c.h.bf16 %v5824_v40 }
 0x4f9   : > { %v5957_v60 = vunpack.c.h.bf16 %v5826_v7  ;;  %v6245_v2 = vadd.f32 %v6094_v55, %v6093_v32  ;;  %v5958_v52 = vunpack.c.h.bf16 %v5828_v59  ;;  %v5952_v10 = vunpack.c.l.bf16 %v5824_v40 }
 0x4fa   : > { %v6252_v62 = vadd.f32 %v6251_v4, %v6100_v24  ;;  %v5959_v30 = vunpack.c.h.bf16 %v5830_v61  ;;  %v6105_v12 = vmul.f32 %v9345_v27, %v5956_v36  ;;  %v5953_v50 = vunpack.c.l.bf16 %v5826_v7 }
 0x4fb   : > { %v6106_v54 = vmul.f32 %v9334_v51, %v5957_v60  ;;  %v6096_v6 = vmul.f32 %v9338_v9, %v5947_v35  ;;  %v6246_v28 = vadd.f32 %v6245_v2, %v6095_v16  ;;  %v5954_v18 = vunpack.c.l.bf16 %v5828_v59 }
 0x4fc   : > { %6253 = vadd.xlane.f32.xlu1 %v6252_v62  ;;  %v5955_v39 = vunpack.c.l.bf16 %v5830_v61  ;;  %v6107_v57 = vmul.f32 %v9336_v0, %v5958_v52  ;;  %v6101_v1 = vmul.f32 %v9345_v27, %v5952_v10  ;;  %v6102_v37 = vmul.f32 %v9334_v51, %v5953_v50  ;;  %v6139_v34 = vpop.xlane.xlu1 %6138 }
 0x4fd   : > { %v6260_v38 = vadd.f32 %v6106_v54, %v6105_v12  ;;  %v8188_v40 = vpop.eup %8187  ;;  %v6247_v49 = vadd.f32 %v6246_v28, %v6096_v6  ;;  %v6108_v20 = vmul.f32 %v9338_v9, %v5959_v30  ;;  %v6103_v14 = vmul.f32 %v9336_v0, %v5954_v18  ;;  %v10013_v12 = vld [vmem:[#allocation2] ss:$0 sm:$0xff]  ;;  %v6134_v54 = vpop.xlane.xlu0 %6133 }
 0x4fe   : > { %v5836_v33 = vmul.bf16 1065369472, %v9960_v8  ;;  %v8190_v3 = vpop.eup %8189  ;;  %v6104_v19 = vmul.f32 %v9338_v9, %v5955_v39  ;;  %v6255_v63 = vadd.f32 %v6102_v37, %v6101_v1  ;;  %v5838_v58 = vmul.bf16 1065369472, %v8184_v48 }
 0x4ff   : > { %v6261_v42 = vadd.f32 %v6260_v38, %v6107_v57  ;;  %v5840_v21 = vmul.bf16 1065369472, %v8188_v40  ;;  %6248 = vadd.xlane.f32.xlu0 %v6247_v49  ;;  %v5964_v46 = vunpack.c.h.bf16 %v5832_v43  ;;  %v5965_v17 = vunpack.c.h.bf16 %v5834_v26 }
 0x500   : > { %v8192_v41 = vpop.eup %8191  ;;  %v5966_v44 = vunpack.c.h.bf16 %v5836_v33  ;;  %v6256_v56 = vadd.f32 %v6255_v63, %v6103_v14  ;;  %v5967_v23 = vunpack.c.h.bf16 %v5838_v58  ;;  %v5960_v45 = vunpack.c.l.bf16 %v5832_v43 }
 0x501   : > { %v6262_v22 = vadd.f32 %v6261_v42, %v6108_v20  ;;  %v5842_v25 = vmul.bf16 1065369472, %v8190_v3  ;;  %v6113_v7 = vmul.f32 %v9345_v27, %v5964_v46  ;;  %v6114_v8 = vmul.f32 %v9334_v51, %v5965_v17 }
 0x502   : > { %v5961_v29 = vunpack.c.l.bf16 %v5834_v26  ;;  %v6257_v13 = vadd.f32 %v6256_v56, %v6104_v19  ;;  %v6115_v5 = vmul.f32 %v9336_v0, %v5966_v44  ;;  %v5962_v11 = vunpack.c.l.bf16 %v5836_v33 }
 0x503   : > { %6263 = vadd.xlane.f32.xlu1 %v6262_v22  ;;  %v5963_v53 = vunpack.c.l.bf16 %v5838_v58  ;;  %v6270_v31 = vadd.f32 %v6114_v8, %v6113_v7  ;;  %v6109_v24 = vmul.f32 %v9345_v27, %v5960_v45  ;;  %v5844_v43 = vmul.bf16 1065369472, %v9984_v47 }
 0x504   : > { %v6110_v32 = vmul.f32 %v9334_v51, %v5961_v29  ;;  %6258 = vadd.xlane.f32.xlu0 %v6257_v13  ;;  %v6116_v59 = vmul.f32 %v9338_v9, %v5967_v23  ;;  %v6111_v48 = vmul.f32 %v9336_v0, %v5962_v11  ;;  %v5846_v26 = vmul.bf16 1065369472, %v8192_v41  ;;  %v6144_v39 = vpop.xlane.xlu1 %6143 }
 0x505   : > { %v5972_v4 = vunpack.c.h.bf16 %v5840_v21  ;;  %v6271_v35 = vadd.f32 %v6270_v31, %v6115_v5  ;;  %v5973_v16 = vunpack.c.h.bf16 %v5842_v25  ;;  %v5974_v61 = vunpack.c.h.bf16 %v5844_v43 }
 0x506   : > { %v6265_v55 = vadd.f32 %v6110_v32, %v6109_v24  ;;  %v5975_v36 = vunpack.c.h.bf16 %v5846_v26  ;;  %v5968_v62 = vunpack.c.l.bf16 %v5840_v21  ;;  %v5969_v2 = vunpack.c.l.bf16 %v5842_v25 }
 0x507   : > { %v6121_v60 = vmul.f32 %v9345_v27, %v5972_v4  ;;  %v6272_v52 = vadd.f32 %v6271_v35, %v6116_v59  ;;  %v6112_v47 = vmul.f32 %v9338_v9, %v5963_v53  ;;  %v6122_v30 = vmul.f32 %v9334_v51, %v5973_v16 }
 0x508   : > { %v6266_v10 = vadd.f32 %v6265_v55, %v6111_v48  ;;  %v6123_v50 = vmul.f32 %v9336_v0, %v5974_v61  ;;  %v5970_v6 = vunpack.c.l.bf16 %v5844_v43  ;;  %v5971_v28 = vunpack.c.l.bf16 %v5846_v26 }
 0x509   : > { %v6117_v18 = vmul.f32 %v9345_v27, %v5968_v62  ;;  %6273 = vadd.xlane.f32.xlu1 %v6272_v52  ;;  %v6280_v38 = vadd.f32 %v6122_v30, %v6121_v60  ;;  %v6118_v1 = vmul.f32 %v9334_v51, %v5969_v2  ;;  %v6124_v37 = vmul.f32 %v9338_v9, %v5975_v36 }
 0x50a   : > { %v6267_v57 = vadd.f32 %v6266_v10, %v6112_v47  ;;  %v6119_v27 = vmul.f32 %v9336_v0, %v5970_v6  ;;  %v6292_v40 = vadd.f32 %v10013_v12, %v6129_v15  ;;  %v6293_v49 = vadd.f32 %v10013_v12, %v6134_v54 }
 0x50b   : > { %v6281_v51 = vadd.f32 %v6280_v38, %v6123_v50  ;;  %v6275_v20 = vadd.f32 %v6118_v1, %v6117_v18  ;;  %v6294_v14 = vadd.f32 %v10013_v12, %v6139_v34  ;;  %v6295_v33 = vadd.f32 %v10013_v12, %v6144_v39 }
 0x50c   : > { %6268 = vadd.xlane.f32.xlu0 %v6267_v57  ;;  %6325 = vst.msk [vmem:[%s10023_s15] sm:$0xff] %vm6324_vm1, %v6292_v40  ;;  %6326 = vst.msk [vmem:[%s10023_s15 + $0x8] sm:$0xff] %vm6324_vm1, %v6293_v49  ;;  %v6120_v0 = vmul.f32 %v9338_v9, %v5971_v28  ;;  %v6154_v63 = vpop.xlane.xlu1 %6153 }
 0x50d   : > { %v6282_v3 = vadd.f32 %v6281_v51, %v6124_v37  ;;  %v6276_v42 = vadd.f32 %v6275_v20, %v6119_v27  ;;  %6327 = vst.msk [vmem:[%s10023_s15 + $0x10] sm:$0xff] %vm6324_vm1, %v6294_v14  ;;  %6328 = vst.msk [vmem:[%s10023_s15 + $0x18] sm:$0xff] %vm6324_vm1, %v6295_v33  ;;  %v6297_v58 = vadd.f32 %v10013_v12, %v6154_v63  ;;  %v6149_v41 = vpop.xlane.xlu0 %6148 }
 0x50e   : > { %v6296_v21 = vadd.f32 %v10013_v12, %v6149_v41 }
 0x50f   : > { %6283 = vadd.xlane.f32.xlu1 %v6282_v3  ;;  %v6277_v19 = vadd.f32 %v6276_v42, %v6120_v0  ;;  %6330 = vst.msk [vmem:[%s10023_s15 + $0x28] sm:$0xff] %vm6324_vm1, %v6297_v58 }
 0x510   : > { %6329 = vst.msk [vmem:[%s10023_s15 + $0x20] sm:$0xff] %vm6324_vm1, %v6296_v21 }
 0x511   : > { %6278 = vadd.xlane.f32.xlu0 %v6277_v19 }
 0x519   : > { %v6164_v9 = vpop.xlane.xlu1 %6163 }
 0x51a   : > { %v6299_v46 = vadd.f32 %v10013_v12, %v6164_v9 }
 0x51c   : > { %6332 = vst.msk [vmem:[%s10023_s15 + $0x38] sm:$0xff] %vm6324_vm1, %v6299_v46 }
 0x51d   : > { %v6159_v17 = vpop.xlane.xlu0 %6158 }
 0x51e   : > { %v6298_v44 = vadd.f32 %v10013_v12, %v6159_v17 }
 0x520   : > { %6331 = vst.msk [vmem:[%s10023_s15 + $0x30] sm:$0xff] %vm6324_vm1, %v6298_v44 }
 0x526   : > { %v6174_v22 = vpop.xlane.xlu1 %6173 }
 0x527   : > { %v6301_v56 = vadd.f32 %v10013_v12, %v6174_v22 }
 0x529   : > { %6334 = vst.msk [vmem:[%s10023_s15 + $0x48] sm:$0xff] %vm6324_vm1, %v6301_v56 }
 0x52b   : > { %v6169_v23 = vpop.xlane.xlu0 %6168 }
 0x52c   : > { %v6300_v45 = vadd.f32 %v10013_v12, %v6169_v23 }
 0x52e   : > { %6333 = vst.msk [vmem:[%s10023_s15 + $0x40] sm:$0xff] %vm6324_vm1, %v6300_v45 }
 0x534   : > { %v6184_v25 = vpop.xlane.xlu1 %6183 }
 0x535   : > { %v6303_v7 = vadd.f32 %v10013_v12, %v6184_v25 }
 0x537   : > { %6336 = vst.msk [vmem:[%s10023_s15 + $0x58] sm:$0xff] %vm6324_vm1, %v6303_v7 }
 0x53a   : > { %v6179_v8 = vpop.xlane.xlu0 %6178 }
 0x53b   : > { %v6302_v29 = vadd.f32 %v10013_v12, %v6179_v8 }
 0x53d   : > { %6335 = vst.msk [vmem:[%s10023_s15 + $0x50] sm:$0xff] %vm6324_vm1, %v6302_v29 }
 0x542   : > { %v6194_v15 = vpop.xlane.xlu1 %6193 }
 0x543   : > { %v6305_v13 = vadd.f32 %v10013_v12, %v6194_v15 }
 0x545   : > { %6338 = vst.msk [vmem:[%s10023_s15 + $0x68] sm:$0xff] %vm6324_vm1, %v6305_v13 }
 0x547   : > { %v6189_v5 = vpop.xlane.xlu0 %6188 }
 0x548   : > { %v6304_v11 = vadd.f32 %v10013_v12, %v6189_v5 }
 0x54a   : > { %6337 = vst.msk [vmem:[%s10023_s15 + $0x60] sm:$0xff] %vm6324_vm1, %v6304_v11 }
 0x552   : > { %v6204_v53 = vpop.xlane.xlu1 %6203 }
 0x553   : > { %v6307_v34 = vadd.f32 %v10013_v12, %v6204_v53 }
 0x555   : > { %6340 = vst.msk [vmem:[%s10023_s15 + $0x78] sm:$0xff] %vm6324_vm1, %v6307_v34 }
 0x556   : > { %v6199_v31 = vpop.xlane.xlu0 %6198 }
 0x557   : > { %v6306_v24 = vadd.f32 %v10013_v12, %v6199_v31 }
 0x559   : > { %6339 = vst.msk [vmem:[%s10023_s15 + $0x70] sm:$0xff] %vm6324_vm1, %v6306_v24 }
 0x55f   : > { %v6214_v32 = vpop.xlane.xlu1 %6213 }
 0x560   : > { %v6309_v43 = vadd.f32 %v10013_v12, %v6214_v32 }
 0x562   : > { %6342 = vst.msk [vmem:[%s10023_s15 + $0x88] sm:$0xff] %vm6324_vm1, %v6309_v43 }
 0x564   : > { %v6209_v59 = vpop.xlane.xlu0 %6208 }
 0x565   : > { %v6308_v48 = vadd.f32 %v10013_v12, %v6209_v59 }
 0x567   : > { %6341 = vst.msk [vmem:[%s10023_s15 + $0x80] sm:$0xff] %vm6324_vm1, %v6308_v48 }
 0x56d   : > { %v6224_v26 = vpop.xlane.xlu1 %6223 }
 0x56e   : > { %v6311_v4 = vadd.f32 %v10013_v12, %v6224_v26 }
 0x570   : > { %6344 = vst.msk [vmem:[%s10023_s15 + $0x98] sm:$0xff] %vm6324_vm1, %v6311_v4 }
 0x571   : > { %v6219_v35 = vpop.xlane.xlu0 %6218 }
 0x572   : > { %v6310_v55 = vadd.f32 %v10013_v12, %v6219_v35 }
 0x574   : > { %6343 = vst.msk [vmem:[%s10023_s15 + $0x90] sm:$0xff] %vm6324_vm1, %v6310_v55 }
 0x578   : > { %v6234_v16 = vpop.xlane.xlu1 %6233 }
 0x579   : > { %v6313_v61 = vadd.f32 %v10013_v12, %v6234_v16 }
 0x57b   : > { %6346 = vst.msk [vmem:[%s10023_s15 + $0xa8] sm:$0xff] %vm6324_vm1, %v6313_v61 }
 0x57d   : > { %v6229_v36 = vpop.xlane.xlu0 %6228 }
 0x57e   : > { %v6312_v60 = vadd.f32 %v10013_v12, %v6229_v36 }
 0x580   : > { %6345 = vst.msk [vmem:[%s10023_s15 + $0xa0] sm:$0xff] %vm6324_vm1, %v6312_v60 }
 0x581   : > { %v6244_v62 = vpop.xlane.xlu1 %6243 }
 0x582   : > { %v6315_v2 = vadd.f32 %v10013_v12, %v6244_v62 }
 0x584   : > { %6348 = vst.msk [vmem:[%s10023_s15 + $0xb8] sm:$0xff] %vm6324_vm1, %v6315_v2  ;;  %v6239_v52 = vpop.xlane.xlu0 %6238 }
 0x585   : > { %v6314_v47 = vadd.f32 %v10013_v12, %v6239_v52 }
 0x587   : > { %6347 = vst.msk [vmem:[%s10023_s15 + $0xb0] sm:$0xff] %vm6324_vm1, %v6314_v47 }
 0x589   : > { %v6254_v10 = vpop.xlane.xlu1 %6253 }
 0x58a   : > { %v6317_v30 = vadd.f32 %v10013_v12, %v6254_v10 }
 0x58c   : > { %6350 = vst.msk [vmem:[%s10023_s15 + $0xc8] sm:$0xff] %vm6324_vm1, %v6317_v30  ;;  %v6249_v54 = vpop.xlane.xlu0 %6248 }
 0x58d   : > { %v6316_v50 = vadd.f32 %v10013_v12, %v6249_v54 }
 0x58f   : > { %6349 = vst.msk [vmem:[%s10023_s15 + $0xc0] sm:$0xff] %vm6324_vm1, %v6316_v50 }
 0x590   : > { %v6264_v6 = vpop.xlane.xlu1 %6263 }
 0x591   : > { %v6319_v28 = vadd.f32 %v10013_v12, %v6264_v6  ;;  %v6259_v18 = vpop.xlane.xlu0 %6258 }
 0x592   : > { %v6318_v39 = vadd.f32 %v10013_v12, %v6259_v18 }
 0x593   : > { %6352 = vst.msk [vmem:[%s10023_s15 + $0xd8] sm:$0xff] %vm6324_vm1, %v6319_v28 }
 0x594   : > { %6351 = vst.msk [vmem:[%s10023_s15 + $0xd0] sm:$0xff] %vm6324_vm1, %v6318_v39 }
 0x596   : > { %v6274_v57 = vpop.xlane.xlu1 %6273 }
 0x597   : > { %v6321_v38 = vadd.f32 %v10013_v12, %v6274_v57 }
 0x599   : > { %v6269_v1 = vpop.xlane.xlu0 %6268  ;;  %6354 = vst.msk [vmem:[%s10023_s15 + $0xe8] sm:$0xff] %vm6324_vm1, %v6321_v38 }
 0x59a   : > { %v6320_v37 = vadd.f32 %v10013_v12, %v6269_v1 }
 0x59c   : > { %6353 = vst.msk [vmem:[%s10023_s15 + $0xe0] sm:$0xff] %vm6324_vm1, %v6320_v37  ;;  %v6284_v27 = vpop.xlane.xlu1 %6283 }
 0x59d   : > { %v6323_v40 = vadd.f32 %v10013_v12, %v6284_v27 }
 0x59e   : > { %v6279_v49 = vpop.xlane.xlu0 %6278 }
 0x59f   : > { %6356 = vst.msk [vmem:[%s10023_s15 + $0xf8] sm:$0xff] %vm6324_vm1, %v6323_v40  ;;  %v6322_v51 = vadd.f32 %v10013_v12, %v6279_v49 }
 0x5a1   : > { %6355 = vst.msk [vmem:[%s10023_s15 + $0xf0] sm:$0xff] %vm6324_vm1, %v6322_v51 }
 0x5a2 PF: > { %s23_s11 = sadd.s32 1, %s8263_s11  }
 0x5a3   : > { %p20_p7 = scmp.ge.s32.totalorder %s23_s11, 4  }
 0x5a5   :  { %22 = sbr.rel (!%p20_p7) target bundleno = 5 (0x5), region = 95 }
 0x5ac   :  { %6379 = vsyncpa [#allocation4], 1 }
 0x5ad   :  { %6381 = vsyncpa [#allocation4 + $0x1], 1 }
 0x5ae   :  { %6382 = vsyncpa [#allocation6], 1 }

</bundles_post_ra>
